<compile_context>
chip_gen: v7x
topology: tpu7x:2x2x1
jax: 0.10.0
libtpu: 0.0.40
codegen_flags: <defaults>
</compile_context>

<pallas_src>
import functools

import numpy as np

import jax
import jax.numpy as jnp
from jax.experimental import pallas as pl
from jax.experimental.pallas import tpu as pltpu


_LANE = 128          # lane width: pad all matmul output channels to this
_SUBLANE = 16        # row alignment (bf16-friendly)
_VMEM_LIMIT = 32 * 1024 * 1024   # safe on v5e/v6e/v7x; tiles here are tiny
_BLOCK_M = 256       # row-tile for the matmul grid


def _ru(x, m):
    return (x + m - 1) // m * m


# ----------------------------------------------------------------------------
# Pallas kernels
# ----------------------------------------------------------------------------
def _matmul_bias_act_kernel(x_ref, w_ref, b_ref, o_ref, *, relu):
    # (tile_m, K) @ (K, Np) on the MXU (bf16 in, f32 accumulate),
    # fused per-output-channel bias (+ ReLU). BN scale is pre-folded into w.
    acc = jnp.dot(x_ref[...], w_ref[...], preferred_element_type=jnp.float32)
    y = acc + b_ref[...]
    if relu:
        y = jnp.maximum(y, 0.0)
    o_ref[...] = y.astype(o_ref.dtype)


# Tap map for a 3x3 window with stride 2 on an input split into 4 parity phases
# (ee, eo, oe, oo of the spatially padded input).  For output (i, j), the padded
# input position (2i+kh, 2j+kw) lives in phase (kh%2, kw%2) at offset
# (i + (kh==2), j + (kw==2)).  Entries are ordered k = kh*3 + kw to match the
# (3,3,C)->(9,C) weight reshape.
_TAPS_S2 = (
    (0, 0, 0), (1, 0, 0), (0, 0, 1),   # kh = 0
    (2, 0, 0), (3, 0, 0), (2, 0, 1),   # kh = 1
    (0, 1, 0), (1, 1, 0), (0, 1, 1),   # kh = 2
)


def _dw3x3_s2_kernel(pee_ref, peo_ref, poe_ref, poo_ref, w_ref, b_ref, o_ref,
                     *, relu):
    # Depthwise 3x3 stride-2 conv: sum of 9 per-channel weighted taps taken as
    # static contiguous slices of the 4 phase views.  BN scale folded into w.
    _, OH, OW, C = o_ref.shape
    phases = (pee_ref[0], peo_ref[0], poe_ref[0], poo_ref[0])  # (OH+1, OW+1, C)
    w = w_ref[...]                                             # (9, C)
    acc = jnp.zeros((OH, OW, C), jnp.float32)
    for k, (p, di, dj) in enumerate(_TAPS_S2):
        tap = phases[p][di:di + OH, dj:dj + OW, :]
        acc = acc + tap * w[k]
    y = acc + b_ref[...]
    if relu:
        y = jnp.maximum(y, 0.0)
    o_ref[0] = y.astype(o_ref.dtype)


def _maxpool3x3_s2_kernel(pee_ref, peo_ref, poe_ref, poo_ref, o_ref):
    # 3x3 stride-2 max pool over the same 9 taps (input padded with -inf).
    _, OH, OW, C = o_ref.shape
    phases = (pee_ref[0], peo_ref[0], poe_ref[0], poo_ref[0])
    out = None
    for (p, di, dj) in _TAPS_S2:
        tap = phases[p][di:di + OH, dj:dj + OW, :]
        out = tap if out is None else jnp.maximum(out, tap)
    o_ref[0] = out.astype(o_ref.dtype)


def _avgpool_fc_kernel(x_ref, w_ref, b_ref, o_ref):
    # Fused global average pool + linear layer (the tail is too small to shard).
    pooled = jnp.mean(x_ref[...], axis=1)                       # (N, C) f32
    acc = jnp.dot(pooled.astype(w_ref.dtype), w_ref[...],
                  preferred_element_type=jnp.float32)
    o_ref[...] = (acc + b_ref[...]).astype(o_ref.dtype)


# ----------------------------------------------------------------------------
# Pallas wrappers
# ----------------------------------------------------------------------------
def _matmul_bias_act(x, w, b, *, relu, block_m=_BLOCK_M):
    # x: (M, K) f32; w: (K, Np) bf16, Np multiple of 128; b: (1, Np) f32.
    M, K = x.shape
    Np = w.shape[1]
    Mp = _ru(M, _SUBLANE)
    tile_m = min(block_m, Mp)
    Mp = _ru(M, tile_m)
    if Mp != M:
        x = jnp.pad(x, ((0, Mp - M), (0, 0)))
    x = x.astype(jnp.bfloat16)            # halve activation DMA bytes, 2x MXU
    out = pl.pallas_call(
        functools.partial(_matmul_bias_act_kernel, relu=relu),
        out_shape=jax.ShapeDtypeStruct((Mp, Np), jnp.float32),
        grid=(Mp // tile_m,),
        in_specs=[
            pl.BlockSpec((tile_m, K), lambda i: (i, 0)),
            pl.BlockSpec((K, Np), lambda i: (0, 0)),
            pl.BlockSpec((1, Np), lambda i: (0, 0)),
        ],
        out_specs=pl.BlockSpec((tile_m, Np), lambda i: (i, 0)),
        compiler_params=pltpu.CompilerParams(
            dimension_semantics=("parallel",),
            vmem_limit_bytes=_VMEM_LIMIT),
    )(x, w, b)
    return out[:M]


def conv1x1_bn_act(x, p, *, relu):
    N, H, W, Cin = x.shape
    out = _matmul_bias_act(x.reshape(N * H * W, Cin), p['w'], p['b'], relu=relu)
    return out[:, :p['cout']].reshape(N, H, W, p['cout'])


def conv3x3_s2_bn_relu(x, p):
    # Dense 3x3, stride 2, padding 1 via im2col (K = 9*Cin = 27) + MXU matmul.
    N, H, W, Cin = x.shape
    OH, OW = H // 2, W // 2
    xp = jnp.pad(x, ((0, 0), (1, 1), (1, 1), (0, 0)))
    cols = [xp[:, kh:kh + 2 * (OH - 1) + 1:2, kw:kw + 2 * (OW - 1) + 1:2, :]
            .reshape(N * OH * OW, Cin)
            for kh in range(3) for kw in range(3)]
    cols = jnp.concatenate(cols, axis=1)          # (M, 9*Cin), (kh, kw, cin)
    out = _matmul_bias_act(cols, p['w'], p['b'], relu=True)
    return out[:, :p['cout']].reshape(N, OH, OW, p['cout'])


def _phase_split_s2(xp):
    # 4 parity views of the padded input; ~1x the input bytes in total
    # (replaces the old 9x (9, M, C) patch stack).
    return (xp[:, 0::2, 0::2, :], xp[:, 0::2, 1::2, :],
            xp[:, 1::2, 0::2, :], xp[:, 1::2, 1::2, :])


def dwconv3x3_s2_bn(x, p, *, relu=False):
    N, H, W, C = x.shape
    assert H % 2 == 0 and W % 2 == 0
    OH, OW = H // 2, W // 2
    xp = jnp.pad(x, ((0, 0), (1, 1), (1, 1), (0, 0)))
    phases = _phase_split_s2(xp)                  # 4 x (N, OH+1, OW+1, C)
    phase_spec = pl.BlockSpec((1, OH + 1, OW + 1, C), lambda n: (n, 0, 0, 0))
    return pl.pallas_call(
        functools.partial(_dw3x3_s2_kernel, relu=relu),
        out_shape=jax.ShapeDtypeStruct((N, OH, OW, C), jnp.float32),
        grid=(N,),
        in_specs=[phase_spec] * 4 + [
            pl.BlockSpec((9, C), lambda n: (0, 0)),
            pl.BlockSpec((1, C), lambda n: (0, 0)),
        ],
        out_specs=pl.BlockSpec((1, OH, OW, C), lambda n: (n, 0, 0, 0)),
        compiler_params=pltpu.CompilerParams(
            dimension_semantics=("parallel",),
            vmem_limit_bytes=_VMEM_LIMIT),
    )(*phases, p['taps'], p['b'])


def maxpool3x3_s2(x):
    N, H, W, C = x.shape
    assert H % 2 == 0 and W % 2 == 0
    OH, OW = H // 2, W // 2
    neg = jnp.finfo(x.dtype).min
    xp = jnp.pad(x, ((0, 0), (1, 1), (1, 1), (0, 0)), constant_values=neg)
    phases = _phase_split_s2(xp)
    phase_spec = pl.BlockSpec((1, OH + 1, OW + 1, C), lambda n: (n, 0, 0, 0))
    return pl.pallas_call(
        _maxpool3x3_s2_kernel,
        out_shape=jax.ShapeDtypeStruct((N, OH, OW, C), x.dtype),
        grid=(N,),
        in_specs=[phase_spec] * 4,
        out_specs=pl.BlockSpec((1, OH, OW, C), lambda n: (n, 0, 0, 0)),
        compiler_params=pltpu.CompilerParams(
            dimension_semantics=("parallel",),
            vmem_limit_bytes=_VMEM_LIMIT),
    )(*phases)


def avgpool_fc(x, p):
    N, H, W, C = x.shape
    xr = x.reshape(N, H * W, C)
    Np = p['w'].shape[1]
    out = pl.pallas_call(
        _avgpool_fc_kernel,
        out_shape=jax.ShapeDtypeStruct((N, Np), jnp.float32),
        grid=(1,),
        in_specs=[
            pl.BlockSpec((N, H * W, C), lambda i: (0, 0, 0)),
            pl.BlockSpec((C, Np), lambda i: (0, 0)),
            pl.BlockSpec((1, Np), lambda i: (0, 0)),
        ],
        out_specs=pl.BlockSpec((N, Np), lambda i: (0, 0)),
        compiler_params=pltpu.CompilerParams(vmem_limit_bytes=_VMEM_LIMIT),
    )(xr, p['w'], p['b'])
    return out[:, :p['cout']]


# ----------------------------------------------------------------------------
# ShuffleNetV2 forward (glue)
# ----------------------------------------------------------------------------
def shuffle_unit_s2(x, sp):
    # branch1: dw3x3(s2)+BN, 1x1+BN+ReLU
    b1 = dwconv3x3_s2_bn(x, sp['b1_dw'], relu=False)
    b1 = conv1x1_bn_act(b1, sp['b1_pw'], relu=True)
    # branch2: 1x1+BN+ReLU, dw3x3(s2)+BN, 1x1+BN+ReLU
    b2 = conv1x1_bn_act(x, sp['b2_pw1'], relu=True)
    b2 = dwconv3x3_s2_bn(b2, sp['b2_dw'], relu=False)
    b2 = conv1x1_bn_act(b2, sp['b2_pw2'], relu=True)
    # Output is kept in "cat order"; the groups=2 channel shuffle is folded into
    # the input-channel permutation of the next consumer's weights (prep time).
    return jnp.concatenate([b1, b2], axis=-1)


def shufflenet_v2_forward(x_nchw, params):
    x = jnp.transpose(x_nchw, (0, 2, 3, 1))       # NCHW -> NHWC (once)
    x = conv3x3_s2_bn_relu(x, params['conv1'])
    x = maxpool3x3_s2(x)
    # each stage == one stride-2 ShuffleUnit (reproduces make_layers behaviour)
    x = shuffle_unit_s2(x, params['stage2'])
    x = shuffle_unit_s2(x, params['stage3'])
    x = shuffle_unit_s2(x, params['stage4'])
    x = conv1x1_bn_act(x, params['conv5'], relu=True)
    return avgpool_fc(x, params['fc'])            # (N, class_num)


# ----------------------------------------------------------------------------
# Parameter prep: fold BN scale into weights, pad Cout to lane width, cast to
# bf16, fold the channel shuffle into consumer weight permutations.
# ----------------------------------------------------------------------------
def _shuffle_inverse_perm(c):
    # torch shuffle (groups=2): shuffled[2j+g] = cat[g*(c//2)+j].
    # We feed `cat` directly, so a consumer expecting `shuffled` must reindex
    # its input-channel axis by the inverse permutation Q, Q[g*(c//2)+j] = 2j+g.
    return np.arange(c).reshape(c // 2, 2).T.reshape(-1)


def _pad_lane(a, mult=_LANE):
    pad = _ru(a.shape[-1], mult) - a.shape[-1]
    if pad:
        a = jnp.pad(a, ((0, 0), (0, pad)))
    return a


def _prep_1x1(w, bn, in_perm=None):
    scale, bias = bn
    cout, cin = w.shape[0], w.shape[1]
    w_mat = w.reshape(cout, cin).T * scale[None, :]     # fold BN scale
    if in_perm is not None:
        w_mat = w_mat[in_perm, :]                       # fold channel shuffle
    return {'w': _pad_lane(w_mat).astype(jnp.bfloat16),
            'b': _pad_lane(bias.reshape(1, -1)).astype(jnp.float32),
            'cout': cout}


def _prep_3x3(w, bn):
    scale, bias = bn
    cout, cin = w.shape[0], w.shape[1]
    w_mat = jnp.transpose(w, (2, 3, 1, 0)).reshape(9 * cin, cout) * scale[None, :]
    return {'w': _pad_lane(w_mat).astype(jnp.bfloat16),
            'b': _pad_lane(bias.reshape(1, -1)).astype(jnp.float32),
            'cout': cout}


def _prep_dw(w33c, bn, in_perm=None):
    scale, bias = bn
    c = w33c.shape[-1]
    taps = w33c.reshape(9, c) * scale[None, :]
    b = bias.reshape(1, c)
    if in_perm is not None:
        taps = taps[:, in_perm]
        b = b[:, in_perm]
    return {'taps': taps.astype(jnp.float32), 'b': b.astype(jnp.float32)}


def _prep_fc(w, b):
    return {'w': _pad_lane(w.T).astype(jnp.bfloat16),
            'b': _pad_lane(b.reshape(1, -1)).astype(jnp.float32),
            'cout': w.shape[0]}


def prepare_params(raw, channel_num):
    def prep_stage(sp, in_perm):
        return {
            'b1_dw': _prep_dw(sp['b1_dw_w'], sp['b1_bn1'], in_perm),
            'b1_pw': _prep_1x1(sp['b1_pw_w'], sp['b1_bn2'], in_perm),
            'b2_pw1': _prep_1x1(sp['b2_pw1_w'], sp['b2_bn1'], in_perm),
            'b2_dw': _prep_dw(sp['b2_dw_w'], sp['b2_bn2']),
            'b2_pw2': _prep_1x1(sp['b2_pw2_w'], sp['b2_bn3']),
        }

    return {
        'conv1': _prep_3x3(raw['conv1_w'], raw['conv1_bn']),
        'stage2': prep_stage(raw['stage2'], None),
        'stage3': prep_stage(raw['stage3'], _shuffle_inverse_perm(channel_num[0])),
        'stage4': prep_stage(raw['stage4'], _shuffle_inverse_perm(channel_num[1])),
        'conv5': _prep_1x1(raw['conv5_w'], raw['conv5_bn'],
                           _shuffle_inverse_perm(channel_num[2])),
        'fc': _prep_fc(raw['fc_w'], raw['fc_b']),
    }


# ----------------------------------------------------------------------------
# Deterministic raw parameter initialization (shapes per the PyTorch __init__)
# ----------------------------------------------------------------------------
def _fold_bn(gamma, beta, mean, var, eps=1e-5):
    scale = gamma / jnp.sqrt(var + eps)
    bias = beta - mean * scale
    return scale, bias


def _bn_params(key, c):
    k1, k2, k3, k4 = jax.random.split(key, 4)
    gamma = 1.0 + 0.1 * jax.random.normal(k1, (c,), jnp.float32)
    beta = 0.1 * jax.random.normal(k2, (c,), jnp.float32)
    mean = 0.1 * jax.random.normal(k3, (c,), jnp.float32)
    var = 1.0 + 0.1 * jnp.abs(jax.random.normal(k4, (c,), jnp.float32))
    return _fold_bn(gamma, beta, mean, var)


def _init_shuffle_unit(key, in_ch, out_ch):
    mid = out_ch // 2
    keys = jax.random.split(key, 10)
    return {
        'b1_dw_w': 0.2 * jax.random.normal(keys[0], (3, 3, in_ch), jnp.float32),
        'b1_bn1': _bn_params(keys[1], in_ch),
        'b1_pw_w': 0.2 * jax.random.normal(keys[2], (mid, in_ch, 1, 1), jnp.float32),
        'b1_bn2': _bn_params(keys[3], mid),
        'b2_pw1_w': 0.2 * jax.random.normal(keys[4], (mid, in_ch, 1, 1), jnp.float32),
        'b2_bn1': _bn_params(keys[5], mid),
        'b2_dw_w': 0.2 * jax.random.normal(keys[6], (3, 3, mid), jnp.float32),
        'b2_bn2': _bn_params(keys[7], mid),
        'b2_pw2_w': 0.2 * jax.random.normal(keys[8], (mid, mid, 1, 1), jnp.float32),
        'b2_bn3': _bn_params(keys[9], mid),
    }


def init_params(key, channel_num, class_num):
    keys = jax.random.split(key, 9)
    return {
        'conv1_w': 0.2 * jax.random.normal(keys[0], (24, 3, 3, 3), jnp.float32),
        'conv1_bn': _bn_params(keys[1], 24),
        'stage2': _init_shuffle_unit(keys[2], 24, channel_num[0]),
        'stage3': _init_shuffle_unit(keys[3], channel_num[0], channel_num[1]),
        'stage4': _init_shuffle_unit(keys[4], channel_num[1], channel_num[2]),
        'conv5_w': 0.1 * jax.random.normal(keys[5], (1024, channel_num[2], 1, 1),
                                           jnp.float32),
        'conv5_bn': _bn_params(keys[6], 1024),
        'fc_w': 0.05 * jax.random.normal(keys[7], (class_num, 1024), jnp.float32),
        'fc_b': 0.05 * jax.random.normal(keys[8], (class_num,), jnp.float32),
    }


# ----------------------------------------------------------------------------
if __name__ == "__main__":
    key = jax.random.PRNGKey(0)
    k_in, k_p = jax.random.split(key)

    channel_num = [16, 32, 64]   # small ShuffleNetV2 stage widths (even)
    class_num = 10
    # input must survive 5 stride-2 halvings: 32 -> 16 -> 8 -> 4 -> 2 -> 1
    x = jax.random.normal(k_in, (2, 3, 32, 32), jnp.float32)  # NCHW like PyTorch

    raw_params = init_params(k_p, channel_num, class_num)
    params = prepare_params(raw_params, channel_num)

    fwd = jax.jit(functools.partial(shufflenet_v2_forward, params=params))
    out = fwd(x)
    jax.block_until_ready(out)

    assert out.shape == (2, class_num), out.shape
    assert out.dtype == jnp.float32
    print("KERNEL_OK")
</pallas_src>

<mosaic_0001>
module attributes {stable_mosaic.version = 11 : i64} {
  func.func @_matmul_bias_act_kernel(%arg0: i32, %arg1: memref<256x27xbf16, #tpu.memory_space<vmem>>, %arg2: memref<27x128xbf16, #tpu.memory_space<vmem>>, %arg3: memref<1x128xf32, #tpu.memory_space<vmem>>, %arg4: memref<256x128xf32, #tpu.memory_space<vmem>>) attributes {dimension_semantics = [#tpu.dimension_semantics<parallel>], iteration_bounds = array<i64: 2>, scalar_prefetch = 0 : i64, scratch_operands = 0 : i64, tpu.core_type = #tpu.core_type<tc>, window_params = [{transform_indices = @transform_0, window_bounds = array<i64: 256, 27>}, {pipeline_mode = #tpu.pipeline_mode<synchronous>, transform_indices = @transform_1, window_bounds = array<i64: 27, 128>}, {pipeline_mode = #tpu.pipeline_mode<synchronous>, transform_indices = @transform_2, window_bounds = array<i64: 1, 128>}, {transform_indices = @transform_3, window_bounds = array<i64: 256, 128>}]} {
    %c0 = arith.constant 0 : index
    %c0_0 = arith.constant 0 : index
    %0 = vector.load %arg1[%c0, %c0_0] : memref<256x27xbf16, #tpu.memory_space<vmem>>, vector<256x27xbf16>
    %c0_1 = arith.constant 0 : index
    %c0_2 = arith.constant 0 : index
    %1 = vector.load %arg2[%c0_1, %c0_2] : memref<27x128xbf16, #tpu.memory_space<vmem>>, vector<27x128xbf16>
    %cst = arith.constant dense<0.000000e+00> : vector<256x128xf32>
    %2 = tpu.matmul %0, %1, %cst {dimension_numbers = #tpu.dot_dimension_numbers<[1], [0], [0], [1], [0, 0, 1, 1], [], []>} : vector<256x27xbf16>, vector<27x128xbf16>, vector<256x128xf32> -> vector<256x128xf32>
    %c0_3 = arith.constant 0 : index
    %c0_4 = arith.constant 0 : index
    %3 = vector.load %arg3[%c0_3, %c0_4] : memref<1x128xf32, #tpu.memory_space<vmem>>, vector<1x128xf32>
    %4 = vector.broadcast %3 : vector<1x128xf32> to vector<256x128xf32>
    %5 = arith.addf %2, %4 : vector<256x128xf32>
    %cst_5 = arith.constant 0.000000e+00 : f32
    %6 = vector.broadcast %cst_5 : f32 to vector<256x128xf32>
    %7 = arith.maximumf %5, %6 : vector<256x128xf32>
    %c0_6 = arith.constant 0 : index
    %c0_7 = arith.constant 0 : index
    %8 = vector.load %arg4[%c0_6, %c0_7] : memref<256x128xf32, #tpu.memory_space<vmem>>, vector<256x128xf32>
    tpu.vector_store %arg4[%c0_6, %c0_7], %7 {strides = array<i32>} : memref<256x128xf32, #tpu.memory_space<vmem>>, vector<256x128xf32>,
    return
  }
  func.func @transform_0(%arg0: i32) -> (i32, i32) {
    %c0_i32 = arith.constant 0 : i32
    %c0_i32_0 = arith.constant 0 : i32
    return %arg0, %c0_i32 : i32, i32
  }
  func.func @transform_1(%arg0: i32) -> (i32, i32) {
    %c0_i32 = arith.constant 0 : i32
    %c0_i32_0 = arith.constant 0 : i32
    %c0_i32_1 = arith.constant 0 : i32
    return %c0_i32, %c0_i32_0 : i32, i32
  }
  func.func @transform_2(%arg0: i32) -> (i32, i32) {
    %c0_i32 = arith.constant 0 : i32
    %c0_i32_0 = arith.constant 0 : i32
    %c0_i32_1 = arith.constant 0 : i32
    return %c0_i32, %c0_i32_0 : i32, i32
  }
  func.func @transform_3(%arg0: i32) -> (i32, i32) {
    %c0_i32 = arith.constant 0 : i32
    %c0_i32_0 = arith.constant 0 : i32
    return %arg0, %c0_i32 : i32, i32
  }
}

module attributes {stable_mosaic.version = 11 : i64} {
  func.func @_maxpool3x3_s2_kernel(%arg0: i32, %arg1: memref<1x9x9x24xf32, #tpu.memory_space<vmem>>, %arg2: memref<1x9x9x24xf32, #tpu.memory_space<vmem>>, %arg3: memref<1x9x9x24xf32, #tpu.memory_space<vmem>>, %arg4: memref<1x9x9x24xf32, #tpu.memory_space<vmem>>, %arg5: memref<1x8x8x24xf32, #tpu.memory_space<vmem>>) attributes {dimension_semantics = [#tpu.dimension_semantics<parallel>], iteration_bounds = array<i64: 2>, scalar_prefetch = 0 : i64, scratch_operands = 0 : i64, tpu.core_type = #tpu.core_type<tc>, window_params = [{transform_indices = @transform_0, window_bounds = array<i64: 1, 9, 9, 24>}, {transform_indices = @transform_1, window_bounds = array<i64: 1, 9, 9, 24>}, {transform_indices = @transform_2, window_bounds = array<i64: 1, 9, 9, 24>}, {transform_indices = @transform_3, window_bounds = array<i64: 1, 9, 9, 24>}, {transform_indices = @transform_4, window_bounds = array<i64: 1, 8, 8, 24>}]} {
    %c0 = arith.constant 0 : index
    %c0_0 = arith.constant 0 : index
    %c0_1 = arith.constant 0 : index
    %c0_2 = arith.constant 0 : index
    %0 = vector.load %arg1[%c0, %c0_0, %c0_1, %c0_2] : memref<1x9x9x24xf32, #tpu.memory_space<vmem>>, vector<1x9x9x24xf32>
    %1 = vector.shape_cast %0 : vector<1x9x9x24xf32> to vector<9x9x24xf32>
    %c0_3 = arith.constant 0 : index
    %c0_4 = arith.constant 0 : index
    %c0_5 = arith.constant 0 : index
    %c0_6 = arith.constant 0 : index
    %2 = vector.load %arg2[%c0_3, %c0_4, %c0_5, %c0_6] : memref<1x9x9x24xf32, #tpu.memory_space<vmem>>, vector<1x9x9x24xf32>
    %3 = vector.shape_cast %2 : vector<1x9x9x24xf32> to vector<9x9x24xf32>
    %c0_7 = arith.constant 0 : index
    %c0_8 = arith.constant 0 : index
    %c0_9 = arith.constant 0 : index
    %c0_10 = arith.constant 0 : index
    %4 = vector.load %arg3[%c0_7, %c0_8, %c0_9, %c0_10] : memref<1x9x9x24xf32, #tpu.memory_space<vmem>>, vector<1x9x9x24xf32>
    %5 = vector.shape_cast %4 : vector<1x9x9x24xf32> to vector<9x9x24xf32>
    %c0_11 = arith.constant 0 : index
    %c0_12 = arith.constant 0 : index
    %c0_13 = arith.constant 0 : index
    %c0_14 = arith.constant 0 : index
    %6 = vector.load %arg4[%c0_11, %c0_12, %c0_13, %c0_14] : memref<1x9x9x24xf32, #tpu.memory_space<vmem>>, vector<1x9x9x24xf32>
    %7 = vector.shape_cast %6 : vector<1x9x9x24xf32> to vector<9x9x24xf32>
    %8 = vector.extract_strided_slice %1 {offsets = [0, 0, 0], sizes = [8, 8, 24], strides = [1, 1, 1]} : vector<9x9x24xf32> to vector<8x8x24xf32>
    %9 = vector.extract_strided_slice %3 {offsets = [0, 0, 0], sizes = [8, 8, 24], strides = [1, 1, 1]} : vector<9x9x24xf32> to vector<8x8x24xf32>
    %10 = arith.maximumf %8, %9 : vector<8x8x24xf32>
    %11 = vector.extract_strided_slice %1 {offsets = [0, 1, 0], sizes = [8, 8, 24], strides = [1, 1, 1]} : vector<9x9x24xf32> to vector<8x8x24xf32>
    %12 = arith.maximumf %10, %11 : vector<8x8x24xf32>
    %13 = vector.extract_strided_slice %5 {offsets = [0, 0, 0], sizes = [8, 8, 24], strides = [1, 1, 1]} : vector<9x9x24xf32> to vector<8x8x24xf32>
    %14 = arith.maximumf %12, %13 : vector<8x8x24xf32>
    %15 = vector.extract_strided_slice %7 {offsets = [0, 0, 0], sizes = [8, 8, 24], strides = [1, 1, 1]} : vector<9x9x24xf32> to vector<8x8x24xf32>
    %16 = arith.maximumf %14, %15 : vector<8x8x24xf32>
    %17 = vector.extract_strided_slice %5 {offsets = [0, 1, 0], sizes = [8, 8, 24], strides = [1, 1, 1]} : vector<9x9x24xf32> to vector<8x8x24xf32>
    %18 = arith.maximumf %16, %17 : vector<8x8x24xf32>
    %19 = vector.extract_strided_slice %1 {offsets = [1, 0, 0], sizes = [8, 8, 24], strides = [1, 1, 1]} : vector<9x9x24xf32> to vector<8x8x24xf32>
    %20 = arith.maximumf %18, %19 : vector<8x8x24xf32>
    %21 = vector.extract_strided_slice %3 {offsets = [1, 0, 0], sizes = [8, 8, 24], strides = [1, 1, 1]} : vector<9x9x24xf32> to vector<8x8x24xf32>
    %22 = arith.maximumf %20, %21 : vector<8x8x24xf32>
    %23 = vector.extract_strided_slice %1 {offsets = [1, 1, 0], sizes = [8, 8, 24], strides = [1, 1, 1]} : vector<9x9x24xf32> to vector<8x8x24xf32>
    %24 = arith.maximumf %22, %23 : vector<8x8x24xf32>
    %c0_15 = arith.constant 0 : index
    %c0_16 = arith.constant 0 : index
    %c0_17 = arith.constant 0 : index
    %c0_18 = arith.constant 0 : index
    %25 = vector.load %arg5[%c0_15, %c0_16, %c0_17, %c0_18] : memref<1x8x8x24xf32, #tpu.memory_space<vmem>>, vector<1x8x8x24xf32>
    %26 = vector.shape_cast %25 : vector<1x8x8x24xf32> to vector<8x8x24xf32>
    %27 = vector.shape_cast %24 : vector<8x8x24xf32> to vector<1x8x8x24xf32>
    tpu.vector_store %arg5[%c0_15, %c0_16, %c0_17, %c0_18], %27 {strides = array<i32>} : memref<1x8x8x24xf32, #tpu.memory_space<vmem>>, vector<1x8x8x24xf32>,
    return
  }
  func.func @transform_0(%arg0: i32) -> (i32, i32, i32, i32) {
    %c0_i32 = arith.constant 0 : i32
    %c0_i32_0 = arith.constant 0 : i32
    %c0_i32_1 = arith.constant 0 : i32
    %c0_i32_2 = arith.constant 0 : i32
    return %arg0, %c0_i32, %c0_i32_0, %c0_i32_1 : i32, i32, i32, i32
  }
  func.func @transform_1(%arg0: i32) -> (i32, i32, i32, i32) {
    %c0_i32 = arith.constant 0 : i32
    %c0_i32_0 = arith.constant 0 : i32
    %c0_i32_1 = arith.constant 0 : i32
    %c0_i32_2 = arith.constant 0 : i32
    return %arg0, %c0_i32, %c0_i32_0, %c0_i32_1 : i32, i32, i32, i32
  }
  func.func @transform_2(%arg0: i32) -> (i32, i32, i32, i32) {
    %c0_i32 = arith.constant 0 : i32
    %c0_i32_0 = arith.constant 0 : i32
    %c0_i32_1 = arith.constant 0 : i32
    %c0_i32_2 = arith.constant 0 : i32
    return %arg0, %c0_i32, %c0_i32_0, %c0_i32_1 : i32, i32, i32, i32
  }
  func.func @transform_3(%arg0: i32) -> (i32, i32, i32, i32) {
    %c0_i32 = arith.constant 0 : i32
    %c0_i32_0 = arith.constant 0 : i32
    %c0_i32_1 = arith.constant 0 : i32
    %c0_i32_2 = arith.constant 0 : i32
    return %arg0, %c0_i32, %c0_i32_0, %c0_i32_1 : i32, i32, i32, i32
  }
  func.func @transform_4(%arg0: i32) -> (i32, i32, i32, i32) {
    %c0_i32 = arith.constant 0 : i32
    %c0_i32_0 = arith.constant 0 : i32
    %c0_i32_1 = arith.constant 0 : i32
    %c0_i32_2 = arith.constant 0 : i32
    return %arg0, %c0_i32, %c0_i32_0, %c0_i32_1 : i32, i32, i32, i32
  }
}

module attributes {stable_mosaic.version = 11 : i64} {
  func.func @_dw3x3_s2_kernel(%arg0: i32, %arg1: memref<1x5x5x24xf32, #tpu.memory_space<vmem>>, %arg2: memref<1x5x5x24xf32, #tpu.memory_space<vmem>>, %arg3: memref<1x5x5x24xf32, #tpu.memory_space<vmem>>, %arg4: memref<1x5x5x24xf32, #tpu.memory_space<vmem>>, %arg5: memref<9x24xf32, #tpu.memory_space<vmem>>, %arg6: memref<1x24xf32, #tpu.memory_space<vmem>>, %arg7: memref<1x4x4x24xf32, #tpu.memory_space<vmem>>) attributes {dimension_semantics = [#tpu.dimension_semantics<parallel>], iteration_bounds = array<i64: 2>, scalar_prefetch = 0 : i64, scratch_operands = 0 : i64, tpu.core_type = #tpu.core_type<tc>, window_params = [{transform_indices = @transform_0, window_bounds = array<i64: 1, 5, 5, 24>}, {transform_indices = @transform_1, window_bounds = array<i64: 1, 5, 5, 24>}, {transform_indices = @transform_2, window_bounds = array<i64: 1, 5, 5, 24>}, {transform_indices = @transform_3, window_bounds = array<i64: 1, 5, 5, 24>}, {pipeline_mode = #tpu.pipeline_mode<synchronous>, transform_indices = @transform_4, window_bounds = array<i64: 9, 24>}, {pipeline_mode = #tpu.pipeline_mode<synchronous>, transform_indices = @transform_5, window_bounds = array<i64: 1, 24>}, {transform_indices = @transform_6, window_bounds = array<i64: 1, 4, 4, 24>}]} {
    %c0 = arith.constant 0 : index
    %c0_0 = arith.constant 0 : index
    %c0_1 = arith.constant 0 : index
    %c0_2 = arith.constant 0 : index
    %0 = vector.load %arg1[%c0, %c0_0, %c0_1, %c0_2] : memref<1x5x5x24xf32, #tpu.memory_space<vmem>>, vector<1x5x5x24xf32>
    %1 = vector.shape_cast %0 : vector<1x5x5x24xf32> to vector<5x5x24xf32>
    %c0_3 = arith.constant 0 : index
    %c0_4 = arith.constant 0 : index
    %c0_5 = arith.constant 0 : index
    %c0_6 = arith.constant 0 : index
    %2 = vector.load %arg2[%c0_3, %c0_4, %c0_5, %c0_6] : memref<1x5x5x24xf32, #tpu.memory_space<vmem>>, vector<1x5x5x24xf32>
    %3 = vector.shape_cast %2 : vector<1x5x5x24xf32> to vector<5x5x24xf32>
    %c0_7 = arith.constant 0 : index
    %c0_8 = arith.constant 0 : index
    %c0_9 = arith.constant 0 : index
    %c0_10 = arith.constant 0 : index
    %4 = vector.load %arg3[%c0_7, %c0_8, %c0_9, %c0_10] : memref<1x5x5x24xf32, #tpu.memory_space<vmem>>, vector<1x5x5x24xf32>
    %5 = vector.shape_cast %4 : vector<1x5x5x24xf32> to vector<5x5x24xf32>
    %c0_11 = arith.constant 0 : index
    %c0_12 = arith.constant 0 : index
    %c0_13 = arith.constant 0 : index
    %c0_14 = arith.constant 0 : index
    %6 = vector.load %arg4[%c0_11, %c0_12, %c0_13, %c0_14] : memref<1x5x5x24xf32, #tpu.memory_space<vmem>>, vector<1x5x5x24xf32>
    %7 = vector.shape_cast %6 : vector<1x5x5x24xf32> to vector<5x5x24xf32>
    %c0_15 = arith.constant 0 : index
    %c0_16 = arith.constant 0 : index
    %8 = vector.load %arg5[%c0_15, %c0_16] : memref<9x24xf32, #tpu.memory_space<vmem>>, vector<9x24xf32>
    %cst = arith.constant 0.000000e+00 : f32
    %9 = vector.broadcast %cst : f32 to vector<4x4x24xf32>
    %10 = vector.extract_strided_slice %1 {offsets = [0, 0, 0], sizes = [4, 4, 24], strides = [1, 1, 1]} : vector<5x5x24xf32> to vector<4x4x24xf32>
    %11 = vector.extract_strided_slice %8 {offsets = [0, 0], sizes = [1, 24], strides = [1, 1]} : vector<9x24xf32> to vector<1x24xf32>
    %12 = vector.shape_cast %11 : vector<1x24xf32> to vector<24xf32>
    %13 = vector.shape_cast %12 : vector<24xf32> to vector<1x1x24xf32>
    %14 = vector.broadcast %13 : vector<1x1x24xf32> to vector<4x4x24xf32>
    %15 = arith.mulf %10, %14 : vector<4x4x24xf32>
    %16 = arith.addf %9, %15 : vector<4x4x24xf32>
    %17 = vector.extract_strided_slice %3 {offsets = [0, 0, 0], sizes = [4, 4, 24], strides = [1, 1, 1]} : vector<5x5x24xf32> to vector<4x4x24xf32>
    %18 = vector.extract_strided_slice %8 {offsets = [1, 0], sizes = [1, 24], strides = [1, 1]} : vector<9x24xf32> to vector<1x24xf32>
    %19 = vector.shape_cast %18 : vector<1x24xf32> to vector<24xf32>
    %20 = vector.shape_cast %19 : vector<24xf32> to vector<1x1x24xf32>
    %21 = vector.broadcast %20 : vector<1x1x24xf32> to vector<4x4x24xf32>
    %22 = arith.mulf %17, %21 : vector<4x4x24xf32>
    %23 = arith.addf %16, %22 : vector<4x4x24xf32>
    %24 = vector.extract_strided_slice %1 {offsets = [0, 1, 0], sizes = [4, 4, 24], strides = [1, 1, 1]} : vector<5x5x24xf32> to vector<4x4x24xf32>
    %25 = vector.extract_strided_slice %8 {offsets = [2, 0], sizes = [1, 24], strides = [1, 1]} : vector<9x24xf32> to vector<1x24xf32>
    %26 = vector.shape_cast %25 : vector<1x24xf32> to vector<24xf32>
    %27 = vector.shape_cast %26 : vector<24xf32> to vector<1x1x24xf32>
    %28 = vector.broadcast %27 : vector<1x1x24xf32> to vector<4x4x24xf32>
    %29 = arith.mulf %24, %28 : vector<4x4x24xf32>
    %30 = arith.addf %23, %29 : vector<4x4x24xf32>
    %31 = vector.extract_strided_slice %5 {offsets = [0, 0, 0], sizes = [4, 4, 24], strides = [1, 1, 1]} : vector<5x5x24xf32> to vector<4x4x24xf32>
    %32 = vector.extract_strided_slice %8 {offsets = [3, 0], sizes = [1, 24], strides = [1, 1]} : vector<9x24xf32> to vector<1x24xf32>
    %33 = vector.shape_cast %32 : vector<1x24xf32> to vector<24xf32>
    %34 = vector.shape_cast %33 : vector<24xf32> to vector<1x1x24xf32>
    %35 = vector.broadcast %34 : vector<1x1x24xf32> to vector<4x4x24xf32>
    %36 = arith.mulf %31, %35 : vector<4x4x24xf32>
    %37 = arith.addf %30, %36 : vector<4x4x24xf32>
    %38 = vector.extract_strided_slice %7 {offsets = [0, 0, 0], sizes = [4, 4, 24], strides = [1, 1, 1]} : vector<5x5x24xf32> to vector<4x4x24xf32>
    %39 = vector.extract_strided_slice %8 {offsets = [4, 0], sizes = [1, 24], strides = [1, 1]} : vector<9x24xf32> to vector<1x24xf32>
    %40 = vector.shape_cast %39 : vector<1x24xf32> to vector<24xf32>
    %41 = vector.shape_cast %40 : vector<24xf32> to vector<1x1x24xf32>
    %42 = vector.broadcast %41 : vector<1x1x24xf32> to vector<4x4x24xf32>
    %43 = arith.mulf %38, %42 : vector<4x4x24xf32>
    %44 = arith.addf %37, %43 : vector<4x4x24xf32>
    %45 = vector.extract_strided_slice %5 {offsets = [0, 1, 0], sizes = [4, 4, 24], strides = [1, 1, 1]} : vector<5x5x24xf32> to vector<4x4x24xf32>
    %46 = vector.extract_strided_slice %8 {offsets = [5, 0], sizes = [1, 24], strides = [1, 1]} : vector<9x24xf32> to vector<1x24xf32>
    %47 = vector.shape_cast %46 : vector<1x24xf32> to vector<24xf32>
    %48 = vector.shape_cast %47 : vector<24xf32> to vector<1x1x24xf32>
    %49 = vector.broadcast %48 : vector<1x1x24xf32> to vector<4x4x24xf32>
    %50 = arith.mulf %45, %49 : vector<4x4x24xf32>
    %51 = arith.addf %44, %50 : vector<4x4x24xf32>
    %52 = vector.extract_strided_slice %1 {offsets = [1, 0, 0], sizes = [4, 4, 24], strides = [1, 1, 1]} : vector<5x5x24xf32> to vector<4x4x24xf32>
    %53 = vector.extract_strided_slice %8 {offsets = [6, 0], sizes = [1, 24], strides = [1, 1]} : vector<9x24xf32> to vector<1x24xf32>
    %54 = vector.shape_cast %53 : vector<1x24xf32> to vector<24xf32>
    %55 = vector.shape_cast %54 : vector<24xf32> to vector<1x1x24xf32>
    %56 = vector.broadcast %55 : vector<1x1x24xf32> to vector<4x4x24xf32>
    %57 = arith.mulf %52, %56 : vector<4x4x24xf32>
    %58 = arith.addf %51, %57 : vector<4x4x24xf32>
    %59 = vector.extract_strided_slice %3 {offsets = [1, 0, 0], sizes = [4, 4, 24], strides = [1, 1, 1]} : vector<5x5x24xf32> to vector<4x4x24xf32>
    %60 = vector.extract_strided_slice %8 {offsets = [7, 0], sizes = [1, 24], strides = [1, 1]} : vector<9x24xf32> to vector<1x24xf32>
    %61 = vector.shape_cast %60 : vector<1x24xf32> to vector<24xf32>
    %62 = vector.shape_cast %61 : vector<24xf32> to vector<1x1x24xf32>
    %63 = vector.broadcast %62 : vector<1x1x24xf32> to vector<4x4x24xf32>
    %64 = arith.mulf %59, %63 : vector<4x4x24xf32>
    %65 = arith.addf %58, %64 : vector<4x4x24xf32>
    %66 = vector.extract_strided_slice %1 {offsets = [1, 1, 0], sizes = [4, 4, 24], strides = [1, 1, 1]} : vector<5x5x24xf32> to vector<4x4x24xf32>
    %67 = vector.extract_strided_slice %8 {offsets = [8, 0], sizes = [1, 24], strides = [1, 1]} : vector<9x24xf32> to vector<1x24xf32>
    %68 = vector.shape_cast %67 : vector<1x24xf32> to vector<24xf32>
    %69 = vector.shape_cast %68 : vector<24xf32> to vector<1x1x24xf32>
    %70 = vector.broadcast %69 : vector<1x1x24xf32> to vector<4x4x24xf32>
    %71 = arith.mulf %66, %70 : vector<4x4x24xf32>
    %72 = arith.addf %65, %71 : vector<4x4x24xf32>
    %c0_17 = arith.constant 0 : index
    %c0_18 = arith.constant 0 : index
    %73 = vector.load %arg6[%c0_17, %c0_18] : memref<1x24xf32, #tpu.memory_space<vmem>>, vector<1x24xf32>
    %74 = vector.shape_cast %73 : vector<1x24xf32> to vector<1x1x24xf32>
    %75 = vector.broadcast %74 : vector<1x1x24xf32> to vector<4x4x24xf32>
    %76 = arith.addf %72, %75 : vector<4x4x24xf32>
    %c0_19 = arith.constant 0 : index
    %c0_20 = arith.constant 0 : index
    %c0_21 = arith.constant 0 : index
    %c0_22 = arith.constant 0 : index
    %77 = vector.load %arg7[%c0_19, %c0_20, %c0_21, %c0_22] : memref<1x4x4x24xf32, #tpu.memory_space<vmem>>, vector<1x4x4x24xf32>
    %78 = vector.shape_cast %77 : vector<1x4x4x24xf32> to vector<4x4x24xf32>
    %79 = vector.shape_cast %76 : vector<4x4x24xf32> to vector<1x4x4x24xf32>
    tpu.vector_store %arg7[%c0_19, %c0_20, %c0_21, %c0_22], %79 {strides = array<i32>} : memref<1x4x4x24xf32, #tpu.memory_space<vmem>>, vector<1x4x4x24xf32>,
    return
  }
  func.func @transform_0(%arg0: i32) -> (i32, i32, i32, i32) {
    %c0_i32 = arith.constant 0 : i32
    %c0_i32_0 = arith.constant 0 : i32
    %c0_i32_1 = arith.constant 0 : i32
    %c0_i32_2 = arith.constant 0 : i32
    return %arg0, %c0_i32, %c0_i32_0, %c0_i32_1 : i32, i32, i32, i32
  }
  func.func @transform_1(%arg0: i32) -> (i32, i32, i32, i32) {
    %c0_i32 = arith.constant 0 : i32
    %c0_i32_0 = arith.constant 0 : i32
    %c0_i32_1 = arith.constant 0 : i32
    %c0_i32_2 = arith.constant 0 : i32
    return %arg0, %c0_i32, %c0_i32_0, %c0_i32_1 : i32, i32, i32, i32
  }
  func.func @transform_2(%arg0: i32) -> (i32, i32, i32, i32) {
    %c0_i32 = arith.constant 0 : i32
    %c0_i32_0 = arith.constant 0 : i32
    %c0_i32_1 = arith.constant 0 : i32
    %c0_i32_2 = arith.constant 0 : i32
    return %arg0, %c0_i32, %c0_i32_0, %c0_i32_1 : i32, i32, i32, i32
  }
  func.func @transform_3(%arg0: i32) -> (i32, i32, i32, i32) {
    %c0_i32 = arith.constant 0 : i32
    %c0_i32_0 = arith.constant 0 : i32
    %c0_i32_1 = arith.constant 0 : i32
    %c0_i32_2 = arith.constant 0 : i32
    return %arg0, %c0_i32, %c0_i32_0, %c0_i32_1 : i32, i32, i32, i32
  }
  func.func @transform_4(%arg0: i32) -> (i32, i32) {
    %c0_i32 = arith.constant 0 : i32
    %c0_i32_0 = arith.constant 0 : i32
    %c0_i32_1 = arith.constant 0 : i32
    return %c0_i32, %c0_i32_0 : i32, i32
  }
  func.func @transform_5(%arg0: i32) -> (i32, i32) {
    %c0_i32 = arith.constant 0 : i32
    %c0_i32_0 = arith.constant 0 : i32
    %c0_i32_1 = arith.constant 0 : i32
    return %c0_i32, %c0_i32_0 : i32, i32
  }
  func.func @transform_6(%arg0: i32) -> (i32, i32, i32, i32) {
    %c0_i32 = arith.constant 0 : i32
    %c0_i32_0 = arith.constant 0 : i32
    %c0_i32_1 = arith.constant 0 : i32
    %c0_i32_2 = arith.constant 0 : i32
    return %arg0, %c0_i32, %c0_i32_0, %c0_i32_1 : i32, i32, i32, i32
  }
}

module attributes {stable_mosaic.version = 11 : i64} {
  func.func @_matmul_bias_act_kernel(%arg0: i32, %arg1: memref<32x24xbf16, #tpu.memory_space<vmem>>, %arg2: memref<24x128xbf16, #tpu.memory_space<vmem>>, %arg3: memref<1x128xf32, #tpu.memory_space<vmem>>, %arg4: memref<32x128xf32, #tpu.memory_space<vmem>>) attributes {dimension_semantics = [#tpu.dimension_semantics<parallel>], iteration_bounds = array<i64: 1>, scalar_prefetch = 0 : i64, scratch_operands = 0 : i64, tpu.core_type = #tpu.core_type<tc>, window_params = [{transform_indices = @transform_0, window_bounds = array<i64: 32, 24>}, {pipeline_mode = #tpu.pipeline_mode<synchronous>, transform_indices = @transform_1, window_bounds = array<i64: 24, 128>}, {pipeline_mode = #tpu.pipeline_mode<synchronous>, transform_indices = @transform_2, window_bounds = array<i64: 1, 128>}, {transform_indices = @transform_3, window_bounds = array<i64: 32, 128>}]} {
    %c0 = arith.constant 0 : index
    %c0_0 = arith.constant 0 : index
    %0 = vector.load %arg1[%c0, %c0_0] : memref<32x24xbf16, #tpu.memory_space<vmem>>, vector<32x24xbf16>
    %c0_1 = arith.constant 0 : index
    %c0_2 = arith.constant 0 : index
    %1 = vector.load %arg2[%c0_1, %c0_2] : memref<24x128xbf16, #tpu.memory_space<vmem>>, vector<24x128xbf16>
    %cst = arith.constant dense<0.000000e+00> : vector<32x128xf32>
    %2 = tpu.matmul %0, %1, %cst {dimension_numbers = #tpu.dot_dimension_numbers<[1], [0], [0], [1], [0, 0, 1, 1], [], []>} : vector<32x24xbf16>, vector<24x128xbf16>, vector<32x128xf32> -> vector<32x128xf32>
    %c0_3 = arith.constant 0 : index
    %c0_4 = arith.constant 0 : index
    %3 = vector.load %arg3[%c0_3, %c0_4] : memref<1x128xf32, #tpu.memory_space<vmem>>, vector<1x128xf32>
    %4 = vector.broadcast %3 : vector<1x128xf32> to vector<32x128xf32>
    %5 = arith.addf %2, %4 : vector<32x128xf32>
    %cst_5 = arith.constant 0.000000e+00 : f32
    %6 = vector.broadcast %cst_5 : f32 to vector<32x128xf32>
    %7 = arith.maximumf %5, %6 : vector<32x128xf32>
    %c0_6 = arith.constant 0 : index
    %c0_7 = arith.constant 0 : index
    %8 = vector.load %arg4[%c0_6, %c0_7] : memref<32x128xf32, #tpu.memory_space<vmem>>, vector<32x128xf32>
    tpu.vector_store %arg4[%c0_6, %c0_7], %7 {strides = array<i32>} : memref<32x128xf32, #tpu.memory_space<vmem>>, vector<32x128xf32>,
    return
  }
  func.func @transform_0(%arg0: i32) -> (i32, i32) {
    %c0_i32 = arith.constant 0 : i32
    %c0_i32_0 = arith.constant 0 : i32
    return %arg0, %c0_i32 : i32, i32
  }
  func.func @transform_1(%arg0: i32) -> (i32, i32) {
    %c0_i32 = arith.constant 0 : i32
    %c0_i32_0 = arith.constant 0 : i32
    %c0_i32_1 = arith.constant 0 : i32
    return %c0_i32, %c0_i32_0 : i32, i32
  }
  func.func @transform_2(%arg0: i32) -> (i32, i32) {
    %c0_i32 = arith.constant 0 : i32
    %c0_i32_0 = arith.constant 0 : i32
    %c0_i32_1 = arith.constant 0 : i32
    return %c0_i32, %c0_i32_0 : i32, i32
  }
  func.func @transform_3(%arg0: i32) -> (i32, i32) {
    %c0_i32 = arith.constant 0 : i32
    %c0_i32_0 = arith.constant 0 : i32
    return %arg0, %c0_i32 : i32, i32
  }
}

module attributes {stable_mosaic.version = 11 : i64} {
  func.func @_matmul_bias_act_kernel(%arg0: i32, %arg1: memref<128x24xbf16, #tpu.memory_space<vmem>>, %arg2: memref<24x128xbf16, #tpu.memory_space<vmem>>, %arg3: memref<1x128xf32, #tpu.memory_space<vmem>>, %arg4: memref<128x128xf32, #tpu.memory_space<vmem>>) attributes {dimension_semantics = [#tpu.dimension_semantics<parallel>], iteration_bounds = array<i64: 1>, scalar_prefetch = 0 : i64, scratch_operands = 0 : i64, tpu.core_type = #tpu.core_type<tc>, window_params = [{transform_indices = @transform_0, window_bounds = array<i64: 128, 24>}, {pipeline_mode = #tpu.pipeline_mode<synchronous>, transform_indices = @transform_1, window_bounds = array<i64: 24, 128>}, {pipeline_mode = #tpu.pipeline_mode<synchronous>, transform_indices = @transform_2, window_bounds = array<i64: 1, 128>}, {transform_indices = @transform_3, window_bounds = array<i64: 128, 128>}]} {
    %c0 = arith.constant 0 : index
    %c0_0 = arith.constant 0 : index
    %0 = vector.load %arg1[%c0, %c0_0] : memref<128x24xbf16, #tpu.memory_space<vmem>>, vector<128x24xbf16>
    %c0_1 = arith.constant 0 : index
    %c0_2 = arith.constant 0 : index
    %1 = vector.load %arg2[%c0_1, %c0_2] : memref<24x128xbf16, #tpu.memory_space<vmem>>, vector<24x128xbf16>
    %cst = arith.constant dense<0.000000e+00> : vector<128x128xf32>
    %2 = tpu.matmul %0, %1, %cst {dimension_numbers = #tpu.dot_dimension_numbers<[1], [0], [0], [1], [0, 0, 1, 1], [], []>} : vector<128x24xbf16>, vector<24x128xbf16>, vector<128x128xf32> -> vector<128x128xf32>
    %c0_3 = arith.constant 0 : index
    %c0_4 = arith.constant 0 : index
    %3 = vector.load %arg3[%c0_3, %c0_4] : memref<1x128xf32, #tpu.memory_space<vmem>>, vector<1x128xf32>
    %4 = vector.broadcast %3 : vector<1x128xf32> to vector<128x128xf32>
    %5 = arith.addf %2, %4 : vector<128x128xf32>
    %cst_5 = arith.constant 0.000000e+00 : f32
    %6 = vector.broadcast %cst_5 : f32 to vector<128x128xf32>
    %7 = arith.maximumf %5, %6 : vector<128x128xf32>
    %c0_6 = arith.constant 0 : index
    %c0_7 = arith.constant 0 : index
    %8 = vector.load %arg4[%c0_6, %c0_7] : memref<128x128xf32, #tpu.memory_space<vmem>>, vector<128x128xf32>
    tpu.vector_store %arg4[%c0_6, %c0_7], %7 {strides = array<i32>} : memref<128x128xf32, #tpu.memory_space<vmem>>, vector<128x128xf32>,
    return
  }
  func.func @transform_0(%arg0: i32) -> (i32, i32) {
    %c0_i32 = arith.constant 0 : i32
    %c0_i32_0 = arith.constant 0 : i32
    return %arg0, %c0_i32 : i32, i32
  }
  func.func @transform_1(%arg0: i32) -> (i32, i32) {
    %c0_i32 = arith.constant 0 : i32
    %c0_i32_0 = arith.constant 0 : i32
    %c0_i32_1 = arith.constant 0 : i32
    return %c0_i32, %c0_i32_0 : i32, i32
  }
  func.func @transform_2(%arg0: i32) -> (i32, i32) {
    %c0_i32 = arith.constant 0 : i32
    %c0_i32_0 = arith.constant 0 : i32
    %c0_i32_1 = arith.constant 0 : i32
    return %c0_i32, %c0_i32_0 : i32, i32
  }
  func.func @transform_3(%arg0: i32) -> (i32, i32) {
    %c0_i32 = arith.constant 0 : i32
    %c0_i32_0 = arith.constant 0 : i32
    return %arg0, %c0_i32 : i32, i32
  }
}

module attributes {stable_mosaic.version = 11 : i64} {
  func.func @_dw3x3_s2_kernel(%arg0: i32, %arg1: memref<1x5x5x8xf32, #tpu.memory_space<vmem>>, %arg2: memref<1x5x5x8xf32, #tpu.memory_space<vmem>>, %arg3: memref<1x5x5x8xf32, #tpu.memory_space<vmem>>, %arg4: memref<1x5x5x8xf32, #tpu.memory_space<vmem>>, %arg5: memref<9x8xf32, #tpu.memory_space<vmem>>, %arg6: memref<1x8xf32, #tpu.memory_space<vmem>>, %arg7: memref<1x4x4x8xf32, #tpu.memory_space<vmem>>) attributes {dimension_semantics = [#tpu.dimension_semantics<parallel>], iteration_bounds = array<i64: 2>, scalar_prefetch = 0 : i64, scratch_operands = 0 : i64, tpu.core_type = #tpu.core_type<tc>, window_params = [{transform_indices = @transform_0, window_bounds = array<i64: 1, 5, 5, 8>}, {transform_indices = @transform_1, window_bounds = array<i64: 1, 5, 5, 8>}, {transform_indices = @transform_2, window_bounds = array<i64: 1, 5, 5, 8>}, {transform_indices = @transform_3, window_bounds = array<i64: 1, 5, 5, 8>}, {pipeline_mode = #tpu.pipeline_mode<synchronous>, transform_indices = @transform_4, window_bounds = array<i64: 9, 8>}, {pipeline_mode = #tpu.pipeline_mode<synchronous>, transform_indices = @transform_5, window_bounds = array<i64: 1, 8>}, {transform_indices = @transform_6, window_bounds = array<i64: 1, 4, 4, 8>}]} {
    %c0 = arith.constant 0 : index
    %c0_0 = arith.constant 0 : index
    %c0_1 = arith.constant 0 : index
    %c0_2 = arith.constant 0 : index
    %0 = vector.load %arg1[%c0, %c0_0, %c0_1, %c0_2] : memref<1x5x5x8xf32, #tpu.memory_space<vmem>>, vector<1x5x5x8xf32>
    %1 = vector.shape_cast %0 : vector<1x5x5x8xf32> to vector<5x5x8xf32>
    %c0_3 = arith.constant 0 : index
    %c0_4 = arith.constant 0 : index
    %c0_5 = arith.constant 0 : index
    %c0_6 = arith.constant 0 : index
    %2 = vector.load %arg2[%c0_3, %c0_4, %c0_5, %c0_6] : memref<1x5x5x8xf32, #tpu.memory_space<vmem>>, vector<1x5x5x8xf32>
    %3 = vector.shape_cast %2 : vector<1x5x5x8xf32> to vector<5x5x8xf32>
    %c0_7 = arith.constant 0 : index
    %c0_8 = arith.constant 0 : index
    %c0_9 = arith.constant 0 : index
    %c0_10 = arith.constant 0 : index
    %4 = vector.load %arg3[%c0_7, %c0_8, %c0_9, %c0_10] : memref<1x5x5x8xf32, #tpu.memory_space<vmem>>, vector<1x5x5x8xf32>
    %5 = vector.shape_cast %4 : vector<1x5x5x8xf32> to vector<5x5x8xf32>
    %c0_11 = arith.constant 0 : index
    %c0_12 = arith.constant 0 : index
    %c0_13 = arith.constant 0 : index
    %c0_14 = arith.constant 0 : index
    %6 = vector.load %arg4[%c0_11, %c0_12, %c0_13, %c0_14] : memref<1x5x5x8xf32, #tpu.memory_space<vmem>>, vector<1x5x5x8xf32>
    %7 = vector.shape_cast %6 : vector<1x5x5x8xf32> to vector<5x5x8xf32>
    %c0_15 = arith.constant 0 : index
    %c0_16 = arith.constant 0 : index
    %8 = vector.load %arg5[%c0_15, %c0_16] : memref<9x8xf32, #tpu.memory_space<vmem>>, vector<9x8xf32>
    %cst = arith.constant 0.000000e+00 : f32
    %9 = vector.broadcast %cst : f32 to vector<4x4x8xf32>
    %10 = vector.extract_strided_slice %1 {offsets = [0, 0, 0], sizes = [4, 4, 8], strides = [1, 1, 1]} : vector<5x5x8xf32> to vector<4x4x8xf32>
    %11 = vector.extract_strided_slice %8 {offsets = [0, 0], sizes = [1, 8], strides = [1, 1]} : vector<9x8xf32> to vector<1x8xf32>
    %12 = vector.shape_cast %11 : vector<1x8xf32> to vector<8xf32>
    %13 = vector.shape_cast %12 : vector<8xf32> to vector<1x1x8xf32>
    %14 = vector.broadcast %13 : vector<1x1x8xf32> to vector<4x4x8xf32>
    %15 = arith.mulf %10, %14 : vector<4x4x8xf32>
    %16 = arith.addf %9, %15 : vector<4x4x8xf32>
    %17 = vector.extract_strided_slice %3 {offsets = [0, 0, 0], sizes = [4, 4, 8], strides = [1, 1, 1]} : vector<5x5x8xf32> to vector<4x4x8xf32>
    %18 = vector.extract_strided_slice %8 {offsets = [1, 0], sizes = [1, 8], strides = [1, 1]} : vector<9x8xf32> to vector<1x8xf32>
    %19 = vector.shape_cast %18 : vector<1x8xf32> to vector<8xf32>
    %20 = vector.shape_cast %19 : vector<8xf32> to vector<1x1x8xf32>
    %21 = vector.broadcast %20 : vector<1x1x8xf32> to vector<4x4x8xf32>
    %22 = arith.mulf %17, %21 : vector<4x4x8xf32>
    %23 = arith.addf %16, %22 : vector<4x4x8xf32>
    %24 = vector.extract_strided_slice %1 {offsets = [0, 1, 0], sizes = [4, 4, 8], strides = [1, 1, 1]} : vector<5x5x8xf32> to vector<4x4x8xf32>
    %25 = vector.extract_strided_slice %8 {offsets = [2, 0], sizes = [1, 8], strides = [1, 1]} : vector<9x8xf32> to vector<1x8xf32>
    %26 = vector.shape_cast %25 : vector<1x8xf32> to vector<8xf32>
    %27 = vector.shape_cast %26 : vector<8xf32> to vector<1x1x8xf32>
    %28 = vector.broadcast %27 : vector<1x1x8xf32> to vector<4x4x8xf32>
    %29 = arith.mulf %24, %28 : vector<4x4x8xf32>
    %30 = arith.addf %23, %29 : vector<4x4x8xf32>
    %31 = vector.extract_strided_slice %5 {offsets = [0, 0, 0], sizes = [4, 4, 8], strides = [1, 1, 1]} : vector<5x5x8xf32> to vector<4x4x8xf32>
    %32 = vector.extract_strided_slice %8 {offsets = [3, 0], sizes = [1, 8], strides = [1, 1]} : vector<9x8xf32> to vector<1x8xf32>
    %33 = vector.shape_cast %32 : vector<1x8xf32> to vector<8xf32>
    %34 = vector.shape_cast %33 : vector<8xf32> to vector<1x1x8xf32>
    %35 = vector.broadcast %34 : vector<1x1x8xf32> to vector<4x4x8xf32>
    %36 = arith.mulf %31, %35 : vector<4x4x8xf32>
    %37 = arith.addf %30, %36 : vector<4x4x8xf32>
    %38 = vector.extract_strided_slice %7 {offsets = [0, 0, 0], sizes = [4, 4, 8], strides = [1, 1, 1]} : vector<5x5x8xf32> to vector<4x4x8xf32>
    %39 = vector.extract_strided_slice %8 {offsets = [4, 0], sizes = [1, 8], strides = [1, 1]} : vector<9x8xf32> to vector<1x8xf32>
    %40 = vector.shape_cast %39 : vector<1x8xf32> to vector<8xf32>
    %41 = vector.shape_cast %40 : vector<8xf32> to vector<1x1x8xf32>
    %42 = vector.broadcast %41 : vector<1x1x8xf32> to vector<4x4x8xf32>
    %43 = arith.mulf %38, %42 : vector<4x4x8xf32>
    %44 = arith.addf %37, %43 : vector<4x4x8xf32>
    %45 = vector.extract_strided_slice %5 {offsets = [0, 1, 0], sizes = [4, 4, 8], strides = [1, 1, 1]} : vector<5x5x8xf32> to vector<4x4x8xf32>
    %46 = vector.extract_strided_slice %8 {offsets = [5, 0], sizes = [1, 8], strides = [1, 1]} : vector<9x8xf32> to vector<1x8xf32>
    %47 = vector.shape_cast %46 : vector<1x8xf32> to vector<8xf32>
    %48 = vector.shape_cast %47 : vector<8xf32> to vector<1x1x8xf32>
    %49 = vector.broadcast %48 : vector<1x1x8xf32> to vector<4x4x8xf32>
    %50 = arith.mulf %45, %49 : vector<4x4x8xf32>
    %51 = arith.addf %44, %50 : vector<4x4x8xf32>
    %52 = vector.extract_strided_slice %1 {offsets = [1, 0, 0], sizes = [4, 4, 8], strides = [1, 1, 1]} : vector<5x5x8xf32> to vector<4x4x8xf32>
    %53 = vector.extract_strided_slice %8 {offsets = [6, 0], sizes = [1, 8], strides = [1, 1]} : vector<9x8xf32> to vector<1x8xf32>
    %54 = vector.shape_cast %53 : vector<1x8xf32> to vector<8xf32>
    %55 = vector.shape_cast %54 : vector<8xf32> to vector<1x1x8xf32>
    %56 = vector.broadcast %55 : vector<1x1x8xf32> to vector<4x4x8xf32>
    %57 = arith.mulf %52, %56 : vector<4x4x8xf32>
    %58 = arith.addf %51, %57 : vector<4x4x8xf32>
    %59 = vector.extract_strided_slice %3 {offsets = [1, 0, 0], sizes = [4, 4, 8], strides = [1, 1, 1]} : vector<5x5x8xf32> to vector<4x4x8xf32>
    %60 = vector.extract_strided_slice %8 {offsets = [7, 0], sizes = [1, 8], strides = [1, 1]} : vector<9x8xf32> to vector<1x8xf32>
    %61 = vector.shape_cast %60 : vector<1x8xf32> to vector<8xf32>
    %62 = vector.shape_cast %61 : vector<8xf32> to vector<1x1x8xf32>
    %63 = vector.broadcast %62 : vector<1x1x8xf32> to vector<4x4x8xf32>
    %64 = arith.mulf %59, %63 : vector<4x4x8xf32>
    %65 = arith.addf %58, %64 : vector<4x4x8xf32>
    %66 = vector.extract_strided_slice %1 {offsets = [1, 1, 0], sizes = [4, 4, 8], strides = [1, 1, 1]} : vector<5x5x8xf32> to vector<4x4x8xf32>
    %67 = vector.extract_strided_slice %8 {offsets = [8, 0], sizes = [1, 8], strides = [1, 1]} : vector<9x8xf32> to vector<1x8xf32>
    %68 = vector.shape_cast %67 : vector<1x8xf32> to vector<8xf32>
    %69 = vector.shape_cast %68 : vector<8xf32> to vector<1x1x8xf32>
    %70 = vector.broadcast %69 : vector<1x1x8xf32> to vector<4x4x8xf32>
    %71 = arith.mulf %66, %70 : vector<4x4x8xf32>
    %72 = arith.addf %65, %71 : vector<4x4x8xf32>
    %c0_17 = arith.constant 0 : index
    %c0_18 = arith.constant 0 : index
    %73 = vector.load %arg6[%c0_17, %c0_18] : memref<1x8xf32, #tpu.memory_space<vmem>>, vector<1x8xf32>
    %74 = vector.shape_cast %73 : vector<1x8xf32> to vector<1x1x8xf32>
    %75 = vector.broadcast %74 : vector<1x1x8xf32> to vector<4x4x8xf32>
    %76 = arith.addf %72, %75 : vector<4x4x8xf32>
    %c0_19 = arith.constant 0 : index
    %c0_20 = arith.constant 0 : index
    %c0_21 = arith.constant 0 : index
    %c0_22 = arith.constant 0 : index
    %77 = vector.load %arg7[%c0_19, %c0_20, %c0_21, %c0_22] : memref<1x4x4x8xf32, #tpu.memory_space<vmem>>, vector<1x4x4x8xf32>
    %78 = vector.shape_cast %77 : vector<1x4x4x8xf32> to vector<4x4x8xf32>
    %79 = vector.shape_cast %76 : vector<4x4x8xf32> to vector<1x4x4x8xf32>
    tpu.vector_store %arg7[%c0_19, %c0_20, %c0_21, %c0_22], %79 {strides = array<i32>} : memref<1x4x4x8xf32, #tpu.memory_space<vmem>>, vector<1x4x4x8xf32>,
    return
  }
  func.func @transform_0(%arg0: i32) -> (i32, i32, i32, i32) {
    %c0_i32 = arith.constant 0 : i32
    %c0_i32_0 = arith.constant 0 : i32
    %c0_i32_1 = arith.constant 0 : i32
    %c0_i32_2 = arith.constant 0 : i32
    return %arg0, %c0_i32, %c0_i32_0, %c0_i32_1 : i32, i32, i32, i32
  }
  func.func @transform_1(%arg0: i32) -> (i32, i32, i32, i32) {
    %c0_i32 = arith.constant 0 : i32
    %c0_i32_0 = arith.constant 0 : i32
    %c0_i32_1 = arith.constant 0 : i32
    %c0_i32_2 = arith.constant 0 : i32
    return %arg0, %c0_i32, %c0_i32_0, %c0_i32_1 : i32, i32, i32, i32
  }
  func.func @transform_2(%arg0: i32) -> (i32, i32, i32, i32) {
    %c0_i32 = arith.constant 0 : i32
    %c0_i32_0 = arith.constant 0 : i32
    %c0_i32_1 = arith.constant 0 : i32
    %c0_i32_2 = arith.constant 0 : i32
    return %arg0, %c0_i32, %c0_i32_0, %c0_i32_1 : i32, i32, i32, i32
  }
  func.func @transform_3(%arg0: i32) -> (i32, i32, i32, i32) {
    %c0_i32 = arith.constant 0 : i32
    %c0_i32_0 = arith.constant 0 : i32
    %c0_i32_1 = arith.constant 0 : i32
    %c0_i32_2 = arith.constant 0 : i32
    return %arg0, %c0_i32, %c0_i32_0, %c0_i32_1 : i32, i32, i32, i32
  }
  func.func @transform_4(%arg0: i32) -> (i32, i32) {
    %c0_i32 = arith.constant 0 : i32
    %c0_i32_0 = arith.constant 0 : i32
    %c0_i32_1 = arith.constant 0 : i32
    return %c0_i32, %c0_i32_0 : i32, i32
  }
  func.func @transform_5(%arg0: i32) -> (i32, i32) {
    %c0_i32 = arith.constant 0 : i32
    %c0_i32_0 = arith.constant 0 : i32
    %c0_i32_1 = arith.constant 0 : i32
    return %c0_i32, %c0_i32_0 : i32, i32
  }
  func.func @transform_6(%arg0: i32) -> (i32, i32, i32, i32) {
    %c0_i32 = arith.constant 0 : i32
    %c0_i32_0 = arith.constant 0 : i32
    %c0_i32_1 = arith.constant 0 : i32
    %c0_i32_2 = arith.constant 0 : i32
    return %arg0, %c0_i32, %c0_i32_0, %c0_i32_1 : i32, i32, i32, i32
  }
}

module attributes {stable_mosaic.version = 11 : i64} {
  func.func @_matmul_bias_act_kernel(%arg0: i32, %arg1: memref<32x8xbf16, #tpu.memory_space<vmem>>, %arg2: memref<8x128xbf16, #tpu.memory_space<vmem>>, %arg3: memref<1x128xf32, #tpu.memory_space<vmem>>, %arg4: memref<32x128xf32, #tpu.memory_space<vmem>>) attributes {dimension_semantics = [#tpu.dimension_semantics<parallel>], iteration_bounds = array<i64: 1>, scalar_prefetch = 0 : i64, scratch_operands = 0 : i64, tpu.core_type = #tpu.core_type<tc>, window_params = [{transform_indices = @transform_0, window_bounds = array<i64: 32, 8>}, {pipeline_mode = #tpu.pipeline_mode<synchronous>, transform_indices = @transform_1, window_bounds = array<i64: 8, 128>}, {pipeline_mode = #tpu.pipeline_mode<synchronous>, transform_indices = @transform_2, window_bounds = array<i64: 1, 128>}, {transform_indices = @transform_3, window_bounds = array<i64: 32, 128>}]} {
    %c0 = arith.constant 0 : index
    %c0_0 = arith.constant 0 : index
    %0 = vector.load %arg1[%c0, %c0_0] : memref<32x8xbf16, #tpu.memory_space<vmem>>, vector<32x8xbf16>
    %c0_1 = arith.constant 0 : index
    %c0_2 = arith.constant 0 : index
    %1 = vector.load %arg2[%c0_1, %c0_2] : memref<8x128xbf16, #tpu.memory_space<vmem>>, vector<8x128xbf16>
    %cst = arith.constant dense<0.000000e+00> : vector<32x128xf32>
    %2 = tpu.matmul %0, %1, %cst {dimension_numbers = #tpu.dot_dimension_numbers<[1], [0], [0], [1], [0, 0, 1, 1], [], []>} : vector<32x8xbf16>, vector<8x128xbf16>, vector<32x128xf32> -> vector<32x128xf32>
    %c0_3 = arith.constant 0 : index
    %c0_4 = arith.constant 0 : index
    %3 = vector.load %arg3[%c0_3, %c0_4] : memref<1x128xf32, #tpu.memory_space<vmem>>, vector<1x128xf32>
    %4 = vector.broadcast %3 : vector<1x128xf32> to vector<32x128xf32>
    %5 = arith.addf %2, %4 : vector<32x128xf32>
    %cst_5 = arith.constant 0.000000e+00 : f32
    %6 = vector.broadcast %cst_5 : f32 to vector<32x128xf32>
    %7 = arith.maximumf %5, %6 : vector<32x128xf32>
    %c0_6 = arith.constant 0 : index
    %c0_7 = arith.constant 0 : index
    %8 = vector.load %arg4[%c0_6, %c0_7] : memref<32x128xf32, #tpu.memory_space<vmem>>, vector<32x128xf32>
    tpu.vector_store %arg4[%c0_6, %c0_7], %7 {strides = array<i32>} : memref<32x128xf32, #tpu.memory_space<vmem>>, vector<32x128xf32>,
    return
  }
  func.func @transform_0(%arg0: i32) -> (i32, i32) {
    %c0_i32 = arith.constant 0 : i32
    %c0_i32_0 = arith.constant 0 : i32
    return %arg0, %c0_i32 : i32, i32
  }
  func.func @transform_1(%arg0: i32) -> (i32, i32) {
    %c0_i32 = arith.constant 0 : i32
    %c0_i32_0 = arith.constant 0 : i32
    %c0_i32_1 = arith.constant 0 : i32
    return %c0_i32, %c0_i32_0 : i32, i32
  }
  func.func @transform_2(%arg0: i32) -> (i32, i32) {
    %c0_i32 = arith.constant 0 : i32
    %c0_i32_0 = arith.constant 0 : i32
    %c0_i32_1 = arith.constant 0 : i32
    return %c0_i32, %c0_i32_0 : i32, i32
  }
  func.func @transform_3(%arg0: i32) -> (i32, i32) {
    %c0_i32 = arith.constant 0 : i32
    %c0_i32_0 = arith.constant 0 : i32
    return %arg0, %c0_i32 : i32, i32
  }
}

module attributes {stable_mosaic.version = 11 : i64} {
  func.func @_dw3x3_s2_kernel(%arg0: i32, %arg1: memref<1x3x3x16xf32, #tpu.memory_space<vmem>>, %arg2: memref<1x3x3x16xf32, #tpu.memory_space<vmem>>, %arg3: memref<1x3x3x16xf32, #tpu.memory_space<vmem>>, %arg4: memref<1x3x3x16xf32, #tpu.memory_space<vmem>>, %arg5: memref<9x16xf32, #tpu.memory_space<vmem>>, %arg6: memref<1x16xf32, #tpu.memory_space<vmem>>, %arg7: memref<1x2x2x16xf32, #tpu.memory_space<vmem>>) attributes {dimension_semantics = [#tpu.dimension_semantics<parallel>], iteration_bounds = array<i64: 2>, scalar_prefetch = 0 : i64, scratch_operands = 0 : i64, tpu.core_type = #tpu.core_type<tc>, window_params = [{transform_indices = @transform_0, window_bounds = array<i64: 1, 3, 3, 16>}, {transform_indices = @transform_1, window_bounds = array<i64: 1, 3, 3, 16>}, {transform_indices = @transform_2, window_bounds = array<i64: 1, 3, 3, 16>}, {transform_indices = @transform_3, window_bounds = array<i64: 1, 3, 3, 16>}, {pipeline_mode = #tpu.pipeline_mode<synchronous>, transform_indices = @transform_4, window_bounds = array<i64: 9, 16>}, {pipeline_mode = #tpu.pipeline_mode<synchronous>, transform_indices = @transform_5, window_bounds = array<i64: 1, 16>}, {transform_indices = @transform_6, window_bounds = array<i64: 1, 2, 2, 16>}]} {
    %c0 = arith.constant 0 : index
    %c0_0 = arith.constant 0 : index
    %c0_1 = arith.constant 0 : index
    %c0_2 = arith.constant 0 : index
    %0 = vector.load %arg1[%c0, %c0_0, %c0_1, %c0_2] : memref<1x3x3x16xf32, #tpu.memory_space<vmem>>, vector<1x3x3x16xf32>
    %1 = vector.shape_cast %0 : vector<1x3x3x16xf32> to vector<3x3x16xf32>
    %c0_3 = arith.constant 0 : index
    %c0_4 = arith.constant 0 : index
    %c0_5 = arith.constant 0 : index
    %c0_6 = arith.constant 0 : index
    %2 = vector.load %arg2[%c0_3, %c0_4, %c0_5, %c0_6] : memref<1x3x3x16xf32, #tpu.memory_space<vmem>>, vector<1x3x3x16xf32>
    %3 = vector.shape_cast %2 : vector<1x3x3x16xf32> to vector<3x3x16xf32>
    %c0_7 = arith.constant 0 : index
    %c0_8 = arith.constant 0 : index
    %c0_9 = arith.constant 0 : index
    %c0_10 = arith.constant 0 : index
    %4 = vector.load %arg3[%c0_7, %c0_8, %c0_9, %c0_10] : memref<1x3x3x16xf32, #tpu.memory_space<vmem>>, vector<1x3x3x16xf32>
    %5 = vector.shape_cast %4 : vector<1x3x3x16xf32> to vector<3x3x16xf32>
    %c0_11 = arith.constant 0 : index
    %c0_12 = arith.constant 0 : index
    %c0_13 = arith.constant 0 : index
    %c0_14 = arith.constant 0 : index
    %6 = vector.load %arg4[%c0_11, %c0_12, %c0_13, %c0_14] : memref<1x3x3x16xf32, #tpu.memory_space<vmem>>, vector<1x3x3x16xf32>
    %7 = vector.shape_cast %6 : vector<1x3x3x16xf32> to vector<3x3x16xf32>
    %c0_15 = arith.constant 0 : index
    %c0_16 = arith.constant 0 : index
    %8 = vector.load %arg5[%c0_15, %c0_16] : memref<9x16xf32, #tpu.memory_space<vmem>>, vector<9x16xf32>
    %cst = arith.constant 0.000000e+00 : f32
    %9 = vector.broadcast %cst : f32 to vector<2x2x16xf32>
    %10 = vector.extract_strided_slice %1 {offsets = [0, 0, 0], sizes = [2, 2, 16], strides = [1, 1, 1]} : vector<3x3x16xf32> to vector<2x2x16xf32>
    %11 = vector.extract_strided_slice %8 {offsets = [0, 0], sizes = [1, 16], strides = [1, 1]} : vector<9x16xf32> to vector<1x16xf32>
    %12 = vector.shape_cast %11 : vector<1x16xf32> to vector<16xf32>
    %13 = vector.shape_cast %12 : vector<16xf32> to vector<1x1x16xf32>
    %14 = vector.broadcast %13 : vector<1x1x16xf32> to vector<2x2x16xf32>
    %15 = arith.mulf %10, %14 : vector<2x2x16xf32>
    %16 = arith.addf %9, %15 : vector<2x2x16xf32>
    %17 = vector.extract_strided_slice %3 {offsets = [0, 0, 0], sizes = [2, 2, 16], strides = [1, 1, 1]} : vector<3x3x16xf32> to vector<2x2x16xf32>
    %18 = vector.extract_strided_slice %8 {offsets = [1, 0], sizes = [1, 16], strides = [1, 1]} : vector<9x16xf32> to vector<1x16xf32>
    %19 = vector.shape_cast %18 : vector<1x16xf32> to vector<16xf32>
    %20 = vector.shape_cast %19 : vector<16xf32> to vector<1x1x16xf32>
    %21 = vector.broadcast %20 : vector<1x1x16xf32> to vector<2x2x16xf32>
    %22 = arith.mulf %17, %21 : vector<2x2x16xf32>
    %23 = arith.addf %16, %22 : vector<2x2x16xf32>
    %24 = vector.extract_strided_slice %1 {offsets = [0, 1, 0], sizes = [2, 2, 16], strides = [1, 1, 1]} : vector<3x3x16xf32> to vector<2x2x16xf32>
    %25 = vector.extract_strided_slice %8 {offsets = [2, 0], sizes = [1, 16], strides = [1, 1]} : vector<9x16xf32> to vector<1x16xf32>
    %26 = vector.shape_cast %25 : vector<1x16xf32> to vector<16xf32>
    %27 = vector.shape_cast %26 : vector<16xf32> to vector<1x1x16xf32>
    %28 = vector.broadcast %27 : vector<1x1x16xf32> to vector<2x2x16xf32>
    %29 = arith.mulf %24, %28 : vector<2x2x16xf32>
    %30 = arith.addf %23, %29 : vector<2x2x16xf32>
    %31 = vector.extract_strided_slice %5 {offsets = [0, 0, 0], sizes = [2, 2, 16], strides = [1, 1, 1]} : vector<3x3x16xf32> to vector<2x2x16xf32>
    %32 = vector.extract_strided_slice %8 {offsets = [3, 0], sizes = [1, 16], strides = [1, 1]} : vector<9x16xf32> to vector<1x16xf32>
    %33 = vector.shape_cast %32 : vector<1x16xf32> to vector<16xf32>
    %34 = vector.shape_cast %33 : vector<16xf32> to vector<1x1x16xf32>
    %35 = vector.broadcast %34 : vector<1x1x16xf32> to vector<2x2x16xf32>
    %36 = arith.mulf %31, %35 : vector<2x2x16xf32>
    %37 = arith.addf %30, %36 : vector<2x2x16xf32>
    %38 = vector.extract_strided_slice %7 {offsets = [0, 0, 0], sizes = [2, 2, 16], strides = [1, 1, 1]} : vector<3x3x16xf32> to vector<2x2x16xf32>
    %39 = vector.extract_strided_slice %8 {offsets = [4, 0], sizes = [1, 16], strides = [1, 1]} : vector<9x16xf32> to vector<1x16xf32>
    %40 = vector.shape_cast %39 : vector<1x16xf32> to vector<16xf32>
    %41 = vector.shape_cast %40 : vector<16xf32> to vector<1x1x16xf32>
    %42 = vector.broadcast %41 : vector<1x1x16xf32> to vector<2x2x16xf32>
    %43 = arith.mulf %38, %42 : vector<2x2x16xf32>
    %44 = arith.addf %37, %43 : vector<2x2x16xf32>
    %45 = vector.extract_strided_slice %5 {offsets = [0, 1, 0], sizes = [2, 2, 16], strides = [1, 1, 1]} : vector<3x3x16xf32> to vector<2x2x16xf32>
    %46 = vector.extract_strided_slice %8 {offsets = [5, 0], sizes = [1, 16], strides = [1, 1]} : vector<9x16xf32> to vector<1x16xf32>
    %47 = vector.shape_cast %46 : vector<1x16xf32> to vector<16xf32>
    %48 = vector.shape_cast %47 : vector<16xf32> to vector<1x1x16xf32>
    %49 = vector.broadcast %48 : vector<1x1x16xf32> to vector<2x2x16xf32>
    %50 = arith.mulf %45, %49 : vector<2x2x16xf32>
    %51 = arith.addf %44, %50 : vector<2x2x16xf32>
    %52 = vector.extract_strided_slice %1 {offsets = [1, 0, 0], sizes = [2, 2, 16], strides = [1, 1, 1]} : vector<3x3x16xf32> to vector<2x2x16xf32>
    %53 = vector.extract_strided_slice %8 {offsets = [6, 0], sizes = [1, 16], strides = [1, 1]} : vector<9x16xf32> to vector<1x16xf32>
    %54 = vector.shape_cast %53 : vector<1x16xf32> to vector<16xf32>
    %55 = vector.shape_cast %54 : vector<16xf32> to vector<1x1x16xf32>
    %56 = vector.broadcast %55 : vector<1x1x16xf32> to vector<2x2x16xf32>
    %57 = arith.mulf %52, %56 : vector<2x2x16xf32>
    %58 = arith.addf %51, %57 : vector<2x2x16xf32>
    %59 = vector.extract_strided_slice %3 {offsets = [1, 0, 0], sizes = [2, 2, 16], strides = [1, 1, 1]} : vector<3x3x16xf32> to vector<2x2x16xf32>
    %60 = vector.extract_strided_slice %8 {offsets = [7, 0], sizes = [1, 16], strides = [1, 1]} : vector<9x16xf32> to vector<1x16xf32>
    %61 = vector.shape_cast %60 : vector<1x16xf32> to vector<16xf32>
    %62 = vector.shape_cast %61 : vector<16xf32> to vector<1x1x16xf32>
    %63 = vector.broadcast %62 : vector<1x1x16xf32> to vector<2x2x16xf32>
    %64 = arith.mulf %59, %63 : vector<2x2x16xf32>
    %65 = arith.addf %58, %64 : vector<2x2x16xf32>
    %66 = vector.extract_strided_slice %1 {offsets = [1, 1, 0], sizes = [2, 2, 16], strides = [1, 1, 1]} : vector<3x3x16xf32> to vector<2x2x16xf32>
    %67 = vector.extract_strided_slice %8 {offsets = [8, 0], sizes = [1, 16], strides = [1, 1]} : vector<9x16xf32> to vector<1x16xf32>
    %68 = vector.shape_cast %67 : vector<1x16xf32> to vector<16xf32>
    %69 = vector.shape_cast %68 : vector<16xf32> to vector<1x1x16xf32>
    %70 = vector.broadcast %69 : vector<1x1x16xf32> to vector<2x2x16xf32>
    %71 = arith.mulf %66, %70 : vector<2x2x16xf32>
    %72 = arith.addf %65, %71 : vector<2x2x16xf32>
    %c0_17 = arith.constant 0 : index
    %c0_18 = arith.constant 0 : index
    %73 = vector.load %arg6[%c0_17, %c0_18] : memref<1x16xf32, #tpu.memory_space<vmem>>, vector<1x16xf32>
    %74 = vector.shape_cast %73 : vector<1x16xf32> to vector<1x1x16xf32>
    %75 = vector.broadcast %74 : vector<1x1x16xf32> to vector<2x2x16xf32>
    %76 = arith.addf %72, %75 : vector<2x2x16xf32>
    %c0_19 = arith.constant 0 : index
    %c0_20 = arith.constant 0 : index
    %c0_21 = arith.constant 0 : index
    %c0_22 = arith.constant 0 : index
    %77 = vector.load %arg7[%c0_19, %c0_20, %c0_21, %c0_22] : memref<1x2x2x16xf32, #tpu.memory_space<vmem>>, vector<1x2x2x16xf32>
    %78 = vector.shape_cast %77 : vector<1x2x2x16xf32> to vector<2x2x16xf32>
    %79 = vector.shape_cast %76 : vector<2x2x16xf32> to vector<1x2x2x16xf32>
    tpu.vector_store %arg7[%c0_19, %c0_20, %c0_21, %c0_22], %79 {strides = array<i32>} : memref<1x2x2x16xf32, #tpu.memory_space<vmem>>, vector<1x2x2x16xf32>,
    return
  }
  func.func @transform_0(%arg0: i32) -> (i32, i32, i32, i32) {
    %c0_i32 = arith.constant 0 : i32
    %c0_i32_0 = arith.constant 0 : i32
    %c0_i32_1 = arith.constant 0 : i32
    %c0_i32_2 = arith.constant 0 : i32
    return %arg0, %c0_i32, %c0_i32_0, %c0_i32_1 : i32, i32, i32, i32
  }
  func.func @transform_1(%arg0: i32) -> (i32, i32, i32, i32) {
    %c0_i32 = arith.constant 0 : i32
    %c0_i32_0 = arith.constant 0 : i32
    %c0_i32_1 = arith.constant 0 : i32
    %c0_i32_2 = arith.constant 0 : i32
    return %arg0, %c0_i32, %c0_i32_0, %c0_i32_1 : i32, i32, i32, i32
  }
  func.func @transform_2(%arg0: i32) -> (i32, i32, i32, i32) {
    %c0_i32 = arith.constant 0 : i32
    %c0_i32_0 = arith.constant 0 : i32
    %c0_i32_1 = arith.constant 0 : i32
    %c0_i32_2 = arith.constant 0 : i32
    return %arg0, %c0_i32, %c0_i32_0, %c0_i32_1 : i32, i32, i32, i32
  }
  func.func @transform_3(%arg0: i32) -> (i32, i32, i32, i32) {
    %c0_i32 = arith.constant 0 : i32
    %c0_i32_0 = arith.constant 0 : i32
    %c0_i32_1 = arith.constant 0 : i32
    %c0_i32_2 = arith.constant 0 : i32
    return %arg0, %c0_i32, %c0_i32_0, %c0_i32_1 : i32, i32, i32, i32
  }
  func.func @transform_4(%arg0: i32) -> (i32, i32) {
    %c0_i32 = arith.constant 0 : i32
    %c0_i32_0 = arith.constant 0 : i32
    %c0_i32_1 = arith.constant 0 : i32
    return %c0_i32, %c0_i32_0 : i32, i32
  }
  func.func @transform_5(%arg0: i32) -> (i32, i32) {
    %c0_i32 = arith.constant 0 : i32
    %c0_i32_0 = arith.constant 0 : i32
    %c0_i32_1 = arith.constant 0 : i32
    return %c0_i32, %c0_i32_0 : i32, i32
  }
  func.func @transform_6(%arg0: i32) -> (i32, i32, i32, i32) {
    %c0_i32 = arith.constant 0 : i32
    %c0_i32_0 = arith.constant 0 : i32
    %c0_i32_1 = arith.constant 0 : i32
    %c0_i32_2 = arith.constant 0 : i32
    return %arg0, %c0_i32, %c0_i32_0, %c0_i32_1 : i32, i32, i32, i32
  }
}

module attributes {stable_mosaic.version = 11 : i64} {
  func.func @_matmul_bias_act_kernel(%arg0: i32, %arg1: memref<16x16xbf16, #tpu.memory_space<vmem>>, %arg2: memref<16x128xbf16, #tpu.memory_space<vmem>>, %arg3: memref<1x128xf32, #tpu.memory_space<vmem>>, %arg4: memref<16x128xf32, #tpu.memory_space<vmem>>) attributes {dimension_semantics = [#tpu.dimension_semantics<parallel>], iteration_bounds = array<i64: 1>, scalar_prefetch = 0 : i64, scratch_operands = 0 : i64, tpu.core_type = #tpu.core_type<tc>, window_params = [{transform_indices = @transform_0, window_bounds = array<i64: 16, 16>}, {pipeline_mode = #tpu.pipeline_mode<synchronous>, transform_indices = @transform_1, window_bounds = array<i64: 16, 128>}, {pipeline_mode = #tpu.pipeline_mode<synchronous>, transform_indices = @transform_2, window_bounds = array<i64: 1, 128>}, {transform_indices = @transform_3, window_bounds = array<i64: 16, 128>}]} {
    %c0 = arith.constant 0 : index
    %c0_0 = arith.constant 0 : index
    %0 = vector.load %arg1[%c0, %c0_0] : memref<16x16xbf16, #tpu.memory_space<vmem>>, vector<16x16xbf16>
    %c0_1 = arith.constant 0 : index
    %c0_2 = arith.constant 0 : index
    %1 = vector.load %arg2[%c0_1, %c0_2] : memref<16x128xbf16, #tpu.memory_space<vmem>>, vector<16x128xbf16>
    %cst = arith.constant dense<0.000000e+00> : vector<16x128xf32>
    %2 = tpu.matmul %0, %1, %cst {dimension_numbers = #tpu.dot_dimension_numbers<[1], [0], [0], [1], [0, 0, 1, 1], [], []>} : vector<16x16xbf16>, vector<16x128xbf16>, vector<16x128xf32> -> vector<16x128xf32>
    %c0_3 = arith.constant 0 : index
    %c0_4 = arith.constant 0 : index
    %3 = vector.load %arg3[%c0_3, %c0_4] : memref<1x128xf32, #tpu.memory_space<vmem>>, vector<1x128xf32>
    %4 = vector.broadcast %3 : vector<1x128xf32> to vector<16x128xf32>
    %5 = arith.addf %2, %4 : vector<16x128xf32>
    %cst_5 = arith.constant 0.000000e+00 : f32
    %6 = vector.broadcast %cst_5 : f32 to vector<16x128xf32>
    %7 = arith.maximumf %5, %6 : vector<16x128xf32>
    %c0_6 = arith.constant 0 : index
    %c0_7 = arith.constant 0 : index
    %8 = vector.load %arg4[%c0_6, %c0_7] : memref<16x128xf32, #tpu.memory_space<vmem>>, vector<16x128xf32>
    tpu.vector_store %arg4[%c0_6, %c0_7], %7 {strides = array<i32>} : memref<16x128xf32, #tpu.memory_space<vmem>>, vector<16x128xf32>,
    return
  }
  func.func @transform_0(%arg0: i32) -> (i32, i32) {
    %c0_i32 = arith.constant 0 : i32
    %c0_i32_0 = arith.constant 0 : i32
    return %arg0, %c0_i32 : i32, i32
  }
  func.func @transform_1(%arg0: i32) -> (i32, i32) {
    %c0_i32 = arith.constant 0 : i32
    %c0_i32_0 = arith.constant 0 : i32
    %c0_i32_1 = arith.constant 0 : i32
    return %c0_i32, %c0_i32_0 : i32, i32
  }
  func.func @transform_2(%arg0: i32) -> (i32, i32) {
    %c0_i32 = arith.constant 0 : i32
    %c0_i32_0 = arith.constant 0 : i32
    %c0_i32_1 = arith.constant 0 : i32
    return %c0_i32, %c0_i32_0 : i32, i32
  }
  func.func @transform_3(%arg0: i32) -> (i32, i32) {
    %c0_i32 = arith.constant 0 : i32
    %c0_i32_0 = arith.constant 0 : i32
    return %arg0, %c0_i32 : i32, i32
  }
}

module attributes {stable_mosaic.version = 11 : i64} {
  func.func @_matmul_bias_act_kernel(%arg0: i32, %arg1: memref<32x16xbf16, #tpu.memory_space<vmem>>, %arg2: memref<16x128xbf16, #tpu.memory_space<vmem>>, %arg3: memref<1x128xf32, #tpu.memory_space<vmem>>, %arg4: memref<32x128xf32, #tpu.memory_space<vmem>>) attributes {dimension_semantics = [#tpu.dimension_semantics<parallel>], iteration_bounds = array<i64: 1>, scalar_prefetch = 0 : i64, scratch_operands = 0 : i64, tpu.core_type = #tpu.core_type<tc>, window_params = [{transform_indices = @transform_0, window_bounds = array<i64: 32, 16>}, {pipeline_mode = #tpu.pipeline_mode<synchronous>, transform_indices = @transform_1, window_bounds = array<i64: 16, 128>}, {pipeline_mode = #tpu.pipeline_mode<synchronous>, transform_indices = @transform_2, window_bounds = array<i64: 1, 128>}, {transform_indices = @transform_3, window_bounds = array<i64: 32, 128>}]} {
    %c0 = arith.constant 0 : index
    %c0_0 = arith.constant 0 : index
    %0 = vector.load %arg1[%c0, %c0_0] : memref<32x16xbf16, #tpu.memory_space<vmem>>, vector<32x16xbf16>
    %c0_1 = arith.constant 0 : index
    %c0_2 = arith.constant 0 : index
    %1 = vector.load %arg2[%c0_1, %c0_2] : memref<16x128xbf16, #tpu.memory_space<vmem>>, vector<16x128xbf16>
    %cst = arith.constant dense<0.000000e+00> : vector<32x128xf32>
    %2 = tpu.matmul %0, %1, %cst {dimension_numbers = #tpu.dot_dimension_numbers<[1], [0], [0], [1], [0, 0, 1, 1], [], []>} : vector<32x16xbf16>, vector<16x128xbf16>, vector<32x128xf32> -> vector<32x128xf32>
    %c0_3 = arith.constant 0 : index
    %c0_4 = arith.constant 0 : index
    %3 = vector.load %arg3[%c0_3, %c0_4] : memref<1x128xf32, #tpu.memory_space<vmem>>, vector<1x128xf32>
    %4 = vector.broadcast %3 : vector<1x128xf32> to vector<32x128xf32>
    %5 = arith.addf %2, %4 : vector<32x128xf32>
    %cst_5 = arith.constant 0.000000e+00 : f32
    %6 = vector.broadcast %cst_5 : f32 to vector<32x128xf32>
    %7 = arith.maximumf %5, %6 : vector<32x128xf32>
    %c0_6 = arith.constant 0 : index
    %c0_7 = arith.constant 0 : index
    %8 = vector.load %arg4[%c0_6, %c0_7] : memref<32x128xf32, #tpu.memory_space<vmem>>, vector<32x128xf32>
    tpu.vector_store %arg4[%c0_6, %c0_7], %7 {strides = array<i32>} : memref<32x128xf32, #tpu.memory_space<vmem>>, vector<32x128xf32>,
    return
  }
  func.func @transform_0(%arg0: i32) -> (i32, i32) {
    %c0_i32 = arith.constant 0 : i32
    %c0_i32_0 = arith.constant 0 : i32
    return %arg0, %c0_i32 : i32, i32
  }
  func.func @transform_1(%arg0: i32) -> (i32, i32) {
    %c0_i32 = arith.constant 0 : i32
    %c0_i32_0 = arith.constant 0 : i32
    %c0_i32_1 = arith.constant 0 : i32
    return %c0_i32, %c0_i32_0 : i32, i32
  }
  func.func @transform_2(%arg0: i32) -> (i32, i32) {
    %c0_i32 = arith.constant 0 : i32
    %c0_i32_0 = arith.constant 0 : i32
    %c0_i32_1 = arith.constant 0 : i32
    return %c0_i32, %c0_i32_0 : i32, i32
  }
  func.func @transform_3(%arg0: i32) -> (i32, i32) {
    %c0_i32 = arith.constant 0 : i32
    %c0_i32_0 = arith.constant 0 : i32
    return %arg0, %c0_i32 : i32, i32
  }
}

module attributes {stable_mosaic.version = 11 : i64} {
  func.func @_matmul_bias_act_kernel(%arg0: i32, %arg1: memref<16x32xbf16, #tpu.memory_space<vmem>>, %arg2: memref<32x128xbf16, #tpu.memory_space<vmem>>, %arg3: memref<1x128xf32, #tpu.memory_space<vmem>>, %arg4: memref<16x128xf32, #tpu.memory_space<vmem>>) attributes {dimension_semantics = [#tpu.dimension_semantics<parallel>], iteration_bounds = array<i64: 1>, scalar_prefetch = 0 : i64, scratch_operands = 0 : i64, tpu.core_type = #tpu.core_type<tc>, window_params = [{transform_indices = @transform_0, window_bounds = array<i64: 16, 32>}, {pipeline_mode = #tpu.pipeline_mode<synchronous>, transform_indices = @transform_1, window_bounds = array<i64: 32, 128>}, {pipeline_mode = #tpu.pipeline_mode<synchronous>, transform_indices = @transform_2, window_bounds = array<i64: 1, 128>}, {transform_indices = @transform_3, window_bounds = array<i64: 16, 128>}]} {
    %c0 = arith.constant 0 : index
    %c0_0 = arith.constant 0 : index
    %0 = vector.load %arg1[%c0, %c0_0] : memref<16x32xbf16, #tpu.memory_space<vmem>>, vector<16x32xbf16>
    %c0_1 = arith.constant 0 : index
    %c0_2 = arith.constant 0 : index
    %1 = vector.load %arg2[%c0_1, %c0_2] : memref<32x128xbf16, #tpu.memory_space<vmem>>, vector<32x128xbf16>
    %cst = arith.constant dense<0.000000e+00> : vector<16x128xf32>
    %2 = tpu.matmul %0, %1, %cst {dimension_numbers = #tpu.dot_dimension_numbers<[1], [0], [0], [1], [0, 0, 1, 1], [], []>} : vector<16x32xbf16>, vector<32x128xbf16>, vector<16x128xf32> -> vector<16x128xf32>
    %c0_3 = arith.constant 0 : index
    %c0_4 = arith.constant 0 : index
    %3 = vector.load %arg3[%c0_3, %c0_4] : memref<1x128xf32, #tpu.memory_space<vmem>>, vector<1x128xf32>
    %4 = vector.broadcast %3 : vector<1x128xf32> to vector<16x128xf32>
    %5 = arith.addf %2, %4 : vector<16x128xf32>
    %cst_5 = arith.constant 0.000000e+00 : f32
    %6 = vector.broadcast %cst_5 : f32 to vector<16x128xf32>
    %7 = arith.maximumf %5, %6 : vector<16x128xf32>
    %c0_6 = arith.constant 0 : index
    %c0_7 = arith.constant 0 : index
    %8 = vector.load %arg4[%c0_6, %c0_7] : memref<16x128xf32, #tpu.memory_space<vmem>>, vector<16x128xf32>
    tpu.vector_store %arg4[%c0_6, %c0_7], %7 {strides = array<i32>} : memref<16x128xf32, #tpu.memory_space<vmem>>, vector<16x128xf32>,
    return
  }
  func.func @transform_0(%arg0: i32) -> (i32, i32) {
    %c0_i32 = arith.constant 0 : i32
    %c0_i32_0 = arith.constant 0 : i32
    return %arg0, %c0_i32 : i32, i32
  }
  func.func @transform_1(%arg0: i32) -> (i32, i32) {
    %c0_i32 = arith.constant 0 : i32
    %c0_i32_0 = arith.constant 0 : i32
    %c0_i32_1 = arith.constant 0 : i32
    return %c0_i32, %c0_i32_0 : i32, i32
  }
  func.func @transform_2(%arg0: i32) -> (i32, i32) {
    %c0_i32 = arith.constant 0 : i32
    %c0_i32_0 = arith.constant 0 : i32
    %c0_i32_1 = arith.constant 0 : i32
    return %c0_i32, %c0_i32_0 : i32, i32
  }
  func.func @transform_3(%arg0: i32) -> (i32, i32) {
    %c0_i32 = arith.constant 0 : i32
    %c0_i32_0 = arith.constant 0 : i32
    return %arg0, %c0_i32 : i32, i32
  }
}

module attributes {stable_mosaic.version = 11 : i64} {
  func.func @_dw3x3_s2_kernel(%arg0: i32, %arg1: memref<1x2x2x32xf32, #tpu.memory_space<vmem>>, %arg2: memref<1x2x2x32xf32, #tpu.memory_space<vmem>>, %arg3: memref<1x2x2x32xf32, #tpu.memory_space<vmem>>, %arg4: memref<1x2x2x32xf32, #tpu.memory_space<vmem>>, %arg5: memref<9x32xf32, #tpu.memory_space<vmem>>, %arg6: memref<1x32xf32, #tpu.memory_space<vmem>>, %arg7: memref<1x1x1x32xf32, #tpu.memory_space<vmem>>) attributes {dimension_semantics = [#tpu.dimension_semantics<parallel>], iteration_bounds = array<i64: 2>, scalar_prefetch = 0 : i64, scratch_operands = 0 : i64, tpu.core_type = #tpu.core_type<tc>, window_params = [{transform_indices = @transform_0, window_bounds = array<i64: 1, 2, 2, 32>}, {transform_indices = @transform_1, window_bounds = array<i64: 1, 2, 2, 32>}, {transform_indices = @transform_2, window_bounds = array<i64: 1, 2, 2, 32>}, {transform_indices = @transform_3, window_bounds = array<i64: 1, 2, 2, 32>}, {pipeline_mode = #tpu.pipeline_mode<synchronous>, transform_indices = @transform_4, window_bounds = array<i64: 9, 32>}, {pipeline_mode = #tpu.pipeline_mode<synchronous>, transform_indices = @transform_5, window_bounds = array<i64: 1, 32>}, {transform_indices = @transform_6, window_bounds = array<i64: 1, 1, 1, 32>}]} {
    %c0 = arith.constant 0 : index
    %c0_0 = arith.constant 0 : index
    %c0_1 = arith.constant 0 : index
    %c0_2 = arith.constant 0 : index
    %0 = vector.load %arg1[%c0, %c0_0, %c0_1, %c0_2] : memref<1x2x2x32xf32, #tpu.memory_space<vmem>>, vector<1x2x2x32xf32>
    %1 = vector.shape_cast %0 : vector<1x2x2x32xf32> to vector<2x2x32xf32>
    %c0_3 = arith.constant 0 : index
    %c0_4 = arith.constant 0 : index
    %c0_5 = arith.constant 0 : index
    %c0_6 = arith.constant 0 : index
    %2 = vector.load %arg2[%c0_3, %c0_4, %c0_5, %c0_6] : memref<1x2x2x32xf32, #tpu.memory_space<vmem>>, vector<1x2x2x32xf32>
    %3 = vector.shape_cast %2 : vector<1x2x2x32xf32> to vector<2x2x32xf32>
    %c0_7 = arith.constant 0 : index
    %c0_8 = arith.constant 0 : index
    %c0_9 = arith.constant 0 : index
    %c0_10 = arith.constant 0 : index
    %4 = vector.load %arg3[%c0_7, %c0_8, %c0_9, %c0_10] : memref<1x2x2x32xf32, #tpu.memory_space<vmem>>, vector<1x2x2x32xf32>
    %5 = vector.shape_cast %4 : vector<1x2x2x32xf32> to vector<2x2x32xf32>
    %c0_11 = arith.constant 0 : index
    %c0_12 = arith.constant 0 : index
    %c0_13 = arith.constant 0 : index
    %c0_14 = arith.constant 0 : index
    %6 = vector.load %arg4[%c0_11, %c0_12, %c0_13, %c0_14] : memref<1x2x2x32xf32, #tpu.memory_space<vmem>>, vector<1x2x2x32xf32>
    %7 = vector.shape_cast %6 : vector<1x2x2x32xf32> to vector<2x2x32xf32>
    %c0_15 = arith.constant 0 : index
    %c0_16 = arith.constant 0 : index
    %8 = vector.load %arg5[%c0_15, %c0_16] : memref<9x32xf32, #tpu.memory_space<vmem>>, vector<9x32xf32>
    %cst = arith.constant 0.000000e+00 : f32
    %9 = vector.broadcast %cst : f32 to vector<1x1x32xf32>
    %10 = vector.extract_strided_slice %1 {offsets = [0, 0, 0], sizes = [1, 1, 32], strides = [1, 1, 1]} : vector<2x2x32xf32> to vector<1x1x32xf32>
    %11 = vector.extract_strided_slice %8 {offsets = [0, 0], sizes = [1, 32], strides = [1, 1]} : vector<9x32xf32> to vector<1x32xf32>
    %12 = vector.shape_cast %11 : vector<1x32xf32> to vector<32xf32>
    %13 = vector.shape_cast %12 : vector<32xf32> to vector<1x1x32xf32>
    %14 = arith.mulf %10, %13 : vector<1x1x32xf32>
    %15 = arith.addf %9, %14 : vector<1x1x32xf32>
    %16 = vector.extract_strided_slice %3 {offsets = [0, 0, 0], sizes = [1, 1, 32], strides = [1, 1, 1]} : vector<2x2x32xf32> to vector<1x1x32xf32>
    %17 = vector.extract_strided_slice %8 {offsets = [1, 0], sizes = [1, 32], strides = [1, 1]} : vector<9x32xf32> to vector<1x32xf32>
    %18 = vector.shape_cast %17 : vector<1x32xf32> to vector<32xf32>
    %19 = vector.shape_cast %18 : vector<32xf32> to vector<1x1x32xf32>
    %20 = arith.mulf %16, %19 : vector<1x1x32xf32>
    %21 = arith.addf %15, %20 : vector<1x1x32xf32>
    %22 = vector.extract_strided_slice %1 {offsets = [0, 1, 0], sizes = [1, 1, 32], strides = [1, 1, 1]} : vector<2x2x32xf32> to vector<1x1x32xf32>
    %23 = vector.extract_strided_slice %8 {offsets = [2, 0], sizes = [1, 32], strides = [1, 1]} : vector<9x32xf32> to vector<1x32xf32>
    %24 = vector.shape_cast %23 : vector<1x32xf32> to vector<32xf32>
    %25 = vector.shape_cast %24 : vector<32xf32> to vector<1x1x32xf32>
    %26 = arith.mulf %22, %25 : vector<1x1x32xf32>
    %27 = arith.addf %21, %26 : vector<1x1x32xf32>
    %28 = vector.extract_strided_slice %5 {offsets = [0, 0, 0], sizes = [1, 1, 32], strides = [1, 1, 1]} : vector<2x2x32xf32> to vector<1x1x32xf32>
    %29 = vector.extract_strided_slice %8 {offsets = [3, 0], sizes = [1, 32], strides = [1, 1]} : vector<9x32xf32> to vector<1x32xf32>
    %30 = vector.shape_cast %29 : vector<1x32xf32> to vector<32xf32>
    %31 = vector.shape_cast %30 : vector<32xf32> to vector<1x1x32xf32>
    %32 = arith.mulf %28, %31 : vector<1x1x32xf32>
    %33 = arith.addf %27, %32 : vector<1x1x32xf32>
    %34 = vector.extract_strided_slice %7 {offsets = [0, 0, 0], sizes = [1, 1, 32], strides = [1, 1, 1]} : vector<2x2x32xf32> to vector<1x1x32xf32>
    %35 = vector.extract_strided_slice %8 {offsets = [4, 0], sizes = [1, 32], strides = [1, 1]} : vector<9x32xf32> to vector<1x32xf32>
    %36 = vector.shape_cast %35 : vector<1x32xf32> to vector<32xf32>
    %37 = vector.shape_cast %36 : vector<32xf32> to vector<1x1x32xf32>
    %38 = arith.mulf %34, %37 : vector<1x1x32xf32>
    %39 = arith.addf %33, %38 : vector<1x1x32xf32>
    %40 = vector.extract_strided_slice %5 {offsets = [0, 1, 0], sizes = [1, 1, 32], strides = [1, 1, 1]} : vector<2x2x32xf32> to vector<1x1x32xf32>
    %41 = vector.extract_strided_slice %8 {offsets = [5, 0], sizes = [1, 32], strides = [1, 1]} : vector<9x32xf32> to vector<1x32xf32>
    %42 = vector.shape_cast %41 : vector<1x32xf32> to vector<32xf32>
    %43 = vector.shape_cast %42 : vector<32xf32> to vector<1x1x32xf32>
    %44 = arith.mulf %40, %43 : vector<1x1x32xf32>
    %45 = arith.addf %39, %44 : vector<1x1x32xf32>
    %46 = vector.extract_strided_slice %1 {offsets = [1, 0, 0], sizes = [1, 1, 32], strides = [1, 1, 1]} : vector<2x2x32xf32> to vector<1x1x32xf32>
    %47 = vector.extract_strided_slice %8 {offsets = [6, 0], sizes = [1, 32], strides = [1, 1]} : vector<9x32xf32> to vector<1x32xf32>
    %48 = vector.shape_cast %47 : vector<1x32xf32> to vector<32xf32>
    %49 = vector.shape_cast %48 : vector<32xf32> to vector<1x1x32xf32>
    %50 = arith.mulf %46, %49 : vector<1x1x32xf32>
    %51 = arith.addf %45, %50 : vector<1x1x32xf32>
    %52 = vector.extract_strided_slice %3 {offsets = [1, 0, 0], sizes = [1, 1, 32], strides = [1, 1, 1]} : vector<2x2x32xf32> to vector<1x1x32xf32>
    %53 = vector.extract_strided_slice %8 {offsets = [7, 0], sizes = [1, 32], strides = [1, 1]} : vector<9x32xf32> to vector<1x32xf32>
    %54 = vector.shape_cast %53 : vector<1x32xf32> to vector<32xf32>
    %55 = vector.shape_cast %54 : vector<32xf32> to vector<1x1x32xf32>
    %56 = arith.mulf %52, %55 : vector<1x1x32xf32>
    %57 = arith.addf %51, %56 : vector<1x1x32xf32>
    %58 = vector.extract_strided_slice %1 {offsets = [1, 1, 0], sizes = [1, 1, 32], strides = [1, 1, 1]} : vector<2x2x32xf32> to vector<1x1x32xf32>
    %59 = vector.extract_strided_slice %8 {offsets = [8, 0], sizes = [1, 32], strides = [1, 1]} : vector<9x32xf32> to vector<1x32xf32>
    %60 = vector.shape_cast %59 : vector<1x32xf32> to vector<32xf32>
    %61 = vector.shape_cast %60 : vector<32xf32> to vector<1x1x32xf32>
    %62 = arith.mulf %58, %61 : vector<1x1x32xf32>
    %63 = arith.addf %57, %62 : vector<1x1x32xf32>
    %c0_17 = arith.constant 0 : index
    %c0_18 = arith.constant 0 : index
    %64 = vector.load %arg6[%c0_17, %c0_18] : memref<1x32xf32, #tpu.memory_space<vmem>>, vector<1x32xf32>
    %65 = vector.shape_cast %64 : vector<1x32xf32> to vector<1x1x32xf32>
    %66 = arith.addf %63, %65 : vector<1x1x32xf32>
    %c0_19 = arith.constant 0 : index
    %c0_20 = arith.constant 0 : index
    %c0_21 = arith.constant 0 : index
    %c0_22 = arith.constant 0 : index
    %67 = vector.load %arg7[%c0_19, %c0_20, %c0_21, %c0_22] : memref<1x1x1x32xf32, #tpu.memory_space<vmem>>, vector<1x1x1x32xf32>
    %68 = vector.shape_cast %67 : vector<1x1x1x32xf32> to vector<1x1x32xf32>
    %69 = vector.shape_cast %66 : vector<1x1x32xf32> to vector<1x1x1x32xf32>
    tpu.vector_store %arg7[%c0_19, %c0_20, %c0_21, %c0_22], %69 {strides = array<i32>} : memref<1x1x1x32xf32, #tpu.memory_space<vmem>>, vector<1x1x1x32xf32>,
    return
  }
  func.func @transform_0(%arg0: i32) -> (i32, i32, i32, i32) {
    %c0_i32 = arith.constant 0 : i32
    %c0_i32_0 = arith.constant 0 : i32
    %c0_i32_1 = arith.constant 0 : i32
    %c0_i32_2 = arith.constant 0 : i32
    return %arg0, %c0_i32, %c0_i32_0, %c0_i32_1 : i32, i32, i32, i32
  }
  func.func @transform_1(%arg0: i32) -> (i32, i32, i32, i32) {
    %c0_i32 = arith.constant 0 : i32
    %c0_i32_0 = arith.constant 0 : i32
    %c0_i32_1 = arith.constant 0 : i32
    %c0_i32_2 = arith.constant 0 : i32
    return %arg0, %c0_i32, %c0_i32_0, %c0_i32_1 : i32, i32, i32, i32
  }
  func.func @transform_2(%arg0: i32) -> (i32, i32, i32, i32) {
    %c0_i32 = arith.constant 0 : i32
    %c0_i32_0 = arith.constant 0 : i32
    %c0_i32_1 = arith.constant 0 : i32
    %c0_i32_2 = arith.constant 0 : i32
    return %arg0, %c0_i32, %c0_i32_0, %c0_i32_1 : i32, i32, i32, i32
  }
  func.func @transform_3(%arg0: i32) -> (i32, i32, i32, i32) {
    %c0_i32 = arith.constant 0 : i32
    %c0_i32_0 = arith.constant 0 : i32
    %c0_i32_1 = arith.constant 0 : i32
    %c0_i32_2 = arith.constant 0 : i32
    return %arg0, %c0_i32, %c0_i32_0, %c0_i32_1 : i32, i32, i32, i32
  }
  func.func @transform_4(%arg0: i32) -> (i32, i32) {
    %c0_i32 = arith.constant 0 : i32
    %c0_i32_0 = arith.constant 0 : i32
    %c0_i32_1 = arith.constant 0 : i32
    return %c0_i32, %c0_i32_0 : i32, i32
  }
  func.func @transform_5(%arg0: i32) -> (i32, i32) {
    %c0_i32 = arith.constant 0 : i32
    %c0_i32_0 = arith.constant 0 : i32
    %c0_i32_1 = arith.constant 0 : i32
    return %c0_i32, %c0_i32_0 : i32, i32
  }
  func.func @transform_6(%arg0: i32) -> (i32, i32, i32, i32) {
    %c0_i32 = arith.constant 0 : i32
    %c0_i32_0 = arith.constant 0 : i32
    %c0_i32_1 = arith.constant 0 : i32
    %c0_i32_2 = arith.constant 0 : i32
    return %arg0, %c0_i32, %c0_i32_0, %c0_i32_1 : i32, i32, i32, i32
  }
}

module attributes {stable_mosaic.version = 11 : i64} {
  func.func @_matmul_bias_act_kernel(%arg0: i32, %arg1: memref<16x64xbf16, #tpu.memory_space<vmem>>, %arg2: memref<64x1024xbf16, #tpu.memory_space<vmem>>, %arg3: memref<1x1024xf32, #tpu.memory_space<vmem>>, %arg4: memref<16x1024xf32, #tpu.memory_space<vmem>>) attributes {dimension_semantics = [#tpu.dimension_semantics<parallel>], iteration_bounds = array<i64: 1>, scalar_prefetch = 0 : i64, scratch_operands = 0 : i64, tpu.core_type = #tpu.core_type<tc>, window_params = [{transform_indices = @transform_0, window_bounds = array<i64: 16, 64>}, {pipeline_mode = #tpu.pipeline_mode<synchronous>, transform_indices = @transform_1, window_bounds = array<i64: 64, 1024>}, {pipeline_mode = #tpu.pipeline_mode<synchronous>, transform_indices = @transform_2, window_bounds = array<i64: 1, 1024>}, {transform_indices = @transform_3, window_bounds = array<i64: 16, 1024>}]} {
    %c0 = arith.constant 0 : index
    %c0_0 = arith.constant 0 : index
    %0 = vector.load %arg1[%c0, %c0_0] : memref<16x64xbf16, #tpu.memory_space<vmem>>, vector<16x64xbf16>
    %c0_1 = arith.constant 0 : index
    %c0_2 = arith.constant 0 : index
    %1 = vector.load %arg2[%c0_1, %c0_2] : memref<64x1024xbf16, #tpu.memory_space<vmem>>, vector<64x1024xbf16>
    %cst = arith.constant dense<0.000000e+00> : vector<16x1024xf32>
    %2 = tpu.matmul %0, %1, %cst {dimension_numbers = #tpu.dot_dimension_numbers<[1], [0], [0], [1], [0, 0, 1, 1], [], []>} : vector<16x64xbf16>, vector<64x1024xbf16>, vector<16x1024xf32> -> vector<16x1024xf32>
    %c0_3 = arith.constant 0 : index
    %c0_4 = arith.constant 0 : index
    %3 = vector.load %arg3[%c0_3, %c0_4] : memref<1x1024xf32, #tpu.memory_space<vmem>>, vector<1x1024xf32>
    %4 = vector.broadcast %3 : vector<1x1024xf32> to vector<16x1024xf32>
    %5 = arith.addf %2, %4 : vector<16x1024xf32>
    %cst_5 = arith.constant 0.000000e+00 : f32
    %6 = vector.broadcast %cst_5 : f32 to vector<16x1024xf32>
    %7 = arith.maximumf %5, %6 : vector<16x1024xf32>
    %c0_6 = arith.constant 0 : index
    %c0_7 = arith.constant 0 : index
    %8 = vector.load %arg4[%c0_6, %c0_7] : memref<16x1024xf32, #tpu.memory_space<vmem>>, vector<16x1024xf32>
    tpu.vector_store %arg4[%c0_6, %c0_7], %7 {strides = array<i32>} : memref<16x1024xf32, #tpu.memory_space<vmem>>, vector<16x1024xf32>,
    return
  }
  func.func @transform_0(%arg0: i32) -> (i32, i32) {
    %c0_i32 = arith.constant 0 : i32
    %c0_i32_0 = arith.constant 0 : i32
    return %arg0, %c0_i32 : i32, i32
  }
  func.func @transform_1(%arg0: i32) -> (i32, i32) {
    %c0_i32 = arith.constant 0 : i32
    %c0_i32_0 = arith.constant 0 : i32
    %c0_i32_1 = arith.constant 0 : i32
    return %c0_i32, %c0_i32_0 : i32, i32
  }
  func.func @transform_2(%arg0: i32) -> (i32, i32) {
    %c0_i32 = arith.constant 0 : i32
    %c0_i32_0 = arith.constant 0 : i32
    %c0_i32_1 = arith.constant 0 : i32
    return %c0_i32, %c0_i32_0 : i32, i32
  }
  func.func @transform_3(%arg0: i32) -> (i32, i32) {
    %c0_i32 = arith.constant 0 : i32
    %c0_i32_0 = arith.constant 0 : i32
    return %arg0, %c0_i32 : i32, i32
  }
}

module attributes {stable_mosaic.version = 11 : i64} {
  func.func @_avgpool_fc_kernel(%arg0: i32, %arg1: memref<2x1x1024xf32, #tpu.memory_space<vmem>>, %arg2: memref<1024x128xbf16, #tpu.memory_space<vmem>>, %arg3: memref<1x128xf32, #tpu.memory_space<vmem>>, %arg4: memref<2x128xf32, #tpu.memory_space<vmem>>) attributes {dimension_semantics = [#tpu.dimension_semantics<arbitrary>], iteration_bounds = array<i64: 1>, scalar_prefetch = 0 : i64, scratch_operands = 0 : i64, tpu.core_type = #tpu.core_type<tc>, window_params = [{pipeline_mode = #tpu.pipeline_mode<synchronous>, transform_indices = @transform_0, window_bounds = array<i64: 2, 1, 1024>}, {pipeline_mode = #tpu.pipeline_mode<synchronous>, transform_indices = @transform_1, window_bounds = array<i64: 1024, 128>}, {pipeline_mode = #tpu.pipeline_mode<synchronous>, transform_indices = @transform_2, window_bounds = array<i64: 1, 128>}, {pipeline_mode = #tpu.pipeline_mode<synchronous>, transform_indices = @transform_3, window_bounds = array<i64: 2, 128>}]} {
    %c0 = arith.constant 0 : index
    %c0_0 = arith.constant 0 : index
    %c0_1 = arith.constant 0 : index
    %0 = vector.load %arg1[%c0, %c0_0, %c0_1] : memref<2x1x1024xf32, #tpu.memory_space<vmem>>, vector<2x1x1024xf32>
    %cst = arith.constant dense<0.000000e+00> : vector<2x1024xf32>
    %1 = vector.multi_reduction <add>, %0, %cst [1] : vector<2x1x1024xf32> to vector<2x1024xf32>
    %cst_2 = arith.constant 1.000000e+00 : f32
    %2 = vector.broadcast %cst_2 : f32 to vector<2x1024xf32>
    %3 = arith.divf %1, %2 : vector<2x1024xf32>
    %4 = arith.truncf %3 : vector<2x1024xf32> to vector<2x1024xbf16>
    %c0_3 = arith.constant 0 : index
    %c0_4 = arith.constant 0 : index
    %5 = vector.load %arg2[%c0_3, %c0_4] : memref<1024x128xbf16, #tpu.memory_space<vmem>>, vector<1024x128xbf16>
    %cst_5 = arith.constant dense<0.000000e+00> : vector<2x128xf32>
    %6 = tpu.matmul %4, %5, %cst_5 {dimension_numbers = #tpu.dot_dimension_numbers<[1], [0], [0], [1], [0, 0, 1, 1], [], []>} : vector<2x1024xbf16>, vector<1024x128xbf16>, vector<2x128xf32> -> vector<2x128xf32>
    %c0_6 = arith.constant 0 : index
    %c0_7 = arith.constant 0 : index
    %7 = vector.load %arg3[%c0_6, %c0_7] : memref<1x128xf32, #tpu.memory_space<vmem>>, vector<1x128xf32>
    %8 = vector.broadcast %7 : vector<1x128xf32> to vector<2x128xf32>
    %9 = arith.addf %6, %8 : vector<2x128xf32>
    %c0_8 = arith.constant 0 : index
    %c0_9 = arith.constant 0 : index
    %10 = vector.load %arg4[%c0_8, %c0_9] : memref<2x128xf32, #tpu.memory_space<vmem>>, vector<2x128xf32>
    tpu.vector_store %arg4[%c0_8, %c0_9], %9 {strides = array<i32>} : memref<2x128xf32, #tpu.memory_space<vmem>>, vector<2x128xf32>,
    return
  }
  func.func @transform_0(%arg0: i32) -> (i32, i32, i32) {
    %c0_i32 = arith.constant 0 : i32
    %c0_i32_0 = arith.constant 0 : i32
    %c0_i32_1 = arith.constant 0 : i32
    %c0_i32_2 = arith.constant 0 : i32
    return %c0_i32, %c0_i32_0, %c0_i32_1 : i32, i32, i32
  }
  func.func @transform_1(%arg0: i32) -> (i32, i32) {
    %c0_i32 = arith.constant 0 : i32
    %c0_i32_0 = arith.constant 0 : i32
    %c0_i32_1 = arith.constant 0 : i32
    return %c0_i32, %c0_i32_0 : i32, i32
  }
  func.func @transform_2(%arg0: i32) -> (i32, i32) {
    %c0_i32 = arith.constant 0 : i32
    %c0_i32_0 = arith.constant 0 : i32
    %c0_i32_1 = arith.constant 0 : i32
    return %c0_i32, %c0_i32_0 : i32, i32
  }
  func.func @transform_3(%arg0: i32) -> (i32, i32) {
    %c0_i32 = arith.constant 0 : i32
    %c0_i32_0 = arith.constant 0 : i32
    %c0_i32_1 = arith.constant 0 : i32
    return %c0_i32, %c0_i32_0 : i32, i32
  }
}

</mosaic_0001>

<bundles_post_ra>
// kernel: shufflenet_v2_forward.19
= control target key start
LH: loop header
LB: loop body
LE: loop exit
PB: predicated region body
PF: predicated region fallthrough
CT: control target
= control target key end

     0   :  { %s806_s12 = smov 0   ;;  %s938_s0 = inlined_call_operand.vmem [shape: bf16[512,27], index: 0, kind: input, shape index: {}]   ;;  %s939_s1 = inlined_call_operand.vmem [shape: bf16[27,128], index: 1, kind: input, shape index: {}]   ;;  %s940_s2 = inlined_call_operand.vmem [shape: f32[1,128], index: 2, kind: input, shape index: {}]   ;;  %s941_s3 = inlined_call_operand.vmem [shape: f32[512,128], index: 3, kind: output, shape index: {}]  }
   0x1 LB: > { %s646_s13 = sadd.s32 4294967295, %s783_s12   ;;  %p650_p0 = scmp.ge.s32.totalorder %s783_s12, 1  ;;  %s783_s12 = sphi %s806_s12, %s13_s12  }
   0x2   : > { %p138_p1 = scmp.lt.s32.totalorder %s783_s12, 3 }
   0x4   : > { %p139_p2 = pnand %p650_p0, %p138_p1 }
   0x5   : > { %v759_v0 = vld [vmem:[%s939_s1] sm:$0xff] (!%p139_p2)   ;;  %vm358_vm0 = vcmask (!%p139_p2), 1044480   ;;  %v760_v1 = vld [vmem:[%s939_s1 + $0x8] sm:$0x3f] (!%p139_p2)   ;;  %vm359_vm1 = vcmask (!%p139_p2), 1045504   ;;  %s651_s18 = sshll.u32 (!%p139_p2), %s646_s13, 5 }
   0x6   : > { %142 = sbr.rel (%p139_p2) target bundleno = 263 (0x107), region = 32  ;;  %710 = vmatprep.subr.bf16.mxu0 (!%p139_p2), %v759_v0  ;;  %746 = vmatprep.subr.bf16.mxu1 (!%p139_p2), %v759_v0  ;;  %v785_v2 = vmov (!%p139_p2), 65535   ;;  %p163_p3 = scmp.lt.s32.totalorder (!%p139_p2), %s651_s18, 63  ;;  %vm309_vm2 = vcmask (!%p139_p2), 220160   ;;  %v863_v22 = vld [vmem:[%s940_s2] ss:$0 sm:$0xff] (!%p139_p2) }
   0x7   : > { %711 = vmatpush3.bf16.msra.mxu0 (!%p139_p2), %v759_v0  ;;  %748 = vmatpush3.bf16.msra.mxu1 (!%p139_p2), %v759_v0  ;;  %v360_v3 = vsel (!%p139_p2), %vm358_vm0, 4294967295, %v785_v2 }
   0x8   : > { %v361_v4 = vsel (!%p139_p2), %vm359_vm1, %v360_v3, 0 }
   0x9   : > { %v363_v5 = vand.u32 (!%p139_p2), %v760_v1, %v361_v4 }
   0xb   : > { %712 = vmatprep.subr.bf16.mxu0 (!%p139_p2), %v363_v5  ;;  %747 = vmatprep.subr.bf16.mxu1 (!%p139_p2), %v363_v5 }
   0xc   : > { %713 = vmatpush3.bf16.msra.mxu0 (!%p139_p2), %v363_v5  ;;  %749 = vmatpush3.bf16.msra.mxu1 (!%p139_p2), %v363_v5 }
   0xd   : > { %s943_s18 = smov (!%p163_p3, %s651_s18), 63 }
   0xe   : > { %s652_s19 = sshll.u32 %s943_s18, 2  ;;  %s654_s25 = sshll.u32 %s943_s18, 3 }
   0xf   : > { %s826_s22 = scalar_lea.vmem %s938_s0, %s652_s19  ;;  %s870_s28 = scalar_lea.vmem %s941_s3, %s654_s25 }
  0x10   : > { %v761_v6 = vld [vmem:[%s826_s22] sm:$0xff]   ;;  %v763_v8 = vld [vmem:[%s826_s22 + $0x8] sm:$0xff]   ;;  %v765_v10 = vld [vmem:[%s826_s22 + $0x10] sm:$0xff]  }
  0x11   : > { %v762_v7 = vld [vmem:[%s826_s22 + $0x40] sm:$0xff]   ;;  %714 = vmatprep.mubr.msk.bf16.mxu0 %vm309_vm2, %v761_v6  ;;  %v764_v9 = vld [vmem:[%s826_s22 + $0x48] sm:$0xff]   ;;  %v766_v11 = vld [vmem:[%s826_s22 + $0x50] sm:$0xff]  }
  0x12   : > { %730 = vmatprep.mubr.msk.bf16.mxu1 %vm309_vm2, %v762_v7  ;;  %715 = vmatmul.mubr.msk.bf16.vlgmr.msra.gmra.mrb[0].mxu0 %vm309_vm2, %v763_v8  ;;  %v767_v12 = vld [vmem:[%s826_s22 + $0x18] sm:$0xff]   ;;  %v769_v14 = vld [vmem:[%s826_s22 + $0x20] sm:$0xff]   ;;  %v771_v16 = vld [vmem:[%s826_s22 + $0x28] sm:$0xff]  }
  0x13   : > { %731 = vmatmul.mubr.msk.bf16.vlgmr.msra.gmra.mrb[0].mxu1 %vm309_vm2, %v764_v9  ;;  %718 = vmatprep.mubr.msk.bf16.mxu0 %vm309_vm2, %v765_v10  ;;  %v768_v13 = vld [vmem:[%s826_s22 + $0x58] sm:$0xff]   ;;  %v770_v15 = vld [vmem:[%s826_s22 + $0x60] sm:$0xff]   ;;  %v772_v17 = vld [vmem:[%s826_s22 + $0x68] sm:$0xff]  }
  0x14   : > { %734 = vmatprep.mubr.msk.bf16.mxu1 %vm309_vm2, %v766_v11  ;;  %v773_v18 = vld [vmem:[%s826_s22 + $0x30] sm:$0xff]   ;;  %v775_v20 = vld [vmem:[%s826_s22 + $0x38] sm:$0xff]  }
  0x15   : > { %v774_v19 = vld [vmem:[%s826_s22 + $0x70] sm:$0xff]   ;;  %v776_v21 = vld [vmem:[%s826_s22 + $0x78] sm:$0xff]  }
  0x1a   : > { %719 = vmatmul.mubr.msk.bf16.gmra.mrb[4].mxu0 %vm309_vm2, %v767_v12 }
  0x1b   : > { %735 = vmatmul.mubr.msk.bf16.gmra.mrb[4].mxu1 %vm309_vm2, %v768_v13  ;;  %722 = vmatprep.mubr.msk.bf16.mxu0 %vm309_vm2, %v769_v14 }
  0x1c   : > { %738 = vmatprep.mubr.msk.bf16.mxu1 %vm309_vm2, %v770_v15 }
  0x22   : > { %723 = vmatmul.mubr.msk.bf16.gmra.mrb[8].mxu0 %vm309_vm2, %v771_v16 }
  0x23   : > { %739 = vmatmul.mubr.msk.bf16.gmra.mrb[8].mxu1 %vm309_vm2, %v772_v17  ;;  %726 = vmatprep.mubr.msk.bf16.mxu0 %vm309_vm2, %v773_v18 }
  0x24   : > { %742 = vmatprep.mubr.msk.bf16.mxu1 %vm309_vm2, %v774_v19 }
  0x2a   : > { %727 = vmatmul.mubr.msk.bf16.gmra.mrb[12].mxu0 %vm309_vm2, %v775_v20 }
  0x2b   : > { %743 = vmatmul.mubr.msk.bf16.gmra.mrb[12].mxu1 %vm309_vm2, %v776_v21 }
  0xe5   : > { %v716_v23 = vpop.f32.mrb[0].mxu0 }
  0xe6   : > { %v408_v24 = vadd.f32 %v716_v23, %v863_v22  ;;  %v732_v25 = vpop.f32.mrb[0].mxu1  ;;  %v399_v26 = vpop.f32.mrb[1].mxu0 }
  0xe7   : > { %v472_v27 = vadd.f32 %v732_v25, %v863_v22  ;;  %v400_v28 = vadd.f32 %v863_v22, %v399_v26  ;;  %v463_v29 = vpop.f32.mrb[1].mxu1  ;;  %v717_v30 = vpop.f32.mrb[2].mxu0 }
  0xe8   : > { %v528_v31 = vmax.f32 %v408_v24, 0.0  ;;  %v464_v32 = vadd.f32 %v863_v22, %v463_v29  ;;  %v411_v33 = vadd.f32 %v717_v30, %v863_v22  ;;  %v733_v34 = vpop.f32.mrb[2].mxu1  ;;  %v402_v35 = vpop.f32.mrb[3].mxu0 }
  0xe9   : > { %v544_v36 = vmax.f32 %v472_v27, 0.0  ;;  %v526_v37 = vmax.f32 %v400_v28, 0.0  ;;  %v475_v38 = vadd.f32 %v733_v34, %v863_v22  ;;  %v403_v39 = vadd.f32 %v863_v22, %v402_v35  ;;  %v466_v40 = vpop.f32.mrb[3].mxu1 }
  0xea   : > { %560 = vst [vmem:[%s870_s28 + $0x10] sm:$0xff] %v528_v31  ;;  %v542_v41 = vmax.f32 %v464_v32, 0.0  ;;  %v529_v42 = vmax.f32 %v411_v33, 0.0  ;;  %v467_v43 = vadd.f32 %v863_v22, %v466_v40 }
  0xeb   : > { %576 = vst [vmem:[%s870_s28 + $0x90] sm:$0xff] %v544_v36  ;;  %558 = vst [vmem:[%s870_s28] sm:$0xff] %v526_v37  ;;  %v545_v44 = vmax.f32 %v475_v38, 0.0  ;;  %v527_v45 = vmax.f32 %v403_v39, 0.0 }
  0xec   : > { %574 = vst [vmem:[%s870_s28 + $0x80] sm:$0xff] %v542_v41  ;;  %561 = vst [vmem:[%s870_s28 + $0x18] sm:$0xff] %v529_v42  ;;  %v543_v46 = vmax.f32 %v467_v43, 0.0 }
  0xed   : > { %577 = vst [vmem:[%s870_s28 + $0x98] sm:$0xff] %v545_v44  ;;  %559 = vst [vmem:[%s870_s28 + $0x8] sm:$0xff] %v527_v45  ;;  %v720_v47 = vpop.f32.mrb[4].mxu0 }
  0xee   : > { %575 = vst [vmem:[%s870_s28 + $0x88] sm:$0xff] %v543_v46  ;;  %v424_v48 = vadd.f32 %v720_v47, %v863_v22  ;;  %v736_v49 = vpop.f32.mrb[4].mxu1  ;;  %v415_v50 = vpop.f32.mrb[5].mxu0 }
  0xef   : > { %v488_v51 = vadd.f32 %v736_v49, %v863_v22  ;;  %v416_v52 = vadd.f32 %v863_v22, %v415_v50  ;;  %v479_v53 = vpop.f32.mrb[5].mxu1  ;;  %v721_v54 = vpop.f32.mrb[6].mxu0 }
  0xf0   : > { %v532_v55 = vmax.f32 %v424_v48, 0.0  ;;  %v480_v56 = vadd.f32 %v863_v22, %v479_v53  ;;  %v427_v57 = vadd.f32 %v721_v54, %v863_v22  ;;  %v737_v58 = vpop.f32.mrb[6].mxu1  ;;  %v418_v59 = vpop.f32.mrb[7].mxu0 }
  0xf1   : > { %v548_v60 = vmax.f32 %v488_v51, 0.0  ;;  %v530_v61 = vmax.f32 %v416_v52, 0.0  ;;  %v491_v62 = vadd.f32 %v737_v58, %v863_v22  ;;  %v419_v63 = vadd.f32 %v863_v22, %v418_v59  ;;  %v482_v0 = vpop.f32.mrb[7].mxu1 }
  0xf2   : > { %564 = vst [vmem:[%s870_s28 + $0x30] sm:$0xff] %v532_v55  ;;  %v546_v1 = vmax.f32 %v480_v56, 0.0  ;;  %v533_v2 = vmax.f32 %v427_v57, 0.0  ;;  %v483_v3 = vadd.f32 %v863_v22, %v482_v0 }
  0xf3   : > { %580 = vst [vmem:[%s870_s28 + $0xb0] sm:$0xff] %v548_v60  ;;  %562 = vst [vmem:[%s870_s28 + $0x20] sm:$0xff] %v530_v61  ;;  %v549_v4 = vmax.f32 %v491_v62, 0.0  ;;  %v531_v5 = vmax.f32 %v419_v63, 0.0 }
  0xf4   : > { %578 = vst [vmem:[%s870_s28 + $0xa0] sm:$0xff] %v546_v1  ;;  %565 = vst [vmem:[%s870_s28 + $0x38] sm:$0xff] %v533_v2  ;;  %v547_v6 = vmax.f32 %v483_v3, 0.0 }
  0xf5   : > { %581 = vst [vmem:[%s870_s28 + $0xb8] sm:$0xff] %v549_v4  ;;  %563 = vst [vmem:[%s870_s28 + $0x28] sm:$0xff] %v531_v5  ;;  %v724_v7 = vpop.f32.mrb[8].mxu0 }
  0xf6   : > { %579 = vst [vmem:[%s870_s28 + $0xa8] sm:$0xff] %v547_v6  ;;  %v440_v8 = vadd.f32 %v724_v7, %v863_v22  ;;  %v740_v9 = vpop.f32.mrb[8].mxu1  ;;  %v431_v10 = vpop.f32.mrb[9].mxu0 }
  0xf7   : > { %v504_v11 = vadd.f32 %v740_v9, %v863_v22  ;;  %v432_v12 = vadd.f32 %v863_v22, %v431_v10  ;;  %v495_v13 = vpop.f32.mrb[9].mxu1  ;;  %v725_v14 = vpop.f32.mrb[10].mxu0 }
  0xf8   : > { %v536_v15 = vmax.f32 %v440_v8, 0.0  ;;  %v496_v16 = vadd.f32 %v863_v22, %v495_v13  ;;  %v443_v17 = vadd.f32 %v725_v14, %v863_v22  ;;  %v741_v18 = vpop.f32.mrb[10].mxu1  ;;  %v434_v19 = vpop.f32.mrb[11].mxu0 }
  0xf9   : > { %v552_v20 = vmax.f32 %v504_v11, 0.0  ;;  %v534_v21 = vmax.f32 %v432_v12, 0.0  ;;  %v507_v23 = vadd.f32 %v741_v18, %v863_v22  ;;  %v435_v24 = vadd.f32 %v863_v22, %v434_v19  ;;  %v498_v25 = vpop.f32.mrb[11].mxu1 }
  0xfa   : > { %568 = vst [vmem:[%s870_s28 + $0x50] sm:$0xff] %v536_v15  ;;  %v550_v26 = vmax.f32 %v496_v16, 0.0  ;;  %v537_v27 = vmax.f32 %v443_v17, 0.0  ;;  %v499_v28 = vadd.f32 %v863_v22, %v498_v25 }
  0xfb   : > { %584 = vst [vmem:[%s870_s28 + $0xd0] sm:$0xff] %v552_v20  ;;  %566 = vst [vmem:[%s870_s28 + $0x40] sm:$0xff] %v534_v21  ;;  %v553_v29 = vmax.f32 %v507_v23, 0.0  ;;  %v535_v30 = vmax.f32 %v435_v24, 0.0 }
  0xfc   : > { %582 = vst [vmem:[%s870_s28 + $0xc0] sm:$0xff] %v550_v26  ;;  %569 = vst [vmem:[%s870_s28 + $0x58] sm:$0xff] %v537_v27  ;;  %v551_v31 = vmax.f32 %v499_v28, 0.0 }
  0xfd   : > { %585 = vst [vmem:[%s870_s28 + $0xd8] sm:$0xff] %v553_v29  ;;  %567 = vst [vmem:[%s870_s28 + $0x48] sm:$0xff] %v535_v30  ;;  %v728_v32 = vpop.f32.mrb[12].mxu0 }
  0xfe   : > { %583 = vst [vmem:[%s870_s28 + $0xc8] sm:$0xff] %v551_v31  ;;  %v456_v33 = vadd.f32 %v728_v32, %v863_v22  ;;  %v744_v34 = vpop.f32.mrb[12].mxu1  ;;  %v447_v35 = vpop.f32.mrb[13].mxu0 }
  0xff   : > { %v520_v36 = vadd.f32 %v744_v34, %v863_v22  ;;  %v448_v37 = vadd.f32 %v863_v22, %v447_v35  ;;  %v511_v38 = vpop.f32.mrb[13].mxu1  ;;  %v729_v39 = vpop.f32.mrb[14].mxu0 }
 0x100   : > { %v540_v40 = vmax.f32 %v456_v33, 0.0  ;;  %v512_v41 = vadd.f32 %v863_v22, %v511_v38  ;;  %v459_v42 = vadd.f32 %v729_v39, %v863_v22  ;;  %v745_v43 = vpop.f32.mrb[14].mxu1  ;;  %v450_v44 = vpop.f32.mrb[15].mxu0 }
 0x101   : > { %v556_v45 = vmax.f32 %v520_v36, 0.0  ;;  %v538_v46 = vmax.f32 %v448_v37, 0.0  ;;  %v523_v47 = vadd.f32 %v745_v43, %v863_v22  ;;  %v451_v48 = vadd.f32 %v863_v22, %v450_v44  ;;  %v514_v49 = vpop.f32.mrb[15].mxu1 }
 0x102   : > { %572 = vst [vmem:[%s870_s28 + $0x70] sm:$0xff] %v540_v40  ;;  %v554_v50 = vmax.f32 %v512_v41, 0.0  ;;  %v541_v51 = vmax.f32 %v459_v42, 0.0  ;;  %v515_v52 = vadd.f32 %v863_v22, %v514_v49 }
 0x103   : > { %588 = vst [vmem:[%s870_s28 + $0xf0] sm:$0xff] %v556_v45  ;;  %570 = vst [vmem:[%s870_s28 + $0x60] sm:$0xff] %v538_v46  ;;  %v557_v53 = vmax.f32 %v523_v47, 0.0  ;;  %v539_v54 = vmax.f32 %v451_v48, 0.0 }
 0x104   : > { %586 = vst [vmem:[%s870_s28 + $0xe0] sm:$0xff] %v554_v50  ;;  %573 = vst [vmem:[%s870_s28 + $0x78] sm:$0xff] %v541_v51  ;;  %v555_v55 = vmax.f32 %v515_v52, 0.0 }
 0x105   : > { %589 = vst [vmem:[%s870_s28 + $0xf8] sm:$0xff] %v557_v53  ;;  %571 = vst [vmem:[%s870_s28 + $0x68] sm:$0xff] %v539_v54 }
 0x106   : > { %587 = vst [vmem:[%s870_s28 + $0xe8] sm:$0xff] %v555_v55 }
 0x107 PF: > { %s13_s12 = sadd.s32 1, %s783_s12  }
 0x108   : > { %p10_p4 = scmp.ge.s32.totalorder %s13_s12, 4  }
 0x10a   :  { %12 = sbr.rel (!%p10_p4) target bundleno = 1 (0x1), region = 62 }

// kernel: shufflenet_v2_forward.20
= control target key start
LH: loop header
LB: loop body
LE: loop exit
PB: predicated region body
PF: predicated region fallthrough
CT: control target
= control target key end

     0   :  { %s632_s15 = smov 0   ;;  %s799_s0 = inlined_call_operand.vmem [shape: f32[2,9,9,24], index: 0, kind: input, shape index: {}]   ;;  %s800_s1 = inlined_call_operand.vmem [shape: f32[2,9,9,24], index: 1, kind: input, shape index: {}]   ;;  %s801_s2 = inlined_call_operand.vmem [shape: f32[2,9,9,24], index: 2, kind: input, shape index: {}]   ;;  %s802_s3 = inlined_call_operand.vmem [shape: f32[2,9,9,24], index: 3, kind: input, shape index: {}]   ;;  %s803_s4 = inlined_call_operand.vmem [shape: f32[2,8,8,24], index: 4, kind: output, shape index: {}]  }
   0x1 LB: > { %s576_s16 = sadd.s32 4294967295, %s605_s15   ;;  %p580_p0 = scmp.ge.s32.totalorder %s605_s15, 1  ;;  %s605_s15 = sphi %s632_s15, %s14_s15  }
   0x2   : > { %p192_p1 = scmp.lt.s32.totalorder %s605_s15, 3 }
   0x4   : > { %p193_p2 = pnand %p580_p0, %p192_p1 }
   0x5   : > { %p233_p3 = scmp.lt.s32.totalorder (!%p193_p2), %s576_s16, 1  ;;  %vm333_vm0 = vcmask (!%p193_p2), 1046528   ;;  %vm476_vm1 = vcmask (!%p193_p2), 195584  }
   0x6   : > { %196 = sbr.rel (%p193_p2) target bundleno = 58 (0x3a), region = 36 }
   0xd   : > { %s805_s16 = smov (!%p233_p3, %s576_s16), 1 }
   0xe   : > { %s590_s17 = smul.u32 144, %s805_s16  ;;  %s589_s30 = sshll.u32 %s805_s16, 6 }
   0xf   : > { %s740_s7 = scalar_lea.vmem %s803_s4, %s589_s30 }
  0x10   : > { %s646_s20 = scalar_lea.vmem %s799_s0, %s590_s17  ;;  %s651_s23 = scalar_lea.vmem %s800_s1, %s590_s17 }
  0x11   : > { %s656_s26 = scalar_lea.vmem %s801_s2, %s590_s17  ;;  %s661_s29 = scalar_lea.vmem %s802_s3, %s590_s17  ;;  %v258_v0 = vld [vmem:[%s646_s20] sm:$0xff]  ;;  %v259_v1 = vld [vmem:[%s646_s20 + $0x8] sm:$0x1]  ;;  %v666_v2 = vld [vmem:[%s646_s20 + $0x10] sm:$0xff] }
  0x12   : > { %v261_v3 = vld [vmem:[%s646_s20 + $0x18] sm:$0x1]  ;;  %v276_v4 = vld [vmem:[%s651_s23] sm:$0xff]  ;;  %v671_v5 = vld [vmem:[%s651_s23 + $0x10] sm:$0xff]  ;;  %v334_v6 = vrot.slane %v258_v0, 1  ;;  %v335_v7 = vrot.slane %v259_v1, 1 }
  0x13   : > { %v285_v8 = vld [vmem:[%s656_s26] sm:$0xff]  ;;  %v286_v9 = vld [vmem:[%s656_s26 + $0x8] sm:$0x1]  ;;  %v287_v10 = vld [vmem:[%s656_s26 + $0x10] sm:$0xff]  ;;  %v309_v11 = vmax.f32 %v258_v0, %v276_v4  ;;  %v310_v12 = vmax.f32 %v666_v2, %v671_v5  ;;  %v337_v13 = vrot.slane %v666_v2, 1  ;;  %v338_v14 = vrot.slane %v261_v3, 1 }
  0x14   : > { %v301_v15 = vld [vmem:[%s661_s29] sm:$0xff]  ;;  %v336_v16 = vsel %vm333_vm0, %v334_v6, %v335_v7  ;;  %v406_v17 = vrot.slane %v285_v8, 1  ;;  %v407_v18 = vrot.slane %v286_v9, 1  ;;  %v409_v19 = vrot.slane %v287_v10, 1  ;;  %v263_v23 = vld [vmem:[%s646_s20 + $0x28] sm:$0x1] }
  0x15   : > { %v262_v20 = vld [vmem:[%s646_s20 + $0x20] sm:$0xff]  ;;  %v683_v21 = vsel %vm333_vm0, %v337_v13, %v338_v14  ;;  %v366_v22 = vmax.f32 %v309_v11, %v336_v16  ;;  %v288_v25 = vld [vmem:[%s656_s26 + $0x18] sm:$0x1]  ;;  %v302_v27 = vld [vmem:[%s661_s29 + $0x10] sm:$0xff]  ;;  %v341_v31 = vrot.slane %v263_v23, 1 }
  0x16   : > { %v687_v24 = vld [vmem:[%s651_s23 + $0x20] sm:$0xff]  ;;  %v340_v26 = vrot.slane %v262_v20, 1  ;;  %v367_v28 = vmax.f32 %v310_v12, %v683_v21  ;;  %v264_v32 = vld [vmem:[%s646_s20 + $0x30] sm:$0xff]  ;;  %v408_v34 = vsel %vm333_vm0, %v406_v17, %v407_v18  ;;  %v410_v35 = vrot.slane %v288_v25, 1  ;;  %v265_v37 = vld [vmem:[%s646_s20 + $0x38] sm:$0x1] }
  0x17   : > { %v289_v29 = vld [vmem:[%s656_s26 + $0x20] sm:$0xff]  ;;  %v311_v30 = vmax.f32 %v262_v20, %v687_v24  ;;  %v374_v33 = vmax.f32 %v366_v22, %v285_v8  ;;  %v698_v38 = vld [vmem:[%s651_s23 + $0x30] sm:$0xff]  ;;  %v290_v42 = vld [vmem:[%s656_s26 + $0x28] sm:$0x1]  ;;  %v343_v44 = vrot.slane %v264_v32, 1  ;;  %v344_v49 = vrot.slane %v265_v37, 1 }
  0x18   : > { %v412_v36 = vrot.slane %v289_v29, 1  ;;  %v291_v39 = vld [vmem:[%s656_s26 + $0x30] sm:$0xff]  ;;  %v375_v40 = vmax.f32 %v367_v28, %v287_v10  ;;  %v342_v41 = vsel %vm333_vm0, %v340_v26, %v341_v31  ;;  %v312_v43 = vmax.f32 %v264_v32, %v698_v38  ;;  %v705_v45 = vld [vmem:[%s646_s20 + $0x40] sm:$0xff]  ;;  %v267_v50 = vld [vmem:[%s646_s20 + $0x48] sm:$0x1] }
  0x19   : > { %v382_v46 = vmax.f32 %v374_v33, %v301_v15  ;;  %v368_v47 = vmax.f32 %v311_v30, %v342_v41  ;;  %v411_v48 = vsel %vm333_vm0, %v409_v19, %v410_v35  ;;  %v710_v51 = vld [vmem:[%s651_s23 + $0x40] sm:$0xff]  ;;  %v413_v54 = vrot.slane %v290_v42, 1  ;;  %v292_v56 = vld [vmem:[%s656_s26 + $0x38] sm:$0x1]  ;;  %v720_v63 = vld [vmem:[%s646_s20 + $0x50] sm:$0xff] }
  0x1a   : > { %v383_v52 = vmax.f32 %v375_v40, %v302_v27  ;;  %v303_v53 = vld [vmem:[%s661_s29 + $0x20] sm:$0xff]  ;;  %v415_v55 = vrot.slane %v291_v39, 1  ;;  %v313_v58 = vmax.f32 %v705_v45, %v710_v51  ;;  %v345_v61 = vsel %vm333_vm0, %v343_v44, %v344_v49  ;;  %v723_v0 = vld [vmem:[%s651_s23 + $0x50] sm:$0xff]  ;;  %v269_v12 = vld [vmem:[%s646_s20 + $0x58] sm:$0x1] }
  0x1b   : > { %v293_v57 = vld [vmem:[%s656_s26 + $0x40] sm:$0xff]  ;;  %v438_v59 = vmax.f32 %v382_v46, %v408_v34  ;;  %v376_v60 = vmax.f32 %v368_v47, %v289_v29  ;;  %v346_v62 = vrot.slane %v705_v45, 1  ;;  %v369_v3 = vmax.f32 %v312_v43, %v345_v61  ;;  %v304_v9 = vld [vmem:[%s661_s29 + $0x30] sm:$0xff]  ;;  %v294_v16 = vld [vmem:[%s656_s26 + $0x48] sm:$0x1] }
  0x1c   : > { %v439_v1 = vmax.f32 %v383_v52, %v411_v48  ;;  %v414_v4 = vsel %vm333_vm0, %v412_v36, %v413_v54  ;;  %v347_v6 = vrot.slane %v267_v50, 1  ;;  %v416_v10 = vrot.slane %v292_v56, 1  ;;  %v295_v23 = vld [vmem:[%s656_s26 + $0x50] sm:$0xff]  ;;  %v305_v26 = vld [vmem:[%s661_s29 + $0x40] sm:$0xff]  ;;  %v271_v34 = vld [vmem:[%s646_s20 + $0x68] sm:$0x1] }
  0x1d   : > { %v446_v7 = vmax.f32 %v438_v59, %v666_v2  ;;  %v384_v8 = vmax.f32 %v376_v60, %v303_v53  ;;  %v418_v11 = vrot.slane %v293_v57, 1  ;;  %v377_v14 = vmax.f32 %v369_v3, %v291_v39  ;;  %v270_v33 = vld [vmem:[%s646_s20 + $0x60] sm:$0xff]  ;;  %v296_v40 = vld [vmem:[%s656_s26 + $0x58] sm:$0x1]  ;;  %v272_v46 = vld [vmem:[%s646_s20 + $0x70] sm:$0xff] }
  0x1e   : > { %v447_v13 = vmax.f32 %v439_v1, %v262_v20  ;;  %v348_v15 = vsel %vm333_vm0, %v346_v62, %v347_v6  ;;  %v314_v17 = vmax.f32 %v720_v63, %v723_v0  ;;  %v417_v22 = vsel %vm333_vm0, %v415_v55, %v416_v10  ;;  %v749_v35 = vld [vmem:[%s651_s23 + $0x60] sm:$0xff]  ;;  %v283_v47 = vld [vmem:[%s651_s23 + $0x70] sm:$0xff]  ;;  %v273_v56 = vld [vmem:[%s646_s20 + $0x78] sm:$0x1] }
  0x1f   : > { %v454_v18 = vmax.f32 %v446_v7, %v671_v5  ;;  %v440_v19 = vmax.f32 %v384_v8, %v414_v4  ;;  %v370_v2 = vmax.f32 %v313_v58, %v348_v15  ;;  %v385_v25 = vmax.f32 %v377_v14, %v304_v9  ;;  %v297_v44 = vld [vmem:[%s656_s26 + $0x60] sm:$0xff]  ;;  %v306_v48 = vld [vmem:[%s661_s29 + $0x50] sm:$0xff]  ;;  %v300_v6 = vld [vmem:[%s656_s26 + $0x78] sm:$0x1] }
  0x20   : > { %v455_v20 = vmax.f32 %v447_v13, %v687_v24  ;;  %v349_v5 = vrot.slane %v720_v63, 1  ;;  %v350_v27 = vrot.slane %v269_v12, 1  ;;  %v419_v31 = vrot.slane %v294_v16, 1  ;;  %v299_v4 = vld [vmem:[%s656_s26 + $0x70] sm:$0xff]  ;;  %v307_v8 = vld [vmem:[%s661_s29 + $0x60] sm:$0xff] }
  0x21   : > { %v468_v28 = vmax.f32 %v454_v18, %v683_v21  ;;  %v448_v29 = vmax.f32 %v440_v19, %v264_v32  ;;  %v378_v30 = vmax.f32 %v370_v2, %v293_v57  ;;  %v441_v36 = vmax.f32 %v385_v25, %v417_v22  ;;  %v298_v57 = vld [vmem:[%s656_s26 + $0x68] sm:$0x1]  ;;  %v308_v22 = vld [vmem:[%s661_s29 + $0x70] sm:$0xff]  ;;  %v274_v25 = vld [vmem:[%s646_s20 + $0x80] sm:$0xff] }
  0x22   : > { %v469_v24 = vmax.f32 %v455_v20, %v342_v41  ;;  %v351_v37 = vsel %vm333_vm0, %v349_v5, %v350_v27  ;;  %v421_v39 = vrot.slane %v295_v23, 1  ;;  %v420_v43 = vsel %vm333_vm0, %v418_v11, %v419_v31 }
  0x23   : > { %477 = vst.msk [vmem:[%s740_s7] sm:$0xff] %vm476_vm1, %v468_v28  ;;  %v456_v21 = vmax.f32 %v448_v29, %v698_v38  ;;  %v386_v32 = vmax.f32 %v378_v30, %v305_v26  ;;  %v371_v42 = vmax.f32 %v314_v17, %v351_v37  ;;  %v449_v41 = vmax.f32 %v441_v36, %v705_v45  ;;  %v275_v26 = vld [vmem:[%s646_s20 + $0x88] sm:$0x1] }
  0x24   : > { %478 = vst.msk [vmem:[%s740_s7 + $0x8] sm:$0xff] %vm476_vm1, %v469_v24  ;;  %v315_v49 = vmax.f32 %v270_v33, %v749_v35  ;;  %v352_v50 = vrot.slane %v270_v33, 1  ;;  %v353_v52 = vrot.slane %v271_v34, 1  ;;  %v422_v55 = vrot.slane %v296_v40, 1  ;;  %v284_v24 = vld [vmem:[%s651_s23 + $0x80] sm:$0xff] }
  0x25   : > { %v470_v38 = vmax.f32 %v456_v21, %v345_v61  ;;  %v379_v53 = vmax.f32 %v371_v42, %v295_v23  ;;  %v442_v54 = vmax.f32 %v386_v32, %v420_v43  ;;  %v457_v58 = vmax.f32 %v449_v41, %v710_v51 }
  0x26   : > { %v354_v59 = vsel %vm333_vm0, %v352_v50, %v353_v52  ;;  %v424_v60 = vrot.slane %v297_v44, 1  ;;  %v316_v45 = vmax.f32 %v272_v46, %v283_v47  ;;  %v423_v3 = vsel %vm333_vm0, %v421_v39, %v422_v55 }
  0x27   : > { %479 = vst.msk [vmem:[%s740_s7 + $0x10] sm:$0xff] %vm476_vm1, %v470_v38  ;;  %v387_v62 = vmax.f32 %v379_v53, %v306_v48  ;;  %v450_v1 = vmax.f32 %v442_v54, %v720_v63  ;;  %v372_v61 = vmax.f32 %v315_v49, %v354_v59  ;;  %v471_v7 = vmax.f32 %v457_v58, %v348_v15 }
  0x28   : > { %v355_v9 = vrot.slane %v272_v46, 1  ;;  %v356_v51 = vrot.slane %v273_v56, 1  ;;  %v425_v10 = vrot.slane %v298_v57, 1  ;;  %v427_v16 = vrot.slane %v299_v4, 1 }
  0x29   : > { %v458_v11 = vmax.f32 %v450_v1, %v723_v0  ;;  %v380_v12 = vmax.f32 %v372_v61, %v297_v44  ;;  %v443_v13 = vmax.f32 %v387_v62, %v423_v3  ;;  %480 = vst.msk [vmem:[%s740_s7 + $0x18] sm:$0xff] %vm476_vm1, %v471_v7  ;;  %v428_v15 = vrot.slane %v300_v6, 1 }
  0x2a   : > { %v357_v63 = vsel %vm333_vm0, %v355_v9, %v356_v51  ;;  %v426_v14 = vsel %vm333_vm0, %v424_v60, %v425_v10  ;;  %v464_v30 = vrot.slane %v274_v25, 1  ;;  %v465_v31 = vrot.slane %v275_v26, 1 }
  0x2b   : > { %v472_v17 = vmax.f32 %v458_v11, %v351_v37  ;;  %v388_v18 = vmax.f32 %v380_v12, %v307_v8  ;;  %v451_v19 = vmax.f32 %v443_v13, %v270_v33  ;;  %v373_v2 = vmax.f32 %v316_v45, %v357_v63 }
  0x2c   : > { %v429_v5 = vsel %vm333_vm0, %v427_v16, %v428_v15  ;;  %v466_v37 = vsel %vm333_vm0, %v464_v30, %v465_v31 }
  0x2d   : > { %481 = vst.msk [vmem:[%s740_s7 + $0x20] sm:$0xff] %vm476_vm1, %v472_v17  ;;  %v459_v0 = vmax.f32 %v451_v19, %v749_v35  ;;  %v381_v23 = vmax.f32 %v373_v2, %v299_v4  ;;  %v444_v20 = vmax.f32 %v388_v18, %v426_v14 }
  0x2f   : > { %v473_v27 = vmax.f32 %v459_v0, %v354_v59  ;;  %v389_v28 = vmax.f32 %v381_v23, %v308_v22  ;;  %v452_v29 = vmax.f32 %v444_v20, %v272_v46 }
  0x31   : > { %482 = vst.msk [vmem:[%s740_s7 + $0x28] sm:$0xff] %vm476_vm1, %v473_v27  ;;  %v460_v33 = vmax.f32 %v452_v29, %v283_v47  ;;  %v445_v34 = vmax.f32 %v389_v28, %v429_v5 }
  0x33   : > { %v474_v36 = vmax.f32 %v460_v33, %v357_v63  ;;  %v453_v35 = vmax.f32 %v445_v34, %v274_v25 }
  0x35   : > { %483 = vst.msk [vmem:[%s740_s7 + $0x30] sm:$0xff] %vm476_vm1, %v474_v36  ;;  %v461_v39 = vmax.f32 %v453_v35, %v284_v24 }
  0x37   : > { %v475_v40 = vmax.f32 %v461_v39, %v466_v37 }
  0x39   : > { %484 = vst.msk [vmem:[%s740_s7 + $0x38] sm:$0xff] %vm476_vm1, %v475_v40 }
  0x3a PF: > { %s14_s15 = sadd.s32 1, %s605_s15  }
  0x3b   : > { %p11_p4 = scmp.ge.s32.totalorder %s14_s15, 4  }
  0x3d   :  { %13 = sbr.rel (!%p11_p4) target bundleno = 1 (0x1), region = 75 }

// kernel: shufflenet_v2_forward.22
= control target key start
LH: loop header
LB: loop body
LE: loop exit
PB: predicated region body
PF: predicated region fallthrough
CT: control target
= control target key end

     0   :  { %vm48_vm0 = vcmask 195584   ;;  %vm55_vm1 = vcmask 1043456   ;;  %s191_s1 = inlined_call_operand.vmem [shape: bf16[24,128], index: 1, kind: input, shape index: {}]   ;;  %s192_s0 = inlined_call_operand.vmem [shape: bf16[32,24], index: 0, kind: input, shape index: {}]   ;;  %s193_s2 = inlined_call_operand.vmem [shape: f32[1,128], index: 2, kind: input, shape index: {}]   ;;  %s194_s3 = inlined_call_operand.vmem [shape: f32[32,128], index: 3, kind: output, shape index: {}]  }
   0x1   :  { %v140_v0 = vld [vmem:[%s191_s1] sm:$0xff]   ;;  %v141_v1 = vld [vmem:[%s191_s1 + $0x8] ss:$0 sps:$4 sm:$0xff]  }
   0x2   :  { %v142_v2 = vld [vmem:[%s192_s0] sm:$0xff]   ;;  %131 = vmatprep.subr.bf16.mxu0 %v140_v0  ;;  %v57_v3 = vsel %vm55_vm1, %v141_v1, 0  ;;  %v143_v4 = vld [vmem:[%s192_s0 + $0x8] sm:$0xff]  }
   0x3   :  { %132 = vmatpush3.bf16.msra.mxu0 %v140_v0  ;;  %135 = vmatprep.mubr.msk.bf16.mxu0 %vm48_vm0, %v142_v2  ;;  %v120_v5 = vld [vmem:[%s193_s2] ss:$0 sm:$0xff] }
   0x4   :  { %139 = vmatprep.subr.msk.bf16.mxu0 %vm55_vm1, %v141_v1 }
   0x7   :  { %134 = vmatpush3.bf16.msra.mxu0 %v57_v3 }
   0xa   :  { %136 = vmatmul.mubr.msk.bf16.vlgmr.msra.gmra.mrb[0].mxu0 %vm48_vm0, %v143_v4 }
  0xdd   :  { %v137_v6 = vpop.f32.mrb[0].mxu0 }
  0xde   :  { %v102_v7 = vadd.f32 %v137_v6, %v120_v5  ;;  %v93_v8 = vpop.f32.mrb[1].mxu0 }
  0xdf   :  { %v94_v9 = vadd.f32 %v120_v5, %v93_v8  ;;  %v138_v10 = vpop.f32.mrb[2].mxu0 }
  0xe0   :  { %v110_v11 = vmax.f32 %v102_v7, 0.0  ;;  %v105_v12 = vadd.f32 %v138_v10, %v120_v5  ;;  %v96_v13 = vpop.f32.mrb[3].mxu0 }
  0xe1   :  { %v108_v14 = vmax.f32 %v94_v9, 0.0  ;;  %v97_v15 = vadd.f32 %v120_v5, %v96_v13 }
  0xe2   :  { %114 = vst [vmem:[%s194_s3 + $0x10] sm:$0xff] %v110_v11  ;;  %v111_v16 = vmax.f32 %v105_v12, 0.0 }
  0xe3   :  { %112 = vst [vmem:[%s194_s3] sm:$0xff] %v108_v14  ;;  %v109_v17 = vmax.f32 %v97_v15, 0.0 }
  0xe4   :  { %115 = vst [vmem:[%s194_s3 + $0x18] sm:$0xff] %v111_v16 }
  0xe5   :  { %113 = vst [vmem:[%s194_s3 + $0x8] sm:$0xff] %v109_v17 }

// kernel: shufflenet_v2_forward.21
= control target key start
LH: loop header
LB: loop body
LE: loop exit
PB: predicated region body
PF: predicated region fallthrough
CT: control target
= control target key end

     0   :  { %s651_s21 = smov 0   ;;  %s756_s0 = inlined_call_operand.vmem [shape: f32[2,5,5,24], index: 0, kind: input, shape index: {}]   ;;  %s757_s1 = inlined_call_operand.vmem [shape: f32[2,5,5,24], index: 1, kind: input, shape index: {}]   ;;  %s758_s2 = inlined_call_operand.vmem [shape: f32[2,5,5,24], index: 2, kind: input, shape index: {}]   ;;  %s759_s3 = inlined_call_operand.vmem [shape: f32[2,5,5,24], index: 3, kind: input, shape index: {}]   ;;  %s760_s4 = inlined_call_operand.vmem [shape: f32[9,24], index: 4, kind: input, shape index: {}]   ;;  %s761_s5 = inlined_call_operand.vmem [shape: f32[1,24], index: 5, kind: input, shape index: {}]   ;;  %s762_s6 = inlined_call_operand.vmem [shape: f32[2,4,4,24], index: 6, kind: output, shape index: {}]  }
   0x1 LB: > { %s583_s22 = sadd.s32 4294967295, %s614_s21   ;;  %p587_p0 = scmp.ge.s32.totalorder %s614_s21, 1  ;;  %s614_s21 = sphi %s651_s21, %s16_s21  }
   0x2   : > { %p242_p1 = scmp.lt.s32.totalorder %s614_s21, 3 }
   0x4   : > { %p243_p2 = pnand %p587_p0, %p242_p1 }
   0x5   : > { %p287_p3 = scmp.lt.s32.totalorder (!%p243_p2), %s583_s22, 1  ;;  %v332_v0 = vlaneseq (!%p243_p2)  ;;  %v330_v2 = vld [vmem:[%s760_s4] sm:$0xff] (!%p243_p2)  ;;  %v678_v11 = vld [vmem:[%s760_s4 + $0x8] ss:$0 sm:$0xff] (!%p243_p2)  ;;  %vm487_vm0 = vcmask (!%p243_p2), 191488  }
   0x6   : > { %246 = sbr.rel (%p243_p2) target bundleno = 48 (0x30), region = 44 }
   0x7   : > { %v333_v1 = vshrl.u32 (!%p243_p2), %v332_v0, 7 }
   0x9   : > { %v334_v3 = vsub.s32 (!%p243_p2), 0, %v333_v1  ;;  %v346_v4 = vsub.s32 (!%p243_p2), 1, %v333_v1  ;;  %v358_v5 = vsub.s32 (!%p243_p2), 2, %v333_v1  ;;  %v382_v6 = vsub.s32 (!%p243_p2), 3, %v333_v1 }
   0xa   : > { %v394_v7 = vsub.s32 (!%p243_p2), 4, %v333_v1  ;;  %v406_v8 = vsub.s32 (!%p243_p2), 5, %v333_v1  ;;  %v430_v9 = vsub.s32 (!%p243_p2), 6, %v333_v1  ;;  %v442_v10 = vsub.s32 (!%p243_p2), 7, %v333_v1 }
   0xb   : > { %v335_v12 = vrot.slane (!%p243_p2), %v330_v2, %v334_v3  ;;  %v347_v13 = vrot.slane (!%p243_p2), %v330_v2, %v346_v4  ;;  %v359_v14 = vrot.slane (!%p243_p2), %v330_v2, %v358_v5  ;;  %v680_v15 = vrot.slane (!%p243_p2), %v330_v2, %v382_v6 }
   0xc   : > { %v695_v19 = vrot.slane (!%p243_p2), %v330_v2, %v394_v7  ;;  %v697_v20 = vrot.slane (!%p243_p2), %v330_v2, %v406_v8  ;;  %v699_v21 = vrot.slane (!%p243_p2), %v330_v2, %v430_v9  ;;  %v701_v22 = vrot.slane (!%p243_p2), %v330_v2, %v442_v10 }
   0xd   : > { %s764_s22 = smov (!%p287_p3, %s583_s22), 1 }
   0xe   : > { %s599_s25 = smul.u32 40, %s764_s22  ;;  %s598_s16 = sshll.u32 %s764_s22, 4 }
   0xf   : > { %s311_s22 = scalar_lea.vmem %s762_s6, %s598_s16 }
  0x10   : > { %s668_s28 = scalar_lea.vmem %s756_s0, %s599_s25  ;;  %s673_s7 = scalar_lea.vmem %s757_s1, %s599_s25 }
  0x11   : > { %s685_s12 = scalar_lea.vmem %s758_s2, %s599_s25  ;;  %s690_s15 = scalar_lea.vmem %s759_s3, %s599_s25  ;;  %v312_v16 = vld [vmem:[%s668_s28] sm:$0x1f]  ;;  %v313_v17 = vld [vmem:[%s668_s28 + $0x8] sm:$0x1f]  ;;  %v314_v33 = vld [vmem:[%s668_s28 + $0x10] sm:$0x1f] }
  0x12   : > { %v317_v18 = vld [vmem:[%s673_s7] sm:$0x1f]  ;;  %v318_v23 = vld [vmem:[%s673_s7 + $0x8] sm:$0x1f]  ;;  %v336_v26 = vmul.f32 %v335_v12, %v312_v16  ;;  %v337_v27 = vmul.f32 %v335_v12, %v313_v17  ;;  %v360_v29 = vmul.f32 %v359_v14, %v312_v16  ;;  %v361_v31 = vmul.f32 %v359_v14, %v313_v17  ;;  %v319_v34 = vld [vmem:[%s673_s7 + $0x10] sm:$0x1f] }
  0x13   : > { %v322_v24 = vld [vmem:[%s685_s12] sm:$0x1f]  ;;  %v348_v28 = vmul.f32 %v347_v13, %v317_v18  ;;  %v349_v30 = vmul.f32 %v347_v13, %v318_v23  ;;  %v323_v39 = vld [vmem:[%s685_s12 + $0x8] sm:$0x1f]  ;;  %v432_v42 = vmul.f32 %v699_v21, %v313_v17  ;;  %v456_v43 = vmul.f32 %v678_v11, %v313_v17  ;;  %v315_v53 = vld [vmem:[%s668_s28 + $0x18] sm:$0x1f] }
  0x14   : > { %v326_v25 = vld [vmem:[%s690_s15] sm:$0x1f]  ;;  %v384_v32 = vmul.f32 %v680_v15, %v322_v24  ;;  %v368_v36 = vrot.slane %v360_v29, 1  ;;  %v408_v38 = vmul.f32 %v697_v20, %v322_v24  ;;  %v369_v41 = vrot.slane %v361_v31, 1  ;;  %v327_v44 = vld [vmem:[%s690_s15 + $0x8] sm:$0x1f] }
  0x15   : > { %v352_v35 = vadd.f32 %v348_v28, %v336_v26  ;;  %v396_v37 = vmul.f32 %v695_v19, %v326_v25  ;;  %v353_v40 = vadd.f32 %v349_v30, %v337_v27  ;;  %v444_v46 = vmul.f32 %v701_v22, %v318_v23  ;;  %v320_v58 = vld [vmem:[%s673_s7 + $0x18] sm:$0x1f]  ;;  %v324_v63 = vld [vmem:[%s685_s12 + $0x10] sm:$0x1f] }
  0x16   : > { %v338_v47 = vmul.f32 %v335_v12, %v314_v33  ;;  %v350_v48 = vmul.f32 %v347_v13, %v319_v34  ;;  %v416_v50 = vrot.slane %v408_v38, 1  ;;  %v362_v51 = vmul.f32 %v359_v14, %v314_v33  ;;  %v328_v0 = vld [vmem:[%s690_s15 + $0x10] sm:$0x1f]  ;;  %v325_v26 = vld [vmem:[%s685_s12 + $0x18] sm:$0x1f] }
  0x17   : > { %v376_v45 = vadd.f32 %v368_v36, %v352_v35  ;;  %v377_v49 = vadd.f32 %v369_v41, %v353_v40  ;;  %v385_v52 = vmul.f32 %v680_v15, %v323_v39  ;;  %v397_v56 = vmul.f32 %v695_v19, %v327_v44  ;;  %v316_v35 = vld [vmem:[%s668_s28 + $0x20] sm:$0x1f] }
  0x18   : > { %v354_v55 = vadd.f32 %v350_v48, %v338_v47  ;;  %v409_v57 = vmul.f32 %v697_v20, %v323_v39  ;;  %v464_v59 = vrot.slane %v456_v43, 1  ;;  %v370_v60 = vrot.slane %v362_v51, 1  ;;  %v595_v38 = vld [vmem:[%s761_s5] ss:$0 sm:$0xff] }
  0x19   : > { %v388_v54 = vadd.f32 %v384_v32, %v376_v45  ;;  %v389_v61 = vadd.f32 %v385_v52, %v377_v49  ;;  %v433_v62 = vmul.f32 %v699_v21, %v314_v33  ;;  %v457_v3 = vmul.f32 %v678_v11, %v314_v33 }
  0x1a   : > { %v417_v2 = vrot.slane %v409_v57, 1  ;;  %v339_v4 = vmul.f32 %v335_v12, %v315_v53  ;;  %v378_v5 = vadd.f32 %v370_v60, %v354_v55  ;;  %v351_v7 = vmul.f32 %v347_v13, %v320_v58  ;;  %v329_v12 = vld [vmem:[%s690_s15 + $0x18] sm:$0x1f] }
  0x1b   : > { %v400_v1 = vadd.f32 %v396_v37, %v388_v54  ;;  %v401_v6 = vadd.f32 %v397_v56, %v389_v61  ;;  %v363_v8 = vmul.f32 %v359_v14, %v315_v53  ;;  %v445_v10 = vmul.f32 %v701_v22, %v319_v34 }
  0x1c   : > { %v386_v16 = vmul.f32 %v680_v15, %v324_v63  ;;  %v398_v17 = vmul.f32 %v695_v19, %v328_v0  ;;  %v355_v23 = vadd.f32 %v351_v7, %v339_v4  ;;  %v410_v25 = vmul.f32 %v697_v20, %v324_v63 }
  0x1d   : > { %v424_v9 = vadd.f32 %v416_v50, %v400_v1  ;;  %v425_v18 = vadd.f32 %v417_v2, %v401_v6  ;;  %v371_v24 = vrot.slane %v363_v8, 1  ;;  %v465_v28 = vrot.slane %v457_v3, 1 }
  0x1e   : > { %v390_v13 = vadd.f32 %v386_v16, %v378_v5  ;;  %v434_v14 = vmul.f32 %v699_v21, %v315_v53  ;;  %v418_v31 = vrot.slane %v410_v25, 1  ;;  %v458_v32 = vmul.f32 %v678_v11, %v315_v53 }
  0x1f   : > { %v436_v27 = vadd.f32 %v432_v42, %v424_v9  ;;  %v437_v29 = vadd.f32 %v433_v62, %v425_v18  ;;  %v379_v30 = vadd.f32 %v371_v24, %v355_v23  ;;  %v387_v36 = vmul.f32 %v680_v15, %v325_v26 }
  0x20   : > { %v402_v34 = vadd.f32 %v398_v17, %v390_v13  ;;  %v399_v37 = vmul.f32 %v695_v19, %v329_v12  ;;  %v411_v40 = vmul.f32 %v697_v20, %v325_v26  ;;  %v446_v43 = vmul.f32 %v701_v22, %v320_v58  ;;  %v321_v19 = vld [vmem:[%s673_s7 + $0x20] sm:$0x1f] }
  0x21   : > { %v448_v33 = vadd.f32 %v444_v46, %v436_v27  ;;  %v449_v39 = vadd.f32 %v445_v10, %v437_v29  ;;  %v391_v44 = vadd.f32 %v387_v36, %v379_v30  ;;  %v466_v45 = vrot.slane %v458_v32, 1 }
  0x22   : > { %v426_v42 = vadd.f32 %v418_v31, %v402_v34  ;;  %v419_v46 = vrot.slane %v411_v40, 1  ;;  %v435_v47 = vmul.f32 %v699_v21, %v316_v35  ;;  %v459_v20 = vmul.f32 %v678_v11, %v316_v35 }
  0x23   : > { %v472_v41 = vadd.f32 %v464_v59, %v448_v33  ;;  %v473_v15 = vadd.f32 %v465_v28, %v449_v39  ;;  %v403_v50 = vadd.f32 %v399_v37, %v391_v44  ;;  %v447_v54 = vmul.f32 %v701_v22, %v321_v19 }
  0x24   : > { %v438_v49 = vadd.f32 %v434_v14, %v426_v42  ;;  %v467_v57 = vrot.slane %v459_v20, 1 }
  0x25   : > { %v483_v48 = vadd.f32 %v595_v38, %v472_v41  ;;  %v484_v51 = vadd.f32 %v595_v38, %v473_v15  ;;  %v427_v53 = vadd.f32 %v419_v46, %v403_v50 }
  0x26   : > { %v450_v52 = vadd.f32 %v446_v43, %v438_v49 }
  0x27   : > { %488 = vst.msk [vmem:[%s311_s22] sm:$0xf] %vm487_vm0, %v483_v48  ;;  %489 = vst.msk [vmem:[%s311_s22 + $0x4] sm:$0xf] %vm487_vm0, %v484_v51  ;;  %v439_v56 = vadd.f32 %v435_v47, %v427_v53 }
  0x28   : > { %v474_v55 = vadd.f32 %v466_v45, %v450_v52 }
  0x29   : > { %v451_v59 = vadd.f32 %v447_v54, %v439_v56 }
  0x2a   : > { %v485_v58 = vadd.f32 %v595_v38, %v474_v55 }
  0x2b   : > { %v475_v21 = vadd.f32 %v467_v57, %v451_v59 }
  0x2c   : > { %490 = vst.msk [vmem:[%s311_s22 + $0x8] sm:$0xf] %vm487_vm0, %v485_v58 }
  0x2d   : > { %v486_v60 = vadd.f32 %v595_v38, %v475_v21 }
  0x2f   : > { %491 = vst.msk [vmem:[%s311_s22 + $0xc] sm:$0xf] %vm487_vm0, %v486_v60 }
  0x30 PF: > { %s16_s21 = sadd.s32 1, %s614_s21  }
  0x31   : > { %p13_p4 = scmp.ge.s32.totalorder %s16_s21, 4  }
  0x33   :  { %15 = sbr.rel (!%p13_p4) target bundleno = 1 (0x1), region = 83 }

// kernel: shufflenet_v2_forward.23
= control target key start
LH: loop header
LB: loop body
LE: loop exit
PB: predicated region body
PF: predicated region fallthrough
CT: control target
= control target key end

     0   :  { %vm115_vm0 = vcmask 1043456   ;;  %vm90_vm1 = vcmask 195584   ;;  %s426_s1 = inlined_call_operand.vmem [shape: bf16[24,128], index: 1, kind: input, shape index: {}]   ;;  %s427_s0 = inlined_call_operand.vmem [shape: bf16[128,24], index: 0, kind: input, shape index: {}]   ;;  %s428_s2 = inlined_call_operand.vmem [shape: f32[1,128], index: 2, kind: input, shape index: {}]   ;;  %s429_s3 = inlined_call_operand.vmem [shape: f32[128,128], index: 3, kind: output, shape index: {}]  }
   0x1   :  { %v307_v0 = vld [vmem:[%s426_s1] sm:$0xff]   ;;  %v308_v1 = vld [vmem:[%s426_s1 + $0x8] ss:$0 sps:$4 sm:$0xff]   ;;  %v313_v7 = vld [vmem:[%s427_s0 + $0x10] sm:$0xff]  }
   0x2   :  { %281 = vmatprep.subr.bf16.mxu0 %v307_v0  ;;  %301 = vmatprep.subr.bf16.mxu1 %v307_v0  ;;  %v309_v2 = vld [vmem:[%s427_s0] sm:$0xff]   ;;  %v117_v4 = vsel %vm115_vm0, %v308_v1, 0  ;;  %v311_v5 = vld [vmem:[%s427_s0 + $0x8] sm:$0xff]   ;;  %v314_v8 = vld [vmem:[%s427_s0 + $0x30] sm:$0xff]  }
   0x3   :  { %282 = vmatpush3.bf16.msra.mxu0 %v307_v0  ;;  %303 = vmatpush3.bf16.msra.mxu1 %v307_v0  ;;  %v310_v3 = vld [vmem:[%s427_s0 + $0x20] sm:$0xff]   ;;  %v312_v6 = vld [vmem:[%s427_s0 + $0x28] sm:$0xff]   ;;  %v315_v9 = vld [vmem:[%s427_s0 + $0x18] sm:$0xff]  }
   0x4   :  { %305 = vmatprep.subr.msk.bf16.mxu0 %vm115_vm0, %v308_v1  ;;  %306 = vmatprep.subr.msk.bf16.mxu1 %vm115_vm0, %v308_v1  ;;  %v316_v10 = vld [vmem:[%s427_s0 + $0x38] sm:$0xff]   ;;  %v252_v11 = vld [vmem:[%s428_s2] ss:$0 sm:$0xff] }
   0x5   :  { %285 = vmatprep.mubr.msk.bf16.mxu0 %vm90_vm1, %v309_v2  ;;  %293 = vmatprep.mubr.msk.bf16.mxu1 %vm90_vm1, %v310_v3 }
   0x7   :  { %284 = vmatpush3.bf16.msra.mxu0 %v117_v4  ;;  %304 = vmatpush3.bf16.msra.mxu1 %v117_v4 }
   0xa   :  { %286 = vmatmul.mubr.msk.bf16.vlgmr.msra.gmra.mrb[0].mxu0 %vm90_vm1, %v311_v5  ;;  %294 = vmatmul.mubr.msk.bf16.vlgmr.msra.gmra.mrb[0].mxu1 %vm90_vm1, %v312_v6 }
   0xb   :  { %289 = vmatprep.mubr.msk.bf16.mxu0 %vm90_vm1, %v313_v7  ;;  %297 = vmatprep.mubr.msk.bf16.mxu1 %vm90_vm1, %v314_v8 }
  0x12   :  { %290 = vmatmul.mubr.msk.bf16.gmra.mrb[4].mxu0 %vm90_vm1, %v315_v9  ;;  %298 = vmatmul.mubr.msk.bf16.gmra.mrb[4].mxu1 %vm90_vm1, %v316_v10 }
  0xdd   :  { %v287_v12 = vpop.f32.mrb[0].mxu0  ;;  %v295_v13 = vpop.f32.mrb[0].mxu1 }
  0xde   :  { %v162_v14 = vadd.f32 %v287_v12, %v252_v11  ;;  %v194_v15 = vadd.f32 %v295_v13, %v252_v11  ;;  %v153_v16 = vpop.f32.mrb[1].mxu0  ;;  %v185_v17 = vpop.f32.mrb[1].mxu1 }
  0xdf   :  { %v154_v18 = vadd.f32 %v252_v11, %v153_v16  ;;  %v186_v19 = vadd.f32 %v252_v11, %v185_v17  ;;  %v288_v20 = vpop.f32.mrb[2].mxu0  ;;  %v296_v21 = vpop.f32.mrb[2].mxu1 }
  0xe0   :  { %v218_v22 = vmax.f32 %v162_v14, 0.0  ;;  %v226_v23 = vmax.f32 %v194_v15, 0.0  ;;  %v165_v24 = vadd.f32 %v288_v20, %v252_v11  ;;  %v197_v25 = vadd.f32 %v296_v21, %v252_v11  ;;  %v156_v26 = vpop.f32.mrb[3].mxu0  ;;  %v188_v27 = vpop.f32.mrb[3].mxu1 }
  0xe1   :  { %v216_v28 = vmax.f32 %v154_v18, 0.0  ;;  %v224_v29 = vmax.f32 %v186_v19, 0.0  ;;  %v157_v30 = vadd.f32 %v252_v11, %v156_v26  ;;  %v189_v31 = vadd.f32 %v252_v11, %v188_v27 }
  0xe2   :  { %234 = vst [vmem:[%s429_s3 + $0x10] sm:$0xff] %v218_v22  ;;  %242 = vst [vmem:[%s429_s3 + $0x50] sm:$0xff] %v226_v23  ;;  %v219_v32 = vmax.f32 %v165_v24, 0.0  ;;  %v227_v33 = vmax.f32 %v197_v25, 0.0 }
  0xe3   :  { %232 = vst [vmem:[%s429_s3] sm:$0xff] %v216_v28  ;;  %240 = vst [vmem:[%s429_s3 + $0x40] sm:$0xff] %v224_v29  ;;  %v217_v34 = vmax.f32 %v157_v30, 0.0  ;;  %v225_v35 = vmax.f32 %v189_v31, 0.0 }
  0xe4   :  { %235 = vst [vmem:[%s429_s3 + $0x18] sm:$0xff] %v219_v32  ;;  %243 = vst [vmem:[%s429_s3 + $0x58] sm:$0xff] %v227_v33 }
  0xe5   :  { %233 = vst [vmem:[%s429_s3 + $0x8] sm:$0xff] %v217_v34  ;;  %241 = vst [vmem:[%s429_s3 + $0x48] sm:$0xff] %v225_v35  ;;  %v291_v36 = vpop.f32.mrb[4].mxu0  ;;  %v299_v37 = vpop.f32.mrb[4].mxu1 }
  0xe6   :  { %v178_v38 = vadd.f32 %v291_v36, %v252_v11  ;;  %v210_v39 = vadd.f32 %v299_v37, %v252_v11  ;;  %v169_v40 = vpop.f32.mrb[5].mxu0  ;;  %v201_v41 = vpop.f32.mrb[5].mxu1 }
  0xe7   :  { %v170_v42 = vadd.f32 %v252_v11, %v169_v40  ;;  %v202_v43 = vadd.f32 %v252_v11, %v201_v41  ;;  %v292_v44 = vpop.f32.mrb[6].mxu0  ;;  %v300_v45 = vpop.f32.mrb[6].mxu1 }
  0xe8   :  { %v222_v46 = vmax.f32 %v178_v38, 0.0  ;;  %v230_v47 = vmax.f32 %v210_v39, 0.0  ;;  %v181_v48 = vadd.f32 %v292_v44, %v252_v11  ;;  %v213_v49 = vadd.f32 %v300_v45, %v252_v11  ;;  %v172_v50 = vpop.f32.mrb[7].mxu0  ;;  %v204_v51 = vpop.f32.mrb[7].mxu1 }
  0xe9   :  { %v220_v52 = vmax.f32 %v170_v42, 0.0  ;;  %v228_v53 = vmax.f32 %v202_v43, 0.0  ;;  %v173_v54 = vadd.f32 %v252_v11, %v172_v50  ;;  %v205_v55 = vadd.f32 %v252_v11, %v204_v51 }
  0xea   :  { %238 = vst [vmem:[%s429_s3 + $0x30] sm:$0xff] %v222_v46  ;;  %246 = vst [vmem:[%s429_s3 + $0x70] sm:$0xff] %v230_v47  ;;  %v223_v56 = vmax.f32 %v181_v48, 0.0  ;;  %v231_v57 = vmax.f32 %v213_v49, 0.0 }
  0xeb   :  { %236 = vst [vmem:[%s429_s3 + $0x20] sm:$0xff] %v220_v52  ;;  %244 = vst [vmem:[%s429_s3 + $0x60] sm:$0xff] %v228_v53  ;;  %v221_v58 = vmax.f32 %v173_v54, 0.0  ;;  %v229_v59 = vmax.f32 %v205_v55, 0.0 }
  0xec   :  { %239 = vst [vmem:[%s429_s3 + $0x38] sm:$0xff] %v223_v56  ;;  %247 = vst [vmem:[%s429_s3 + $0x78] sm:$0xff] %v231_v57 }
  0xed   :  { %237 = vst [vmem:[%s429_s3 + $0x28] sm:$0xff] %v221_v58  ;;  %245 = vst [vmem:[%s429_s3 + $0x68] sm:$0xff] %v229_v59 }

// kernel: shufflenet_v2_forward.25
= control target key start
LH: loop header
LB: loop body
LE: loop exit
PB: predicated region body
PF: predicated region fallthrough
CT: control target
= control target key end

     0   :  { %vm44_vm0 = vcmask 1043456   ;;  %vm37_vm1 = vcmask 64512   ;;  %s170_s1 = inlined_call_operand.vmem [shape: bf16[8,128], index: 1, kind: input, shape index: {}]   ;;  %s171_s0 = inlined_call_operand.vmem [shape: bf16[32,8], index: 0, kind: input, shape index: {}]   ;;  %s172_s2 = inlined_call_operand.vmem [shape: f32[1,128], index: 2, kind: input, shape index: {}]   ;;  %s173_s3 = inlined_call_operand.vmem [shape: f32[32,128], index: 3, kind: output, shape index: {}]  }
   0x1   :  { %v19_v0 = vld [vmem:[%s170_s1] sm:$0xf]  ;;  %v125_v3 = vld [vmem:[%s171_s0 + $0x8] sm:$0xff]  }
   0x2   :  { %123 = vmatprep.subr.msk.bf16.mxu0 %vm44_vm0, %v19_v0  ;;  %v46_v1 = vsel %vm44_vm0, %v19_v0, 0  ;;  %v124_v2 = vld [vmem:[%s171_s0] sm:$0xff]  }
   0x3   :  { %118 = vmatpush3.bf16.msra.mxu0 %v46_v1  ;;  %119 = vmatprep.mubr.msk.bf16.mxu0 %vm37_vm1, %v124_v2  ;;  %v109_v4 = vld [vmem:[%s172_s2] ss:$0 sm:$0xff] }
   0x6   :  { %120 = vmatmul.mubr.msk.bf16.vlgmr.msra.gmra.mrb[0].mxu0 %vm37_vm1, %v125_v3 }
  0xd9   :  { %v121_v5 = vpop.f32.mrb[0].mxu0 }
  0xda   :  { %v91_v6 = vadd.f32 %v121_v5, %v109_v4  ;;  %v82_v7 = vpop.f32.mrb[1].mxu0 }
  0xdb   :  { %v83_v8 = vadd.f32 %v109_v4, %v82_v7  ;;  %v122_v9 = vpop.f32.mrb[2].mxu0 }
  0xdc   :  { %v99_v10 = vmax.f32 %v91_v6, 0.0  ;;  %v94_v11 = vadd.f32 %v122_v9, %v109_v4  ;;  %v85_v12 = vpop.f32.mrb[3].mxu0 }
  0xdd   :  { %v97_v13 = vmax.f32 %v83_v8, 0.0  ;;  %v86_v14 = vadd.f32 %v109_v4, %v85_v12 }
  0xde   :  { %103 = vst [vmem:[%s173_s3 + $0x10] sm:$0xff] %v99_v10  ;;  %v100_v15 = vmax.f32 %v94_v11, 0.0 }
  0xdf   :  { %101 = vst [vmem:[%s173_s3] sm:$0xff] %v97_v13  ;;  %v98_v16 = vmax.f32 %v86_v14, 0.0 }
  0xe0   :  { %104 = vst [vmem:[%s173_s3 + $0x18] sm:$0xff] %v100_v15 }
  0xe1   :  { %102 = vst [vmem:[%s173_s3 + $0x8] sm:$0xff] %v98_v16 }

// kernel: shufflenet_v2_forward.24
= control target key start
LH: loop header
LB: loop body
LE: loop exit
PB: predicated region body
PF: predicated region fallthrough
CT: control target
= control target key end

     0   :  { %s651_s21 = smov 0   ;;  %s756_s0 = inlined_call_operand.vmem [shape: f32[2,5,5,8], index: 0, kind: input, shape index: {}]   ;;  %s757_s1 = inlined_call_operand.vmem [shape: f32[2,5,5,8], index: 1, kind: input, shape index: {}]   ;;  %s758_s2 = inlined_call_operand.vmem [shape: f32[2,5,5,8], index: 2, kind: input, shape index: {}]   ;;  %s759_s3 = inlined_call_operand.vmem [shape: f32[2,5,5,8], index: 3, kind: input, shape index: {}]   ;;  %s760_s4 = inlined_call_operand.vmem [shape: f32[9,8], index: 4, kind: input, shape index: {}]   ;;  %s761_s5 = inlined_call_operand.vmem [shape: f32[1,8], index: 5, kind: input, shape index: {}]   ;;  %s762_s6 = inlined_call_operand.vmem [shape: f32[2,4,4,8], index: 6, kind: output, shape index: {}]  }
   0x1 LB: > { %s583_s22 = sadd.s32 4294967295, %s614_s21   ;;  %p587_p0 = scmp.ge.s32.totalorder %s614_s21, 1  ;;  %s614_s21 = sphi %s651_s21, %s16_s21  }
   0x2   : > { %p242_p1 = scmp.lt.s32.totalorder %s614_s21, 3 }
   0x4   : > { %p243_p2 = pnand %p587_p0, %p242_p1 }
   0x5   : > { %p287_p3 = scmp.lt.s32.totalorder (!%p243_p2), %s583_s22, 1  ;;  %v332_v0 = vlaneseq (!%p243_p2)  ;;  %v330_v2 = vld [vmem:[%s760_s4] sm:$0xff] (!%p243_p2)  ;;  %v678_v11 = vld [vmem:[%s760_s4 + $0x8] ss:$0 sm:$0xff] (!%p243_p2)  ;;  %vm487_vm0 = vcmask (!%p243_p2), 60416  }
   0x6   : > { %246 = sbr.rel (%p243_p2) target bundleno = 48 (0x30), region = 44 }
   0x7   : > { %v333_v1 = vshrl.u32 (!%p243_p2), %v332_v0, 7 }
   0x9   : > { %v334_v3 = vsub.s32 (!%p243_p2), 0, %v333_v1  ;;  %v346_v4 = vsub.s32 (!%p243_p2), 1, %v333_v1  ;;  %v358_v5 = vsub.s32 (!%p243_p2), 2, %v333_v1  ;;  %v382_v6 = vsub.s32 (!%p243_p2), 3, %v333_v1 }
   0xa   : > { %v394_v7 = vsub.s32 (!%p243_p2), 4, %v333_v1  ;;  %v406_v8 = vsub.s32 (!%p243_p2), 5, %v333_v1  ;;  %v430_v9 = vsub.s32 (!%p243_p2), 6, %v333_v1  ;;  %v442_v10 = vsub.s32 (!%p243_p2), 7, %v333_v1 }
   0xb   : > { %v335_v12 = vrot.slane (!%p243_p2), %v330_v2, %v334_v3  ;;  %v347_v13 = vrot.slane (!%p243_p2), %v330_v2, %v346_v4  ;;  %v359_v14 = vrot.slane (!%p243_p2), %v330_v2, %v358_v5  ;;  %v680_v15 = vrot.slane (!%p243_p2), %v330_v2, %v382_v6 }
   0xc   : > { %v695_v19 = vrot.slane (!%p243_p2), %v330_v2, %v394_v7  ;;  %v697_v20 = vrot.slane (!%p243_p2), %v330_v2, %v406_v8  ;;  %v699_v21 = vrot.slane (!%p243_p2), %v330_v2, %v430_v9  ;;  %v701_v22 = vrot.slane (!%p243_p2), %v330_v2, %v442_v10 }
   0xd   : > { %s764_s22 = smov (!%p287_p3, %s583_s22), 1 }
   0xe   : > { %s599_s25 = smul.u32 40, %s764_s22  ;;  %s598_s16 = sshll.u32 %s764_s22, 4 }
   0xf   : > { %s311_s22 = scalar_lea.vmem %s762_s6, %s598_s16 }
  0x10   : > { %s668_s28 = scalar_lea.vmem %s756_s0, %s599_s25  ;;  %s673_s7 = scalar_lea.vmem %s757_s1, %s599_s25 }
  0x11   : > { %s685_s12 = scalar_lea.vmem %s758_s2, %s599_s25  ;;  %s690_s15 = scalar_lea.vmem %s759_s3, %s599_s25  ;;  %v312_v16 = vld [vmem:[%s668_s28] sm:$0x1f]  ;;  %v313_v17 = vld [vmem:[%s668_s28 + $0x8] sm:$0x1f]  ;;  %v314_v33 = vld [vmem:[%s668_s28 + $0x10] sm:$0x1f] }
  0x12   : > { %v317_v18 = vld [vmem:[%s673_s7] sm:$0x1f]  ;;  %v318_v23 = vld [vmem:[%s673_s7 + $0x8] sm:$0x1f]  ;;  %v336_v26 = vmul.f32 %v335_v12, %v312_v16  ;;  %v337_v27 = vmul.f32 %v335_v12, %v313_v17  ;;  %v360_v29 = vmul.f32 %v359_v14, %v312_v16  ;;  %v361_v31 = vmul.f32 %v359_v14, %v313_v17  ;;  %v319_v34 = vld [vmem:[%s673_s7 + $0x10] sm:$0x1f] }
  0x13   : > { %v322_v24 = vld [vmem:[%s685_s12] sm:$0x1f]  ;;  %v348_v28 = vmul.f32 %v347_v13, %v317_v18  ;;  %v349_v30 = vmul.f32 %v347_v13, %v318_v23  ;;  %v323_v39 = vld [vmem:[%s685_s12 + $0x8] sm:$0x1f]  ;;  %v432_v42 = vmul.f32 %v699_v21, %v313_v17  ;;  %v456_v43 = vmul.f32 %v678_v11, %v313_v17  ;;  %v315_v53 = vld [vmem:[%s668_s28 + $0x18] sm:$0x1f] }
  0x14   : > { %v326_v25 = vld [vmem:[%s690_s15] sm:$0x1f]  ;;  %v384_v32 = vmul.f32 %v680_v15, %v322_v24  ;;  %v368_v36 = vrot.slane %v360_v29, 1  ;;  %v408_v38 = vmul.f32 %v697_v20, %v322_v24  ;;  %v369_v41 = vrot.slane %v361_v31, 1  ;;  %v327_v44 = vld [vmem:[%s690_s15 + $0x8] sm:$0x1f] }
  0x15   : > { %v352_v35 = vadd.f32 %v348_v28, %v336_v26  ;;  %v396_v37 = vmul.f32 %v695_v19, %v326_v25  ;;  %v353_v40 = vadd.f32 %v349_v30, %v337_v27  ;;  %v444_v46 = vmul.f32 %v701_v22, %v318_v23  ;;  %v320_v58 = vld [vmem:[%s673_s7 + $0x18] sm:$0x1f]  ;;  %v324_v63 = vld [vmem:[%s685_s12 + $0x10] sm:$0x1f] }
  0x16   : > { %v338_v47 = vmul.f32 %v335_v12, %v314_v33  ;;  %v350_v48 = vmul.f32 %v347_v13, %v319_v34  ;;  %v416_v50 = vrot.slane %v408_v38, 1  ;;  %v362_v51 = vmul.f32 %v359_v14, %v314_v33  ;;  %v328_v0 = vld [vmem:[%s690_s15 + $0x10] sm:$0x1f]  ;;  %v325_v26 = vld [vmem:[%s685_s12 + $0x18] sm:$0x1f] }
  0x17   : > { %v376_v45 = vadd.f32 %v368_v36, %v352_v35  ;;  %v377_v49 = vadd.f32 %v369_v41, %v353_v40  ;;  %v385_v52 = vmul.f32 %v680_v15, %v323_v39  ;;  %v397_v56 = vmul.f32 %v695_v19, %v327_v44  ;;  %v316_v35 = vld [vmem:[%s668_s28 + $0x20] sm:$0x1f] }
  0x18   : > { %v354_v55 = vadd.f32 %v350_v48, %v338_v47  ;;  %v409_v57 = vmul.f32 %v697_v20, %v323_v39  ;;  %v464_v59 = vrot.slane %v456_v43, 1  ;;  %v370_v60 = vrot.slane %v362_v51, 1  ;;  %v595_v38 = vld [vmem:[%s761_s5] ss:$0 sm:$0xff] }
  0x19   : > { %v388_v54 = vadd.f32 %v384_v32, %v376_v45  ;;  %v389_v61 = vadd.f32 %v385_v52, %v377_v49  ;;  %v433_v62 = vmul.f32 %v699_v21, %v314_v33  ;;  %v457_v3 = vmul.f32 %v678_v11, %v314_v33 }
  0x1a   : > { %v417_v2 = vrot.slane %v409_v57, 1  ;;  %v339_v4 = vmul.f32 %v335_v12, %v315_v53  ;;  %v378_v5 = vadd.f32 %v370_v60, %v354_v55  ;;  %v351_v7 = vmul.f32 %v347_v13, %v320_v58  ;;  %v329_v12 = vld [vmem:[%s690_s15 + $0x18] sm:$0x1f] }
  0x1b   : > { %v400_v1 = vadd.f32 %v396_v37, %v388_v54  ;;  %v401_v6 = vadd.f32 %v397_v56, %v389_v61  ;;  %v363_v8 = vmul.f32 %v359_v14, %v315_v53  ;;  %v445_v10 = vmul.f32 %v701_v22, %v319_v34 }
  0x1c   : > { %v386_v16 = vmul.f32 %v680_v15, %v324_v63  ;;  %v398_v17 = vmul.f32 %v695_v19, %v328_v0  ;;  %v355_v23 = vadd.f32 %v351_v7, %v339_v4  ;;  %v410_v25 = vmul.f32 %v697_v20, %v324_v63 }
  0x1d   : > { %v424_v9 = vadd.f32 %v416_v50, %v400_v1  ;;  %v425_v18 = vadd.f32 %v417_v2, %v401_v6  ;;  %v371_v24 = vrot.slane %v363_v8, 1  ;;  %v465_v28 = vrot.slane %v457_v3, 1 }
  0x1e   : > { %v390_v13 = vadd.f32 %v386_v16, %v378_v5  ;;  %v434_v14 = vmul.f32 %v699_v21, %v315_v53  ;;  %v418_v31 = vrot.slane %v410_v25, 1  ;;  %v458_v32 = vmul.f32 %v678_v11, %v315_v53 }
  0x1f   : > { %v436_v27 = vadd.f32 %v432_v42, %v424_v9  ;;  %v437_v29 = vadd.f32 %v433_v62, %v425_v18  ;;  %v379_v30 = vadd.f32 %v371_v24, %v355_v23  ;;  %v387_v36 = vmul.f32 %v680_v15, %v325_v26 }
  0x20   : > { %v402_v34 = vadd.f32 %v398_v17, %v390_v13  ;;  %v399_v37 = vmul.f32 %v695_v19, %v329_v12  ;;  %v411_v40 = vmul.f32 %v697_v20, %v325_v26  ;;  %v446_v43 = vmul.f32 %v701_v22, %v320_v58  ;;  %v321_v19 = vld [vmem:[%s673_s7 + $0x20] sm:$0x1f] }
  0x21   : > { %v448_v33 = vadd.f32 %v444_v46, %v436_v27  ;;  %v449_v39 = vadd.f32 %v445_v10, %v437_v29  ;;  %v391_v44 = vadd.f32 %v387_v36, %v379_v30  ;;  %v466_v45 = vrot.slane %v458_v32, 1 }
  0x22   : > { %v426_v42 = vadd.f32 %v418_v31, %v402_v34  ;;  %v419_v46 = vrot.slane %v411_v40, 1  ;;  %v435_v47 = vmul.f32 %v699_v21, %v316_v35  ;;  %v459_v20 = vmul.f32 %v678_v11, %v316_v35 }
  0x23   : > { %v472_v41 = vadd.f32 %v464_v59, %v448_v33  ;;  %v473_v15 = vadd.f32 %v465_v28, %v449_v39  ;;  %v403_v50 = vadd.f32 %v399_v37, %v391_v44  ;;  %v447_v54 = vmul.f32 %v701_v22, %v321_v19 }
  0x24   : > { %v438_v49 = vadd.f32 %v434_v14, %v426_v42  ;;  %v467_v57 = vrot.slane %v459_v20, 1 }
  0x25   : > { %v483_v48 = vadd.f32 %v595_v38, %v472_v41  ;;  %v484_v51 = vadd.f32 %v595_v38, %v473_v15  ;;  %v427_v53 = vadd.f32 %v419_v46, %v403_v50 }
  0x26   : > { %v450_v52 = vadd.f32 %v446_v43, %v438_v49 }
  0x27   : > { %488 = vst.msk [vmem:[%s311_s22] sm:$0xf] %vm487_vm0, %v483_v48  ;;  %489 = vst.msk [vmem:[%s311_s22 + $0x4] sm:$0xf] %vm487_vm0, %v484_v51  ;;  %v439_v56 = vadd.f32 %v435_v47, %v427_v53 }
  0x28   : > { %v474_v55 = vadd.f32 %v466_v45, %v450_v52 }
  0x29   : > { %v451_v59 = vadd.f32 %v447_v54, %v439_v56 }
  0x2a   : > { %v485_v58 = vadd.f32 %v595_v38, %v474_v55 }
  0x2b   : > { %v475_v21 = vadd.f32 %v467_v57, %v451_v59 }
  0x2c   : > { %490 = vst.msk [vmem:[%s311_s22 + $0x8] sm:$0xf] %vm487_vm0, %v485_v58 }
  0x2d   : > { %v486_v60 = vadd.f32 %v595_v38, %v475_v21 }
  0x2f   : > { %491 = vst.msk [vmem:[%s311_s22 + $0xc] sm:$0xf] %vm487_vm0, %v486_v60 }
  0x30 PF: > { %s16_s21 = sadd.s32 1, %s614_s21  }
  0x31   : > { %p13_p4 = scmp.ge.s32.totalorder %s16_s21, 4  }
  0x33   :  { %15 = sbr.rel (!%p13_p4) target bundleno = 1 (0x1), region = 83 }

// kernel: shufflenet_v2_forward.27
= control target key start
LH: loop header
LB: loop body
LE: loop exit
PB: predicated region body
PF: predicated region fallthrough
CT: control target
= control target key end

     0   :  { %v106_v0 = vmov 0.0   ;;  %vm107_vm0 = vmmov 0   ;;  %vm37_vm1 = vcmask 130048   ;;  %s143_s1 = inlined_call_operand.vmem [shape: bf16[16,128], index: 1, kind: input, shape index: {}]   ;;  %s144_s0 = inlined_call_operand.vmem [shape: bf16[16,16], index: 0, kind: input, shape index: {}]   ;;  %s145_s2 = inlined_call_operand.vmem [shape: f32[1,128], index: 2, kind: input, shape index: {}]   ;;  %s146_s3 = inlined_call_operand.vmem [shape: f32[16,128], index: 3, kind: output, shape index: {}]  }
   0x1   :  { %96 = vmatprep.subr.bf16.mxu0 %v106_v0  ;;  %v104_v1 = vld [vmem:[%s143_s1] sm:$0xff]   ;;  %98 = vmatprep.mubr.msk.bf16.mxu0 %vm107_vm0, %v106_v0 }
   0x2   :  { %v105_v2 = vld [vmem:[%s144_s0] sm:$0xff]   ;;  %97 = vmatpush3.bf16.msra.mxu0 %v104_v1 }
   0x3   :  { %v90_v3 = vld [vmem:[%s145_s2] ss:$0 sm:$0xff] }
   0x5   :  { %99 = vmatmul.mubr.msk.bf16.vlgmr.msra.gmra.mrb[0].mxu0 %vm37_vm1, %v105_v2 }
  0xd8   :  { %v75_v4 = vpop.f32.mrb[0].mxu0 }
  0xd9   :  { %v76_v5 = vadd.f32 %v90_v3, %v75_v4  ;;  %v100_v6 = vpop.f32.mrb[1].mxu0 }
  0xda   :  { %v78_v7 = vpop.f32.mrb[2].mxu0 }
  0xdb   :  { %v82_v8 = vmax.f32 %v76_v5, 0.0  ;;  %v79_v9 = vadd.f32 %v90_v3, %v78_v7  ;;  %v101_v10 = vpop.f32.mrb[3].mxu0 }
  0xdd   :  { %84 = vst [vmem:[%s146_s3] sm:$0xff] %v82_v8  ;;  %v83_v11 = vmax.f32 %v79_v9, 0.0 }
  0xdf   :  { %85 = vst [vmem:[%s146_s3 + $0x8] sm:$0xff] %v83_v11 }

// kernel: shufflenet_v2_forward.26
= control target key start
LH: loop header
LB: loop body
LE: loop exit
PB: predicated region body
PF: predicated region fallthrough
CT: control target
= control target key end

     0   :  { %s585_s21 = smov 0   ;;  %s634_s0 = inlined_call_operand.vmem [shape: f32[2,3,3,16], index: 0, kind: input, shape index: {}]   ;;  %s635_s1 = inlined_call_operand.vmem [shape: f32[2,3,3,16], index: 1, kind: input, shape index: {}]   ;;  %s636_s2 = inlined_call_operand.vmem [shape: f32[2,3,3,16], index: 2, kind: input, shape index: {}]   ;;  %s637_s3 = inlined_call_operand.vmem [shape: f32[2,3,3,16], index: 3, kind: input, shape index: {}]   ;;  %s638_s4 = inlined_call_operand.vmem [shape: f32[9,16], index: 4, kind: input, shape index: {}]   ;;  %s639_s5 = inlined_call_operand.vmem [shape: f32[1,16], index: 5, kind: input, shape index: {}]   ;;  %s640_s6 = inlined_call_operand.vmem [shape: f32[2,2,2,16], index: 6, kind: output, shape index: {}]  }
   0x1 LB: > { %s517_s22 = sadd.s32 4294967295, %s548_s21   ;;  %p521_p0 = scmp.ge.s32.totalorder %s548_s21, 1  ;;  %s548_s21 = sphi %s585_s21, %s16_s21  }
   0x2   : > { %p242_p1 = scmp.lt.s32.totalorder %s548_s21, 3 }
   0x4   : > { %p243_p2 = pnand %p521_p0, %p242_p1 }
   0x5   : > { %p287_p3 = scmp.lt.s32.totalorder (!%p243_p2), %s517_s22, 1  ;;  %v324_v0 = vlaneseq (!%p243_p2)  ;;  %v322_v2 = vld [vmem:[%s638_s4] sm:$0xff] (!%p243_p2)  ;;  %v528_v41 = vld [vmem:[%s638_s4 + $0x8] ss:$0 sm:$0xff] (!%p243_p2)  ;;  %vm423_vm0 = vcmask (!%p243_p2), 123904  }
   0x6   : > { %246 = sbr.rel (%p243_p2) target bundleno = 40 (0x28), region = 44 }
   0x7   : > { %v325_v1 = vshrl.u32 (!%p243_p2), %v324_v0, 7 }
   0x9   : > { %v326_v3 = vsub.s32 (!%p243_p2), 0, %v325_v1  ;;  %v334_v4 = vsub.s32 (!%p243_p2), 1, %v325_v1  ;;  %v342_v5 = vsub.s32 (!%p243_p2), 2, %v325_v1  ;;  %v356_v6 = vsub.s32 (!%p243_p2), 3, %v325_v1 }
   0xa   : > { %v364_v7 = vsub.s32 (!%p243_p2), 4, %v325_v1  ;;  %v372_v8 = vsub.s32 (!%p243_p2), 5, %v325_v1  ;;  %v386_v9 = vsub.s32 (!%p243_p2), 6, %v325_v1  ;;  %v394_v29 = vsub.s32 (!%p243_p2), 7, %v325_v1 }
   0xb   : > { %v327_v10 = vrot.slane (!%p243_p2), %v322_v2, %v326_v3  ;;  %v335_v11 = vrot.slane (!%p243_p2), %v322_v2, %v334_v4  ;;  %v343_v12 = vrot.slane (!%p243_p2), %v322_v2, %v342_v5  ;;  %v357_v13 = vrot.slane (!%p243_p2), %v322_v2, %v356_v6  ;;  %v529_v3 = vld [vmem:[%s639_s5] ss:$0 sm:$0xff] (!%p243_p2) }
   0xc   : > { %v365_v17 = vrot.slane (!%p243_p2), %v322_v2, %v364_v7  ;;  %v373_v18 = vrot.slane (!%p243_p2), %v322_v2, %v372_v8  ;;  %v387_v40 = vrot.slane (!%p243_p2), %v322_v2, %v386_v9  ;;  %v395_v47 = vrot.slane (!%p243_p2), %v322_v2, %v394_v29 }
   0xd   : > { %s642_s22 = smov (!%p287_p3, %s517_s22), 1 }
   0xe   : > { %s533_s25 = smul.u32 12, %s642_s22  ;;  %s532_s16 = sshll.u32 %s642_s22, 2 }
   0xf   : > { %s311_s23 = scalar_lea.vmem %s640_s6, %s532_s16 }
  0x10   : > { %s602_s28 = scalar_lea.vmem %s634_s0, %s533_s25  ;;  %s607_s7 = scalar_lea.vmem %s635_s1, %s533_s25 }
  0x11   : > { %s301_s10 = scalar_lea.vmem %s636_s2, %s533_s25  ;;  %s306_s13 = scalar_lea.vmem %s637_s3, %s533_s25  ;;  %v312_v14 = vld [vmem:[%s602_s28] sm:$0x7]  ;;  %v313_v15 = vld [vmem:[%s602_s28 + $0x4] sm:$0x7]  ;;  %v314_v48 = vld [vmem:[%s602_s28 + $0x8] sm:$0x7] }
  0x12   : > { %v315_v16 = vld [vmem:[%s607_s7] sm:$0x7]  ;;  %v316_v19 = vld [vmem:[%s607_s7 + $0x4] sm:$0x7]  ;;  %v328_v22 = vmul.f32 %v327_v10, %v312_v14  ;;  %v329_v23 = vmul.f32 %v327_v10, %v313_v15  ;;  %v344_v25 = vmul.f32 %v343_v12, %v312_v14  ;;  %v345_v28 = vmul.f32 %v343_v12, %v313_v15  ;;  %v317_v54 = vld [vmem:[%s607_s7 + $0x8] sm:$0x7] }
  0x13   : > { %v318_v20 = vld [vmem:[%s301_s10] sm:$0x7]  ;;  %v319_v21 = vld [vmem:[%s301_s10 + $0x4] sm:$0x7]  ;;  %v336_v24 = vmul.f32 %v335_v11, %v315_v16  ;;  %v337_v27 = vmul.f32 %v335_v11, %v316_v19  ;;  %v388_v52 = vmul.f32 %v387_v40, %v313_v15  ;;  %v404_v53 = vmul.f32 %v528_v41, %v313_v15 }
  0x14   : > { %v320_v26 = vld [vmem:[%s306_s13] sm:$0x7]  ;;  %v321_v30 = vld [vmem:[%s306_s13 + $0x4] sm:$0x7]  ;;  %v348_v32 = vrot.slane %v344_v25, 1  ;;  %v358_v33 = vmul.f32 %v357_v13, %v318_v20  ;;  %v374_v34 = vmul.f32 %v373_v18, %v318_v20  ;;  %v349_v36 = vrot.slane %v345_v28, 1 }
  0x15   : > { %v338_v31 = vadd.f32 %v336_v24, %v328_v22  ;;  %v339_v35 = vadd.f32 %v337_v27, %v329_v23  ;;  %v359_v37 = vmul.f32 %v357_v13, %v319_v21  ;;  %v366_v39 = vmul.f32 %v365_v17, %v320_v26 }
  0x16   : > { %v367_v43 = vmul.f32 %v365_v17, %v321_v30  ;;  %v375_v44 = vmul.f32 %v373_v18, %v319_v21  ;;  %v378_v46 = vrot.slane %v374_v34, 1  ;;  %v389_v56 = vmul.f32 %v387_v40, %v314_v48 }
  0x17   : > { %v352_v38 = vadd.f32 %v348_v32, %v338_v31  ;;  %v353_v42 = vadd.f32 %v349_v36, %v339_v35  ;;  %v405_v57 = vmul.f32 %v528_v41, %v314_v48  ;;  %v396_v59 = vmul.f32 %v395_v47, %v316_v19 }
  0x18   : > { %v379_v50 = vrot.slane %v375_v44, 1  ;;  %v397_v61 = vmul.f32 %v395_v47, %v317_v54  ;;  %v408_v63 = vrot.slane %v404_v53, 1 }
  0x19   : > { %v360_v45 = vadd.f32 %v358_v33, %v352_v38  ;;  %v361_v49 = vadd.f32 %v359_v37, %v353_v42  ;;  %v409_v1 = vrot.slane %v405_v57, 1 }
  0x1b   : > { %v368_v51 = vadd.f32 %v366_v39, %v360_v45  ;;  %v369_v55 = vadd.f32 %v367_v43, %v361_v49 }
  0x1d   : > { %v382_v58 = vadd.f32 %v378_v46, %v368_v51  ;;  %v383_v60 = vadd.f32 %v379_v50, %v369_v55 }
  0x1f   : > { %v390_v62 = vadd.f32 %v388_v52, %v382_v58  ;;  %v391_v0 = vadd.f32 %v389_v56, %v383_v60 }
  0x21   : > { %v398_v2 = vadd.f32 %v396_v59, %v390_v62  ;;  %v399_v4 = vadd.f32 %v397_v61, %v391_v0 }
  0x23   : > { %v412_v5 = vadd.f32 %v408_v63, %v398_v2  ;;  %v413_v6 = vadd.f32 %v409_v1, %v399_v4 }
  0x25   : > { %v421_v7 = vadd.f32 %v529_v3, %v412_v5  ;;  %v422_v8 = vadd.f32 %v529_v3, %v413_v6 }
  0x27   : > { %424 = vst.msk [vmem:[%s311_s23] sm:$0x3] %vm423_vm0, %v421_v7  ;;  %425 = vst.msk [vmem:[%s311_s23 + $0x2] sm:$0x3] %vm423_vm0, %v422_v8 }
  0x28 PF: > { %s16_s21 = sadd.s32 1, %s548_s21  }
  0x29   : > { %p13_p4 = scmp.ge.s32.totalorder %s16_s21, 4  }
  0x2b   :  { %15 = sbr.rel (!%p13_p4) target bundleno = 1 (0x1), region = 83 }

// kernel: shufflenet_v2_forward.28
= control target key start
LH: loop header
LB: loop body
LE: loop exit
PB: predicated region body
PF: predicated region fallthrough
CT: control target
= control target key end

     0   :  { %vm44_vm0 = vcmask 130048   ;;  %s174_s1 = inlined_call_operand.vmem [shape: bf16[16,128], index: 1, kind: input, shape index: {}]   ;;  %s175_s0 = inlined_call_operand.vmem [shape: bf16[32,16], index: 0, kind: input, shape index: {}]   ;;  %s176_s2 = inlined_call_operand.vmem [shape: f32[1,128], index: 2, kind: input, shape index: {}]   ;;  %s177_s3 = inlined_call_operand.vmem [shape: f32[32,128], index: 3, kind: output, shape index: {}]  }
   0x1   :  { %v127_v0 = vld [vmem:[%s174_s1] sm:$0xff]   ;;  %v129_v2 = vld [vmem:[%s175_s0 + $0x8] sm:$0xff]  }
   0x2   :  { %v128_v1 = vld [vmem:[%s175_s0] sm:$0xff]   ;;  %121 = vmatprep.subr.bf16.mxu0 %v127_v0 }
   0x3   :  { %122 = vmatpush3.bf16.msra.mxu0 %v127_v0  ;;  %123 = vmatprep.mubr.msk.bf16.mxu0 %vm44_vm0, %v128_v1  ;;  %v112_v3 = vld [vmem:[%s176_s2] ss:$0 sm:$0xff] }
   0x6   :  { %124 = vmatmul.mubr.msk.bf16.vlgmr.msra.gmra.mrb[0].mxu0 %vm44_vm0, %v129_v2 }
  0xd9   :  { %v125_v4 = vpop.f32.mrb[0].mxu0 }
  0xda   :  { %v94_v5 = vadd.f32 %v125_v4, %v112_v3  ;;  %v85_v6 = vpop.f32.mrb[1].mxu0 }
  0xdb   :  { %v86_v7 = vadd.f32 %v112_v3, %v85_v6  ;;  %v126_v8 = vpop.f32.mrb[2].mxu0 }
  0xdc   :  { %v102_v9 = vmax.f32 %v94_v5, 0.0  ;;  %v97_v10 = vadd.f32 %v126_v8, %v112_v3  ;;  %v88_v11 = vpop.f32.mrb[3].mxu0 }
  0xdd   :  { %v100_v12 = vmax.f32 %v86_v7, 0.0  ;;  %v89_v13 = vadd.f32 %v112_v3, %v88_v11 }
  0xde   :  { %106 = vst [vmem:[%s177_s3 + $0x10] sm:$0xff] %v102_v9  ;;  %v103_v14 = vmax.f32 %v97_v10, 0.0 }
  0xdf   :  { %104 = vst [vmem:[%s177_s3] sm:$0xff] %v100_v12  ;;  %v101_v15 = vmax.f32 %v89_v13, 0.0 }
  0xe0   :  { %107 = vst [vmem:[%s177_s3 + $0x18] sm:$0xff] %v103_v14 }
  0xe1   :  { %105 = vst [vmem:[%s177_s3 + $0x8] sm:$0xff] %v101_v15 }

// kernel: shufflenet_v2_forward.33
= control target key start
LH: loop header
LB: loop body
LE: loop exit
PB: predicated region body
PF: predicated region fallthrough
CT: control target
= control target key end

     0   :  { %v119_v0 = vmov 0.0   ;;  %vm120_vm0 = vmmov 0   ;;  %vm45_vm1 = vcmask 261120   ;;  %s159_s1 = inlined_call_operand.vmem [shape: bf16[32,128], index: 1, kind: input, shape index: {}]   ;;  %s160_s0 = inlined_call_operand.vmem [shape: bf16[16,32], index: 0, kind: input, shape index: {}]   ;;  %s161_s2 = inlined_call_operand.vmem [shape: f32[1,128], index: 2, kind: input, shape index: {}]   ;;  %s162_s3 = inlined_call_operand.vmem [shape: f32[16,128], index: 3, kind: output, shape index: {}]  }
   0x1   :  { %106 = vmatprep.subr.bf16.mxu0 %v119_v0  ;;  %v116_v1 = vld [vmem:[%s159_s1] sm:$0xff]   ;;  %110 = vmatprep.mubr.msk.bf16.mxu0 %vm120_vm0, %v119_v0  ;;  %v117_v2 = vld [vmem:[%s159_s1 + $0x8] sm:$0xff]  }
   0x2   :  { %107 = vmatpush3.bf16.msra.mxu0 %v116_v1  ;;  %v118_v3 = vld [vmem:[%s160_s0] sm:$0xff]  }
   0x3   :  { %108 = vmatprep.subr.bf16.mxu0 %v119_v0  ;;  %v98_v4 = vld [vmem:[%s161_s2] ss:$0 sm:$0xff] }
   0x6   :  { %109 = vmatpush3.bf16.msra.mxu0 %v117_v2 }
   0x9   :  { %111 = vmatmul.mubr.msk.bf16.vlgmr.msra.gmra.mrb[0].mxu0 %vm45_vm1, %v118_v3 }
  0xdc   :  { %v83_v5 = vpop.f32.mrb[0].mxu0 }
  0xdd   :  { %v84_v6 = vadd.f32 %v98_v4, %v83_v5  ;;  %v112_v7 = vpop.f32.mrb[1].mxu0 }
  0xde   :  { %v86_v8 = vpop.f32.mrb[2].mxu0 }
  0xdf   :  { %v90_v9 = vmax.f32 %v84_v6, 0.0  ;;  %v87_v10 = vadd.f32 %v98_v4, %v86_v8  ;;  %v113_v11 = vpop.f32.mrb[3].mxu0 }
  0xe1   :  { %92 = vst [vmem:[%s162_s3] sm:$0xff] %v90_v9  ;;  %v91_v12 = vmax.f32 %v87_v10, 0.0 }
  0xe3   :  { %93 = vst [vmem:[%s162_s3 + $0x8] sm:$0xff] %v91_v12 }

// kernel: shufflenet_v2_forward.34
= control target key start
LH: loop header
LB: loop body
LE: loop exit
PB: predicated region body
PF: predicated region fallthrough
CT: control target
= control target key end

     0   :  { %s514_s21 = smov 0   ;;  %s553_s0 = inlined_call_operand.vmem [shape: f32[2,2,2,32], index: 0, kind: input, shape index: {}]   ;;  %s554_s1 = inlined_call_operand.vmem [shape: f32[2,2,2,32], index: 1, kind: input, shape index: {}]   ;;  %s555_s2 = inlined_call_operand.vmem [shape: f32[2,2,2,32], index: 2, kind: input, shape index: {}]   ;;  %s556_s3 = inlined_call_operand.vmem [shape: f32[2,2,2,32], index: 3, kind: input, shape index: {}]   ;;  %s557_s4 = inlined_call_operand.vmem [shape: f32[9,32], index: 4, kind: input, shape index: {}]   ;;  %s558_s5 = inlined_call_operand.vmem [shape: f32[1,32], index: 5, kind: input, shape index: {}]   ;;  %s559_s6 = inlined_call_operand.vmem [shape: f32[2,1,1,32], index: 6, kind: output, shape index: {}]  }
   0x1 LB: > { %s444_s22 = sadd.s32 4294967295, %s477_s21   ;;  %p448_p0 = scmp.ge.s32.totalorder %s477_s21, 1  ;;  %s477_s21 = sphi %s514_s21, %s16_s21  }
   0x2   : > { %p242_p1 = scmp.lt.s32.totalorder %s477_s21, 3 }
   0x4   : > { %p243_p2 = pnand %p448_p0, %p242_p1 }
   0x5   : > { %p285_p3 = scmp.lt.s32.totalorder (!%p243_p2), %s444_s22, 1  ;;  %v314_v0 = vld [vmem:[%s557_s4] sm:$0xff] (!%p243_p2)  ;;  %v315_v11 = vld [vmem:[%s557_s4 + $0x8] sm:$0x1] (!%p243_p2)  ;;  %vm359_vm0 = vcmask (!%p243_p2), 253952  }
   0x6   : > { %246 = sbr.rel (%p243_p2) target bundleno = 39 (0x27), region = 44  ;;  %v319_v1 = vrot.slane (!%p243_p2), %v314_v0, 1  ;;  %v328_v2 = vrot.slane (!%p243_p2), %v314_v0, 3  ;;  %v332_v3 = vrot.slane (!%p243_p2), %v314_v0, 4  ;;  %v341_v18 = vrot.slane (!%p243_p2), %v314_v0, 6 }
   0x7   : > { %v350_v19 = vrot.slane (!%p243_p2), %v315_v11, 7  ;;  %v345_v23 = vrot.slane (!%p243_p2), %v314_v0, 7  ;;  %v357_v33 = vld [vmem:[%s558_s5] sm:$0x1] (!%p243_p2) }
   0xd   : > { %s561_s22 = smov (!%p285_p3, %s444_s22), 1 }
   0xe   : > { %s459_s25 = sshll.u32 %s561_s22, 2  ;;  %s307_s20 = scalar_lea.vmem %s559_s6, %s561_s22 }
   0xf   : > { %s289_s28 = scalar_lea.vmem %s553_s0, %s459_s25  ;;  %s294_s7 = scalar_lea.vmem %s554_s1, %s459_s25 }
  0x10   : > { %s299_s10 = scalar_lea.vmem %s555_s2, %s459_s25  ;;  %s304_s13 = scalar_lea.vmem %s556_s3, %s459_s25  ;;  %v308_v4 = vld [vmem:[%s289_s28] sm:$0x3]  ;;  %v309_v20 = vld [vmem:[%s289_s28 + $0x2] sm:$0x3] }
  0x11   : > { %v310_v5 = vld [vmem:[%s294_s7] sm:$0x3]  ;;  %v316_v7 = vmul.f32 %v314_v0, %v308_v4  ;;  %v323_v9 = vmul.f32 %v319_v1, %v308_v4  ;;  %v311_v24 = vld [vmem:[%s294_s7 + $0x2] sm:$0x3]  ;;  %v343_v26 = vmul.f32 %v341_v18, %v309_v20  ;;  %v352_v27 = vmul.f32 %v350_v19, %v309_v20 }
  0x12   : > { %v312_v6 = vld [vmem:[%s299_s10] sm:$0x3]  ;;  %v321_v8 = vmul.f32 %v319_v1, %v310_v5  ;;  %v347_v29 = vmul.f32 %v345_v23, %v311_v24 }
  0x13   : > { %v313_v10 = vld [vmem:[%s304_s13] sm:$0x3]  ;;  %v325_v13 = vrot.slane %v323_v9, 1  ;;  %v330_v14 = vmul.f32 %v328_v2, %v312_v6  ;;  %v336_v15 = vmul.f32 %v332_v3, %v312_v6  ;;  %v354_v31 = vrot.slane %v352_v27, 1 }
  0x14   : > { %v322_v12 = vadd.f32 %v321_v8, %v316_v7  ;;  %v334_v17 = vmul.f32 %v332_v3, %v313_v10 }
  0x15   : > { %v338_v22 = vrot.slane %v336_v15, 1 }
  0x16   : > { %v327_v16 = vadd.f32 %v325_v13, %v322_v12 }
  0x18   : > { %v331_v21 = vadd.f32 %v330_v14, %v327_v16 }
  0x1a   : > { %v335_v25 = vadd.f32 %v334_v17, %v331_v21 }
  0x1c   : > { %v340_v28 = vadd.f32 %v338_v22, %v335_v25 }
  0x1e   : > { %v344_v30 = vadd.f32 %v343_v26, %v340_v28 }
  0x20   : > { %v348_v32 = vadd.f32 %v347_v29, %v344_v30 }
  0x22   : > { %v356_v34 = vadd.f32 %v354_v31, %v348_v32 }
  0x24   : > { %v358_v35 = vadd.f32 %v357_v33, %v356_v34 }
  0x26   : > { %360 = vst.msk [vmem:[%s307_s20] sm:$0x1] %vm359_vm0, %v358_v35 }
  0x27 PF: > { %s16_s21 = sadd.s32 1, %s477_s21  }
  0x28   : > { %p13_p4 = scmp.ge.s32.totalorder %s16_s21, 4  }
  0x2a   :  { %15 = sbr.rel (!%p13_p4) target bundleno = 1 (0x1), region = 83 }

// kernel: shufflenet_v2_forward.36
= control target key start
LH: loop header
LB: loop body
LE: loop exit
PB: predicated region body
PF: predicated region fallthrough
CT: control target
= control target key end

     0   :  { %v507_v3 = vmov 0   ;;  %vm256_vm0 = vcmask 523264   ;;  %s686_s1 = inlined_call_operand.vmem [shape: bf16[64,1024], index: 1, kind: input, shape index: {}]   ;;  %s687_s0 = inlined_call_operand.vmem [shape: bf16[16,64], index: 0, kind: input, shape index: {}]   ;;  %s688_s2 = inlined_call_operand.vmem [shape: f32[1,1024], index: 2, kind: input, shape index: {}]   ;;  %s689_s3 = inlined_call_operand.vmem [shape: f32[16,1024], index: 3, kind: output, shape index: {}]  }
   0x1   :  { %v17_v0 = vld [vmem:[%s686_s1] sm:$0xff]  ;;  %v18_v2 = vld [vmem:[%s686_s1 + $0x8] sm:$0xff]  ;;  %292 = vmatprep.mubr.bf16.mxu0 %v507_v3  ;;  %335 = vmatprep.mubr.bf16.mxu1 %v507_v3  ;;  %v19_v31 = vld [vmem:[%s686_s1 + $0x10] sm:$0xff] }
   0x2   :  { %v21_v1 = vld [vmem:[%s686_s1 + $0x20] sm:$0xff]  ;;  %v22_v5 = vld [vmem:[%s686_s1 + $0x28] sm:$0xff]  ;;  %v23_v32 = vld [vmem:[%s686_s1 + $0x30] sm:$0xff] }
   0x3   :  { %v470_v4 = vcombine.high %v17_v0, %v21_v1  ;;  %v469_v6 = vcombine.low %v17_v0, %v21_v1  ;;  %v25_v7 = vld [vmem:[%s686_s1 + $0x40] sm:$0xff]  ;;  %v472_v9 = vcombine.high %v18_v2, %v22_v5  ;;  %v471_v10 = vcombine.low %v18_v2, %v22_v5  ;;  %v26_v12 = vld [vmem:[%s686_s1 + $0x48] sm:$0xff]  ;;  %v20_v33 = vld [vmem:[%s686_s1 + $0x18] sm:$0xff] }
   0x4   :  { %v29_v8 = vld [vmem:[%s686_s1 + $0x60] sm:$0xff]  ;;  %v30_v13 = vld [vmem:[%s686_s1 + $0x68] sm:$0xff]  ;;  %v24_v34 = vld [vmem:[%s686_s1 + $0x38] sm:$0xff]  ;;  %v474_v37 = vcombine.high %v19_v31, %v23_v32  ;;  %v473_v44 = vcombine.low %v19_v31, %v23_v32  ;;  %v51_v2 = vlaneseq }
   0x5   :  { %v478_v11 = vcombine.high %v25_v7, %v29_v8  ;;  %v33_v14 = vld [vmem:[%s686_s1 + $0x80] sm:$0xff]  ;;  %260 = vmatprep.subr.bf16.mxu0 %v470_v4  ;;  %v480_v15 = vcombine.high %v26_v12, %v30_v13  ;;  %v34_v17 = vld [vmem:[%s686_s1 + $0x88] sm:$0xff]  ;;  %303 = vmatprep.subr.bf16.mxu1 %v472_v9  ;;  %v477_v19 = vcombine.low %v25_v7, %v29_v8  ;;  %v27_v39 = vld [vmem:[%s686_s1 + $0x50] sm:$0xff] }
   0x6   :  { %v37_v16 = vld [vmem:[%s686_s1 + $0xa0] sm:$0xff]  ;;  %v38_v18 = vld [vmem:[%s686_s1 + $0xa8] sm:$0xff]  ;;  %261 = vmatpush1.bf16.msra.mxu0 %v469_v6  ;;  %304 = vmatpush1.bf16.msra.mxu1 %v471_v10  ;;  %v479_v20 = vcombine.low %v26_v12, %v30_v13  ;;  %v476_v38 = vcombine.high %v20_v33, %v24_v34  ;;  %v31_v40 = vld [vmem:[%s686_s1 + $0x70] sm:$0xff]  ;;  %v475_v45 = vcombine.low %v20_v33, %v24_v34 }
   0x7   :  { %262 = vmatprep.subr.bf16.mxu0 %v478_v11  ;;  %v486_v21 = vcombine.high %v33_v14, %v37_v16  ;;  %305 = vmatprep.subr.bf16.mxu1 %v480_v15  ;;  %v488_v22 = vcombine.high %v34_v17, %v38_v18  ;;  %v41_v23 = vld [vmem:[%s686_s1 + $0xc0] sm:$0xff]  ;;  %v42_v25 = vld [vmem:[%s686_s1 + $0xc8] sm:$0xff]  ;;  %v485_v27 = vcombine.low %v33_v14, %v37_v16  ;;  %v28_v42 = vld [vmem:[%s686_s1 + $0x58] sm:$0xff] }
   0x8   :  { %v45_v24 = vld [vmem:[%s686_s1 + $0xe0] sm:$0xff]  ;;  %v46_v26 = vld [vmem:[%s686_s1 + $0xe8] sm:$0xff]  ;;  %v487_v28 = vcombine.low %v34_v17, %v38_v18  ;;  %v32_v43 = vld [vmem:[%s686_s1 + $0x78] sm:$0xff]  ;;  %v482_v46 = vcombine.high %v27_v39, %v31_v40  ;;  %v481_v52 = vcombine.low %v27_v39, %v31_v40 }
   0x9   :  { %v494_v29 = vcombine.high %v41_v23, %v45_v24  ;;  %v496_v30 = vcombine.high %v42_v25, %v46_v26  ;;  %v493_v35 = vcombine.low %v41_v23, %v45_v24  ;;  %v495_v36 = vcombine.low %v42_v25, %v46_v26  ;;  %v506_v41 = vld [vmem:[%s687_s0] sm:$0xff]   ;;  %v35_v48 = vld [vmem:[%s686_s1 + $0x90] sm:$0xff]  ;;  %v36_v50 = vld [vmem:[%s686_s1 + $0x98] sm:$0xff] }
   0xa   :  { %263 = vmatpush1.bf16.msra.mxu0 %v477_v19  ;;  %306 = vmatpush1.bf16.msra.mxu1 %v479_v20  ;;  %v484_v47 = vcombine.high %v28_v42, %v32_v43  ;;  %v39_v49 = vld [vmem:[%s686_s1 + $0xb0] sm:$0xff]  ;;  %v40_v51 = vld [vmem:[%s686_s1 + $0xb8] sm:$0xff]  ;;  %v483_v53 = vcombine.low %v28_v42, %v32_v43  ;;  %v49_v5 = vld [vmem:[%s688_s2] sm:$0xff] }
   0xb   :  { %264 = vmatprep.subr.bf16.mxu0 %v486_v21  ;;  %307 = vmatprep.subr.bf16.mxu1 %v488_v22  ;;  %v490_v54 = vcombine.high %v35_v48, %v39_v49  ;;  %v492_v55 = vcombine.high %v36_v50, %v40_v51  ;;  %v43_v56 = vld [vmem:[%s686_s1 + $0xd0] sm:$0xff]  ;;  %v44_v58 = vld [vmem:[%s686_s1 + $0xd8] sm:$0xff]  ;;  %v489_v60 = vcombine.low %v35_v48, %v39_v49 }
   0xc   :  { %v47_v57 = vld [vmem:[%s686_s1 + $0xf0] sm:$0xff]  ;;  %v48_v59 = vld [vmem:[%s686_s1 + $0xf8] sm:$0xff]  ;;  %v491_v61 = vcombine.low %v36_v50, %v40_v51 }
   0xd   :  { %v498_v62 = vcombine.high %v43_v56, %v47_v57  ;;  %v500_v63 = vcombine.high %v44_v58, %v48_v59  ;;  %v497_v0 = vcombine.low %v43_v56, %v47_v57  ;;  %v499_v1 = vcombine.low %v44_v58, %v48_v59 }
   0xe   :  { %265 = vmatpush1.bf16.msra.mxu0 %v485_v27  ;;  %308 = vmatpush1.bf16.msra.mxu1 %v487_v28 }
   0xf   :  { %266 = vmatprep.subr.bf16.mxu0 %v494_v29  ;;  %309 = vmatprep.subr.bf16.mxu1 %v496_v30 }
  0x12   :  { %267 = vmatpush1.bf16.msra.mxu0 %v493_v35  ;;  %310 = vmatpush1.bf16.msra.mxu1 %v495_v36 }
  0x13   :  { %346 = vmatprep.subr.bf16.mxu0 %v474_v37  ;;  %389 = vmatprep.subr.bf16.mxu1 %v476_v38 }
  0x15   :  { %501 = vmatmul.mubr.msk.bf16.vlgmr.msra.gmra.mrb[0].mxu0 %vm256_vm0, %v506_v41  ;;  %502 = vmatmul.mubr.msk.bf16.vlgmr.msra.gmra.mrb[0].mxu1 %vm256_vm0, %v506_v41 }
  0x16   :  { %347 = vmatpush1.bf16.msra.mxu0 %v473_v44  ;;  %390 = vmatpush1.bf16.msra.mxu1 %v475_v45 }
  0x17   :  { %348 = vmatprep.subr.bf16.mxu0 %v482_v46  ;;  %391 = vmatprep.subr.bf16.mxu1 %v484_v47 }
  0x18   :  { %378 = vmatprep.mubr.bf16.mxu0 %v507_v3  ;;  %421 = vmatprep.mubr.bf16.mxu1 %v507_v3  ;;  %v52_v3 = vshrl.u32 %v51_v2, 7 }
  0x1a   :  { %349 = vmatpush1.bf16.msra.mxu0 %v481_v52  ;;  %392 = vmatpush1.bf16.msra.mxu1 %v483_v53  ;;  %v53_v4 = vsub.s32 0, %v52_v3  ;;  %v61_v6 = vsub.s32 2, %v52_v3  ;;  %v57_v7 = vsub.s32 1, %v52_v3  ;;  %v65_v8 = vsub.s32 3, %v52_v3 }
  0x1b   :  { %350 = vmatprep.subr.bf16.mxu0 %v490_v54  ;;  %393 = vmatprep.subr.bf16.mxu1 %v492_v55  ;;  %v69_v37 = vsub.s32 4, %v52_v3  ;;  %v77_v38 = vsub.s32 6, %v52_v3  ;;  %v73_v39 = vsub.s32 5, %v52_v3  ;;  %v81_v40 = vsub.s32 7, %v52_v3 }
  0x1c   :  { %v54_v9 = vrot.slane %v49_v5, %v53_v4  ;;  %v62_v10 = vrot.slane %v49_v5, %v61_v6  ;;  %v58_v11 = vrot.slane %v49_v5, %v57_v7  ;;  %v66_v12 = vrot.slane %v49_v5, %v65_v8 }
  0x1d   :  { %v78_v42 = vrot.slane %v49_v5, %v77_v38  ;;  %v74_v43 = vrot.slane %v49_v5, %v73_v39  ;;  %v82_v44 = vrot.slane %v49_v5, %v81_v40 }
  0x1e   :  { %351 = vmatpush1.bf16.msra.mxu0 %v489_v60  ;;  %394 = vmatpush1.bf16.msra.mxu1 %v491_v61 }
  0x1f   :  { %352 = vmatprep.subr.bf16.mxu0 %v498_v62  ;;  %395 = vmatprep.subr.bf16.mxu1 %v500_v63 }
  0x22   :  { %353 = vmatpush1.bf16.msra.mxu0 %v497_v0  ;;  %396 = vmatpush1.bf16.msra.mxu1 %v499_v1 }
  0x25   :  { %503 = vmatmul.mubr.msk.bf16.vlgmr.msra.gmra.mrb[4].mxu0 %vm256_vm0, %v506_v41  ;;  %504 = vmatmul.mubr.msk.bf16.vlgmr.msra.gmra.mrb[4].mxu1 %vm256_vm0, %v506_v41  ;;  %v70_v41 = vrot.slane %v49_v5, %v69_v37 }
  0xe8   :  { %v294_v13 = vpop.f32.mrb[0].mxu0  ;;  %v337_v15 = vpop.f32.mrb[0].mxu1 }
  0xe9   :  { %v295_v14 = vadd.f32 %v294_v13, %v54_v9  ;;  %v296_v16 = vpop.f32.mrb[1].mxu0  ;;  %v338_v17 = vadd.f32 %v337_v15, %v62_v10  ;;  %v339_v19 = vpop.f32.mrb[1].mxu1 }
  0xea   :  { %v297_v18 = vadd.f32 %v296_v16, %v58_v11  ;;  %v298_v20 = vpop.f32.mrb[2].mxu0  ;;  %v340_v22 = vadd.f32 %v339_v19, %v66_v12  ;;  %v341_v24 = vpop.f32.mrb[2].mxu1 }
  0xeb   :  { %v432_v21 = vmax.f32 %v295_v14, 0.0  ;;  %v299_v23 = vadd.f32 %v298_v20, %v54_v9  ;;  %v300_v25 = vpop.f32.mrb[3].mxu0  ;;  %v434_v26 = vmax.f32 %v338_v17, 0.0  ;;  %v342_v28 = vadd.f32 %v341_v24, %v62_v10  ;;  %v343_v30 = vpop.f32.mrb[3].mxu1 }
  0xec   :  { %v433_v27 = vmax.f32 %v297_v18, 0.0  ;;  %v301_v29 = vadd.f32 %v300_v25, %v58_v11  ;;  %v435_v31 = vmax.f32 %v340_v22, 0.0  ;;  %v344_v33 = vadd.f32 %v343_v30, %v66_v12 }
  0xed   :  { %448 = vst [vmem:[%s689_s3] sm:$0xff] %v432_v21  ;;  %v440_v32 = vmax.f32 %v299_v23, 0.0  ;;  %450 = vst [vmem:[%s689_s3 + $0x10] sm:$0xff] %v434_v26  ;;  %v442_v34 = vmax.f32 %v342_v28, 0.0 }
  0xee   :  { %449 = vst [vmem:[%s689_s3 + $0x8] sm:$0xff] %v433_v27  ;;  %v441_v35 = vmax.f32 %v301_v29, 0.0  ;;  %451 = vst [vmem:[%s689_s3 + $0x18] sm:$0xff] %v435_v31  ;;  %v443_v36 = vmax.f32 %v344_v33, 0.0 }
  0xef   :  { %456 = vst [vmem:[%s689_s3 + $0x40] sm:$0xff] %v440_v32  ;;  %458 = vst [vmem:[%s689_s3 + $0x50] sm:$0xff] %v442_v34 }
  0xf0   :  { %457 = vst [vmem:[%s689_s3 + $0x48] sm:$0xff] %v441_v35  ;;  %459 = vst [vmem:[%s689_s3 + $0x58] sm:$0xff] %v443_v36 }
  0xf8   :  { %v380_v45 = vpop.f32.mrb[4].mxu0  ;;  %v423_v47 = vpop.f32.mrb[4].mxu1 }
  0xf9   :  { %v381_v46 = vadd.f32 %v380_v45, %v70_v41  ;;  %v382_v48 = vpop.f32.mrb[5].mxu0  ;;  %v424_v49 = vadd.f32 %v423_v47, %v78_v42  ;;  %v425_v51 = vpop.f32.mrb[5].mxu1 }
  0xfa   :  { %v383_v50 = vadd.f32 %v382_v48, %v74_v43  ;;  %v384_v52 = vpop.f32.mrb[6].mxu0  ;;  %v426_v54 = vadd.f32 %v425_v51, %v82_v44  ;;  %v427_v56 = vpop.f32.mrb[6].mxu1 }
  0xfb   :  { %v436_v53 = vmax.f32 %v381_v46, 0.0  ;;  %v385_v55 = vadd.f32 %v384_v52, %v70_v41  ;;  %v386_v57 = vpop.f32.mrb[7].mxu0  ;;  %v438_v58 = vmax.f32 %v424_v49, 0.0  ;;  %v428_v60 = vadd.f32 %v427_v56, %v78_v42  ;;  %v429_v62 = vpop.f32.mrb[7].mxu1 }
  0xfc   :  { %v437_v59 = vmax.f32 %v383_v50, 0.0  ;;  %v387_v61 = vadd.f32 %v386_v57, %v74_v43  ;;  %v439_v63 = vmax.f32 %v426_v54, 0.0  ;;  %v430_v1 = vadd.f32 %v429_v62, %v82_v44 }
  0xfd   :  { %452 = vst [vmem:[%s689_s3 + $0x20] sm:$0xff] %v436_v53  ;;  %v444_v0 = vmax.f32 %v385_v55, 0.0  ;;  %454 = vst [vmem:[%s689_s3 + $0x30] sm:$0xff] %v438_v58  ;;  %v446_v2 = vmax.f32 %v428_v60, 0.0 }
  0xfe   :  { %453 = vst [vmem:[%s689_s3 + $0x28] sm:$0xff] %v437_v59  ;;  %v445_v3 = vmax.f32 %v387_v61, 0.0  ;;  %455 = vst [vmem:[%s689_s3 + $0x38] sm:$0xff] %v439_v63  ;;  %v447_v4 = vmax.f32 %v430_v1, 0.0 }
  0xff   :  { %460 = vst [vmem:[%s689_s3 + $0x60] sm:$0xff] %v444_v0  ;;  %462 = vst [vmem:[%s689_s3 + $0x70] sm:$0xff] %v446_v2 }
 0x100   :  { %461 = vst [vmem:[%s689_s3 + $0x68] sm:$0xff] %v445_v3  ;;  %463 = vst [vmem:[%s689_s3 + $0x78] sm:$0xff] %v447_v4 }

// kernel: shufflenet_v2_forward.37
= control target key start
LH: loop header
LB: loop body
LE: loop exit
PB: predicated region body
PF: predicated region fallthrough
CT: control target
= control target key end

     0   :  { %v22_v20 = vlaneseq  ;;  %vm286_vm0 = vcmask 1041409   ;;  %s1391_s0 = inlined_call_operand.vmem [shape: f32[2,1,1024], index: 0, kind: input, shape index: {}]   ;;  %s1392_s1 = inlined_call_operand.vmem [shape: bf16[1024,128], index: 1, kind: input, shape index: {}]   ;;  %s1393_s2 = inlined_call_operand.vmem [shape: f32[1,128], index: 2, kind: input, shape index: {}]   ;;  %s1394_s3 = inlined_call_operand.hbm [shape: f32[2,128], index: 3, kind: output, shape index: {}]  }
   0x1   :  { %v1031_v0 = vld [vmem:[%s1392_s1 + $0x40] sm:$0xff]   ;;  %v1035_v4 = vld [vmem:[%s1392_s1 + $0x48] sm:$0xff]   ;;  %v1039_v8 = vld [vmem:[%s1392_s1 + $0x50] sm:$0xff]  }
   0x2   :  { %v1032_v1 = vld [vmem:[%s1392_s1 + $0xc0] sm:$0xff]   ;;  %942 = vmatprep.subr.bf16.mxu0 %v1031_v0  ;;  %v1036_v5 = vld [vmem:[%s1392_s1 + $0xc8] sm:$0xff]   ;;  %v1040_v9 = vld [vmem:[%s1392_s1 + $0xd0] sm:$0xff]   ;;  %v1212_v25 = vshrl.u32 %v22_v20, 7 }
   0x3   :  { %v1033_v2 = vld [vmem:[%s1392_s1] sm:$0xff]   ;;  %964 = vmatprep.subr.bf16.mxu1 %v1032_v1  ;;  %v1037_v6 = vld [vmem:[%s1392_s1 + $0x8] sm:$0xff]   ;;  %v1041_v10 = vld [vmem:[%s1392_s1 + $0x10] sm:$0xff]  }
   0x4   :  { %v1034_v3 = vld [vmem:[%s1392_s1 + $0x80] sm:$0xff]   ;;  %943 = vmatpush3.bf16.msra.mxu0 %v1033_v2  ;;  %v1038_v7 = vld [vmem:[%s1392_s1 + $0x88] sm:$0xff]   ;;  %v1042_v11 = vld [vmem:[%s1392_s1 + $0x90] sm:$0xff]   ;;  %v28_v30 = vsub.s32 1, %v1212_v25  ;;  %v36_v32 = vsub.s32 3, %v1212_v25  ;;  %v24_v34 = vsub.s32 0, %v1212_v25 }
   0x5   :  { %965 = vmatpush3.bf16.msra.mxu1 %v1034_v3  ;;  %944 = vmatprep.subr.bf16.mxu0 %v1035_v4  ;;  %v1043_v12 = vld [vmem:[%s1392_s1 + $0x58] sm:$0xff]   ;;  %v1047_v16 = vld [vmem:[%s1392_s1 + $0x60] sm:$0xff]   ;;  %v1051_v21 = vld [vmem:[%s1392_s1 + $0x68] sm:$0xff]   ;;  %v32_v36 = vsub.s32 2, %v1212_v25  ;;  %v44_v40 = vsub.s32 5, %v1212_v25  ;;  %v52_v41 = vsub.s32 7, %v1212_v25 }
   0x6   :  { %966 = vmatprep.subr.bf16.mxu1 %v1036_v5  ;;  %v1044_v13 = vld [vmem:[%s1392_s1 + $0xd8] sm:$0xff]   ;;  %v1048_v17 = vld [vmem:[%s1392_s1 + $0xe0] sm:$0xff]   ;;  %v1052_v22 = vld [vmem:[%s1392_s1 + $0xe8] sm:$0xff]  }
   0x7   :  { %v1045_v14 = vld [vmem:[%s1392_s1 + $0x18] sm:$0xff]   ;;  %v1049_v18 = vld [vmem:[%s1392_s1 + $0x20] sm:$0xff]   ;;  %v1053_v23 = vld [vmem:[%s1392_s1 + $0x28] sm:$0xff]  }
   0x8   :  { %945 = vmatpush3.bf16.msra.mxu0 %v1037_v6  ;;  %v1046_v15 = vld [vmem:[%s1392_s1 + $0x98] sm:$0xff]   ;;  %v1050_v19 = vld [vmem:[%s1392_s1 + $0xa0] sm:$0xff]   ;;  %v1054_v24 = vld [vmem:[%s1392_s1 + $0xa8] sm:$0xff]  }
   0x9   :  { %967 = vmatpush3.bf16.msra.mxu1 %v1038_v7  ;;  %946 = vmatprep.subr.bf16.mxu0 %v1039_v8  ;;  %v1055_v26 = vld [vmem:[%s1392_s1 + $0x70] sm:$0xff]   ;;  %v1059_v31 = vld [vmem:[%s1392_s1 + $0x78] sm:$0xff]   ;;  %v1245_v38 = vld [vmem:[%s1391_s0] sm:$0xff] }
   0xa   :  { %968 = vmatprep.subr.bf16.mxu1 %v1040_v9  ;;  %v1056_v27 = vld [vmem:[%s1392_s1 + $0xf0] sm:$0xff]   ;;  %v1060_v33 = vld [vmem:[%s1392_s1 + $0xf8] sm:$0xff]   ;;  %v1250_v39 = vld [vmem:[%s1391_s0 + $0x8] sm:$0xff]  ;;  %v29_v42 = vrot.slane %v1245_v38, %v28_v30  ;;  %v37_v44 = vrot.slane %v1245_v38, %v36_v32  ;;  %v25_v47 = vrot.slane %v1245_v38, %v24_v34  ;;  %v33_v49 = vrot.slane %v1245_v38, %v32_v36 }
   0xb   :  { %v1057_v28 = vld [vmem:[%s1392_s1 + $0x30] sm:$0xff]   ;;  %v1061_v35 = vld [vmem:[%s1392_s1 + $0x38] sm:$0xff]   ;;  %v61_v43 = vrot.slane %v1250_v39, %v28_v30  ;;  %v69_v45 = vrot.slane %v1250_v39, %v36_v32  ;;  %v1063_v46 = vld [vmem:[%s1392_s1 + $0x140] sm:$0xff]   ;;  %v57_v48 = vrot.slane %v1250_v39, %v24_v34  ;;  %v65_v50 = vrot.slane %v1250_v39, %v32_v36 }
   0xc   :  { %947 = vmatpush3.bf16.msra.mxu0 %v1041_v10  ;;  %v1058_v29 = vld [vmem:[%s1392_s1 + $0xb0] sm:$0xff]   ;;  %v1062_v37 = vld [vmem:[%s1392_s1 + $0xb8] sm:$0xff]   ;;  %v1064_v51 = vld [vmem:[%s1392_s1 + $0x1c0] sm:$0xff]   ;;  %v103_v52 = vpack.c.bf16 %v29_v42, %v29_v42  ;;  %v105_v54 = vpack.c.bf16 %v37_v44, %v37_v44  ;;  %v102_v56 = vpack.c.bf16 %v25_v47, %v25_v47  ;;  %v104_v58 = vpack.c.bf16 %v33_v49, %v33_v49 }
   0xd   :  { %969 = vmatpush3.bf16.msra.mxu1 %v1042_v11  ;;  %948 = vmatprep.subr.bf16.mxu0 %v1043_v12  ;;  %v111_v53 = vpack.c.bf16 %v61_v43, %v61_v43  ;;  %v113_v55 = vpack.c.bf16 %v69_v45, %v69_v45  ;;  %v110_v57 = vpack.c.bf16 %v57_v48, %v57_v48  ;;  %v1065_v10 = vld [vmem:[%s1392_s1 + $0x100] sm:$0xff]   ;;  %v1070_v32 = vld [vmem:[%s1392_s1 + $0x188] sm:$0xff]   ;;  %v1071_v34 = vld [vmem:[%s1392_s1 + $0x150] sm:$0xff]   ;;  %v40_v45 = vsub.s32 4, %v1212_v25 }
   0xe   :  { %970 = vmatprep.subr.bf16.mxu1 %v1044_v13  ;;  %v112_v59 = vpack.c.bf16 %v65_v50, %v65_v50  ;;  %v270_v60 = vunpack.c.l.b16 %v103_v52  ;;  %v272_v62 = vunpack.c.l.b16 %v105_v54  ;;  %v269_v0 = vunpack.c.l.b16 %v102_v56  ;;  %v1074_v44 = vld [vmem:[%s1392_s1 + $0x190] sm:$0xff]   ;;  %v1076_v49 = vld [vmem:[%s1392_s1 + $0x1d8] sm:$0xff]   ;;  %v1081_v56 = vld [vmem:[%s1392_s1 + $0x120] sm:$0xff]  }
   0xf   :  { %v278_v61 = vunpack.c.l.b16 %v111_v53  ;;  %v280_v63 = vunpack.c.l.b16 %v113_v55  ;;  %v277_v1 = vunpack.c.l.b16 %v110_v57  ;;  %v271_v2 = vunpack.c.l.b16 %v104_v58  ;;  %v1078_v52 = vld [vmem:[%s1392_s1 + $0x198] sm:$0xff]   ;;  %v1080_v55 = vld [vmem:[%s1392_s1 + $0x1e0] sm:$0xff]  }
  0x10   :  { %949 = vmatpush3.bf16.msra.mxu0 %v1045_v14  ;;  %v279_v3 = vunpack.c.l.b16 %v112_v59  ;;  %v45_v6 = vrot.slane %v1245_v38, %v44_v40  ;;  %v77_v7 = vrot.slane %v1250_v39, %v44_v40  ;;  %v53_v11 = vrot.slane %v1245_v38, %v52_v41  ;;  %v1082_v57 = vld [vmem:[%s1392_s1 + $0x1a0] sm:$0xff]  }
  0x11   :  { %971 = vmatpush3.bf16.msra.mxu1 %v1046_v15  ;;  %950 = vmatprep.subr.bf16.mxu0 %v1047_v16  ;;  %v288_v4 = vrot.slane %v278_v61, 7  ;;  %v292_v5 = vrot.slane %v280_v63, 7  ;;  %v285_v8 = vrot.slane %v277_v1, 7  ;;  %v85_v12 = vrot.slane %v1250_v39, %v52_v41  ;;  %v1066_v15 = vld [vmem:[%s1392_s1 + $0x180] sm:$0xff]   ;;  %v1073_v41 = vld [vmem:[%s1392_s1 + $0x110] sm:$0xff]   ;;  %v1085_v63 = vld [vmem:[%s1392_s1 + $0x128] sm:$0xff]  }
  0x12   :  { %972 = vmatprep.subr.bf16.mxu1 %v1048_v17  ;;  %v290_v9 = vrot.slane %v279_v3, 7  ;;  %v107_v16 = vpack.c.bf16 %v45_v6, %v45_v6  ;;  %v115_v17 = vpack.c.bf16 %v77_v7, %v77_v7  ;;  %v109_v30 = vpack.c.bf16 %v53_v11, %v53_v11 }
  0x13   :  { %v289_v13 = vsel %vm286_vm0, %v288_v4, %v270_v60  ;;  %v293_v14 = vsel %vm286_vm0, %v292_v5, %v272_v62  ;;  %v287_v20 = vsel %vm286_vm0, %v285_v8, %v269_v0  ;;  %v48_v48 = vsub.s32 6, %v1212_v25  ;;  %v1079_v25 = vld [vmem:[%s1392_s1 + $0x160] sm:$0xff]   ;;  %v1084_v62 = vld [vmem:[%s1392_s1 + $0x1e8] sm:$0xff]   ;;  %v1088_v5 = vld [vmem:[%s1392_s1 + $0x1f0] sm:$0xff]  }
  0x14   :  { %951 = vmatpush3.bf16.msra.mxu0 %v1049_v18  ;;  %v303_v18 = vpack.c.b16 %v289_v13, %v289_v13  ;;  %v73_v53 = vrot.slane %v1250_v39, %v40_v45  ;;  %v41_v58 = vrot.slane %v1245_v38, %v40_v45  ;;  %v1086_v0 = vld [vmem:[%s1392_s1 + $0x1a8] sm:$0xff]  }
  0x15   :  { %973 = vmatpush3.bf16.msra.mxu1 %v1050_v19  ;;  %952 = vmatprep.subr.bf16.mxu0 %v1051_v21  ;;  %v305_v19 = vpack.c.b16 %v293_v14, %v293_v14  ;;  %v291_v21 = vsel %vm286_vm0, %v290_v9, %v271_v2  ;;  %v81_v54 = vrot.slane %v1250_v39, %v48_v48  ;;  %v1083_v39 = vld [vmem:[%s1392_s1 + $0x168] sm:$0xff]  }
  0x16   :  { %974 = vmatprep.subr.bf16.mxu1 %v1052_v22  ;;  %v1067_v22 = vld [vmem:[%s1392_s1 + $0x148] sm:$0xff]   ;;  %734 = vmatprep.mubr.bf16.mxu0 %v303_v18  ;;  %v114_v59 = vpack.c.bf16 %v73_v53, %v73_v53  ;;  %v49_v60 = vrot.slane %v1245_v38, %v48_v48  ;;  %v1087_v38 = vld [vmem:[%s1392_s1 + $0x170] sm:$0xff]   ;;  %v106_v1 = vpack.c.bf16 %v41_v58, %v41_v58 }
  0x17   :  { %774 = vmatprep.mubr.bf16.mxu1 %v305_v19  ;;  %v116_v61 = vpack.c.bf16 %v81_v54, %v81_v54 }
  0x18   :  { %953 = vmatpush3.bf16.msra.mxu0 %v1053_v23  ;;  %v302_v23 = vpack.c.b16 %v287_v20, %v287_v20  ;;  %v281_v2 = vunpack.c.l.b16 %v114_v59  ;;  %v108_v3 = vpack.c.bf16 %v49_v60, %v49_v60 }
  0x19   :  { %975 = vmatpush3.bf16.msra.mxu1 %v1054_v24  ;;  %954 = vmatprep.subr.bf16.mxu0 %v1055_v26  ;;  %v304_v24 = vpack.c.b16 %v291_v21, %v291_v21  ;;  %v1068_v26 = vld [vmem:[%s1392_s1 + $0x1c8] sm:$0xff]   ;;  %v283_v4 = vunpack.c.l.b16 %v116_v61 }
  0x1a   :  { %976 = vmatprep.subr.bf16.mxu1 %v1056_v27  ;;  %v274_v27 = vunpack.c.l.b16 %v107_v16 }
  0x1c   :  { %955 = vmatpush3.bf16.msra.mxu0 %v1057_v28  ;;  %v282_v28 = vunpack.c.l.b16 %v115_v17 }
  0x1d   :  { %977 = vmatpush3.bf16.msra.mxu1 %v1058_v29  ;;  %956 = vmatprep.subr.bf16.mxu0 %v1059_v31  ;;  %v1069_v29 = vld [vmem:[%s1392_s1 + $0x108] sm:$0xff]   ;;  %v117_v31 = vpack.c.bf16 %v85_v12, %v85_v12 }
  0x1e   :  { %978 = vmatprep.subr.bf16.mxu1 %v1060_v33  ;;  %v296_v33 = vrot.slane %v282_v28, 7 }
  0x1f   :  { %v284_v36 = vunpack.c.l.b16 %v117_v31 }
  0x20   :  { %957 = vmatpush3.bf16.msra.mxu0 %v1061_v35  ;;  %v276_v35 = vunpack.c.l.b16 %v109_v30  ;;  %v297_v40 = vsel %vm286_vm0, %v296_v33, %v274_v27 }
  0x21   :  { %979 = vmatpush3.bf16.msra.mxu1 %v1062_v37  ;;  %986 = vmatprep.subr.bf16.mxu0 %v1063_v46  ;;  %v1072_v37 = vld [vmem:[%s1392_s1 + $0x1d0] sm:$0xff]   ;;  %v307_v42 = vpack.c.b16 %v297_v40, %v297_v40  ;;  %v300_v43 = vrot.slane %v284_v36, 7  ;;  %v1075_v46 = vld [vmem:[%s1392_s1 + $0x158] sm:$0xff]  }
  0x22   :  { %1008 = vmatprep.subr.bf16.mxu1 %v1064_v51  ;;  %v1077_v51 = vld [vmem:[%s1392_s1 + $0x118] sm:$0xff]  }
  0x23   :  { %735 = vmatmul.mubr.bf16.vlgmr.msra.gmra.mrb[0].mxu0 %v302_v23  ;;  %v301_v47 = vsel %vm286_vm0, %v300_v43, %v276_v35 }
  0x24   :  { %775 = vmatmul.mubr.bf16.vlgmr.msra.gmra.mrb[0].mxu1 %v304_v24  ;;  %987 = vmatpush3.bf16.msra.mxu0 %v1065_v10  ;;  %v309_v50 = vpack.c.b16 %v301_v47, %v301_v47 }
  0x25   :  { %1009 = vmatpush3.bf16.msra.mxu1 %v1066_v15  ;;  %988 = vmatprep.subr.bf16.mxu0 %v1067_v22 }
  0x26   :  { %1010 = vmatprep.subr.bf16.mxu1 %v1068_v26  ;;  %814 = vmatprep.mubr.bf16.mxu0 %v307_v42 }
  0x27   :  { %854 = vmatprep.mubr.bf16.mxu1 %v309_v50 }
  0x28   :  { %989 = vmatpush3.bf16.msra.mxu0 %v1069_v29 }
  0x29   :  { %1011 = vmatpush3.bf16.msra.mxu1 %v1070_v32  ;;  %990 = vmatprep.subr.bf16.mxu0 %v1071_v34 }
  0x2a   :  { %1012 = vmatprep.subr.bf16.mxu1 %v1072_v37 }
  0x2c   :  { %991 = vmatpush3.bf16.msra.mxu0 %v1073_v41 }
  0x2d   :  { %1013 = vmatpush3.bf16.msra.mxu1 %v1074_v44  ;;  %992 = vmatprep.subr.bf16.mxu0 %v1075_v46 }
  0x2e   :  { %1014 = vmatprep.subr.bf16.mxu1 %v1076_v49 }
  0x30   :  { %993 = vmatpush3.bf16.msra.mxu0 %v1077_v51 }
  0x31   :  { %1015 = vmatpush3.bf16.msra.mxu1 %v1078_v52  ;;  %994 = vmatprep.subr.bf16.mxu0 %v1079_v25 }
  0x32   :  { %1016 = vmatprep.subr.bf16.mxu1 %v1080_v55 }
  0x34   :  { %995 = vmatpush3.bf16.msra.mxu0 %v1081_v56 }
  0x35   :  { %1017 = vmatpush3.bf16.msra.mxu1 %v1082_v57  ;;  %996 = vmatprep.subr.bf16.mxu0 %v1083_v39 }
  0x36   :  { %1018 = vmatprep.subr.bf16.mxu1 %v1084_v62 }
  0x37   :  { %8 = vsyncpa [#allocation3], 0  ;;  %v1089_v6 = vld [vmem:[%s1392_s1 + $0x130] sm:$0xff]   ;;  %v273_v8 = vunpack.c.l.b16 %v106_v1  ;;  %v294_v9 = vrot.slane %v281_v2, 7  ;;  %v275_v10 = vunpack.c.l.b16 %v108_v3  ;;  %v298_v11 = vrot.slane %v283_v4, 7  ;;  %v1091_v12 = vld [vmem:[%s1392_s1 + $0x178] sm:$0xff]  }
  0x38   :  { %997 = vmatpush3.bf16.msra.mxu0 %v1085_v63  ;;  %v1090_v7 = vld [vmem:[%s1392_s1 + $0x1b0] sm:$0xff]   ;;  %v1092_v13 = vld [vmem:[%s1392_s1 + $0x1f8] sm:$0xff]   ;;  %v877_v22 = vld [vmem:[%s1393_s2] ss:$0 sm:$0xff] }
  0x39   :  { %1019 = vmatpush3.bf16.msra.mxu1 %v1086_v0  ;;  %998 = vmatprep.subr.bf16.mxu0 %v1087_v38  ;;  %v1093_v14 = vld [vmem:[%s1392_s1 + $0x138] sm:$0xff]   ;;  %v295_v16 = vsel %vm286_vm0, %v294_v9, %v273_v8  ;;  %v299_v17 = vsel %vm286_vm0, %v298_v11, %v275_v10 }
  0x3a   :  { %1020 = vmatprep.subr.bf16.mxu1 %v1088_v5  ;;  %v1094_v15 = vld [vmem:[%s1392_s1 + $0x1b8] sm:$0xff]   ;;  %v306_v18 = vpack.c.b16 %v295_v16, %v295_v16  ;;  %v308_v19 = vpack.c.b16 %v299_v17, %v299_v17  ;;  %s1119_s1 = smov [#allocation2]  }
  0x3b   :  { %s869_s2 = sshll.u32 %s1119_s1, 4  ;;  %s870_s2 = int_to_ptr.vmem [resolvable:$true] %s869_s2 }
  0x3c   :  { %999 = vmatpush3.bf16.msra.mxu0 %v1089_v6  ;;  %s1095_s8 = scalar_lea.vmem %s870_s2, 32  ;;  %p1100_p1 = scmp.lt.s32.totalorder %s870_s2, %s870_s2 }
  0x3d   :  { %1021 = vmatpush3.bf16.msra.mxu1 %v1090_v7  ;;  %1000 = vmatprep.subr.bf16.mxu0 %v1091_v12  ;;  %p1096_p0 = scmp.ne.s32.totalorder %s870_s2, %s1095_s8  ;;  %p1101_p2 = scmp.lt.s32.totalorder %s1095_s8, %s1095_s8 }
  0x3e   :  { %1022 = vmatprep.subr.bf16.mxu1 %v1092_v13 }
  0x3f   :  { %p1102_p3 = por %p1101_p2, %p1100_p1 }
  0x40   :  { %1001 = vmatpush3.bf16.msra.mxu0 %v1093_v14 }
  0x41   :  { %1023 = vmatpush3.bf16.msra.mxu1 %v1094_v15  ;;  %p1103_p4 = pnand %p1102_p3, %p1096_p0 }
  0x43   :  { %815 = vmatmul.mubr.bf16.vlgmr.msra.gmra.mrb[4].mxu0 %v306_v18 }
  0x44   :  { %855 = vmatmul.mubr.bf16.vlgmr.msra.gmra.mrb[4].mxu1 %v308_v19 }
  0xf6   :  { %v958_v20 = vpop.f32.mrb[0].mxu0 }
  0xf7   :  { %v980_v21 = vpop.f32.mrb[0].mxu1  ;;  %v959_v23 = vpop.f32.mrb[1].mxu0 }
  0xf8   :  { %v981_v24 = vpop.f32.mrb[1].mxu1  ;;  %v960_v26 = vadd.f32 %v959_v23, %v958_v20  ;;  %v961_v28 = vpop.f32.mrb[2].mxu0 }
  0xf9   :  { %v982_v27 = vadd.f32 %v981_v24, %v980_v21  ;;  %v983_v29 = vpop.f32.mrb[2].mxu1  ;;  %v962_v30 = vpop.f32.mrb[3].mxu0 }
  0xfa   :  { %v984_v31 = vpop.f32.mrb[3].mxu1  ;;  %v737_v32 = vadd.f32 %v960_v26, %v877_v22 }
  0xfc   :  { %v777_v33 = vadd.f32 %v982_v27, %v737_v32 }
 0x116   :  { %v1002_v34 = vpop.f32.mrb[4].mxu0 }
 0x117   :  { %v1024_v35 = vpop.f32.mrb[4].mxu1  ;;  %v1003_v36 = vpop.f32.mrb[5].mxu0 }
 0x118   :  { %v1025_v37 = vpop.f32.mrb[5].mxu1  ;;  %v1004_v40 = vadd.f32 %v1003_v36, %v1002_v34  ;;  %v1005_v42 = vpop.f32.mrb[6].mxu0 }
 0x119   :  { %v1026_v41 = vadd.f32 %v1025_v37, %v1024_v35  ;;  %v1027_v43 = vpop.f32.mrb[6].mxu1  ;;  %v1006_v44 = vpop.f32.mrb[7].mxu0 }
 0x11a   :  { %v1028_v45 = vpop.f32.mrb[7].mxu1  ;;  %v817_v46 = vadd.f32 %v1004_v40, %v777_v33 }
 0x11c   :  { %v857_v47 = vadd.f32 %v1026_v41, %v817_v46 }
 0x11e   :  { %862 = vst [vmem:[#allocation2] sm:$0x3] %v857_v47 }
 0x11f   :  { %1106 = shalt.err (!%p1103_p4)
}
 0x120   :  { %s1107_s11 = scalar_lea.hbm %s1394_s3, 32 }
 0x121   :  { %p1108_p5 = scmp.ne.s32.totalorder %s1394_s3, %s1107_s11  ;;  %p1111_p6 = scmp.lt.u32.totalorder %s1107_s11, %s1394_s3 }
 0x123   :  { %p1113_p7 = pnand %p1111_p6, %p1108_p5 }
 0x125   :  { %1116 = shalt.err (!%p1113_p7)
}
 0x126   :  { %872 = dma.vmem_to_hbm [thread:$0]  %s870_s2, 32, %s1394_s3, [#allocation3]  }
 0x127   :  { %1117 = dma.done.wait [#allocation3], 32  }
 0x128   :  { %1118 = vsyncadd [#allocation3], 4294967264 }
 0x129   :  { %876 = vsyncpa [#allocation3], 1 }

</bundles_post_ra>
